<compile_context>
chip_gen: v5e
topology: v5e:2x2
jax: 0.10.0
libtpu: 0.0.40
codegen_flags: <defaults>
</compile_context>

<pallas_src>
import functools
import math

import jax
import jax.numpy as jnp
from jax import lax
from jax.experimental import pallas as pl
from jax.experimental.pallas import tpu as pltpu


def _conv3d_gn_kernel(x_ref, w_ref, proj_ref, gamma_ref, beta_ref, o_ref, *,
                      ksize, out_d, out_h, eps, inv_count, block_n):
    """Fused Conv3d (stride=1) + GroupNorm for a block of `block_n` samples.

    x_ref:     (B, Dp, Hp, KP)      padded input, bf16; KP = Wp*Cin rounded to 128
    w_ref:     (K*K, KP, OWC)       banded (Toeplitz-in-W) weights, bf16
    proj_ref:  (OWC, OWC)           0/1 "same GroupNorm group" projection, f32
    gamma_ref: (1, OWC)             per-channel gamma tiled over W, f32
    beta_ref:  (1, OWC)             per-channel beta tiled over W, f32
    o_ref:     (B, D*H, OWC)        output block (lane-dense), f32
    """
    dh = out_d * out_h
    kp = x_ref.shape[-1]

    for b in range(block_n):
        # --- 3-D conv as 9 (kd, kh) matmuls against the banded weight. ---
        # Accumulate in vregs; initialize with the first tap's dot (no zero fill,
        # no VMEM round trips).
        acc = None
        for kd in range(ksize):
            for kh in range(ksize):
                patch = x_ref[b, kd:kd + out_d, kh:kh + out_h, :]
                patch2 = patch.reshape(dh, kp)          # lane-aligned (KP % 128 == 0)
                part = jnp.dot(patch2, w_ref[kd * ksize + kh],
                               preferred_element_type=jnp.float32)
                acc = part if acc is None else acc + part

        # --- GroupNorm (per sample), two-pass (centered) variance. ---
        # Group reduction via one precomputed 0/1 same-group projection
        # (single tiny dot per statistic; negligible at this size).
        col_sum = jnp.sum(acc, axis=0, keepdims=True)                  # (1, OWC)
        mean_lane = jnp.dot(col_sum, proj_ref[...],
                            preferred_element_type=jnp.float32) * inv_count
        centered = acc - mean_lane
        col_sq = jnp.sum(centered * centered, axis=0, keepdims=True)   # (1, OWC)
        var_lane = jnp.dot(col_sq, proj_ref[...],
                           preferred_element_type=jnp.float32) * inv_count

        # folded affine: y = centered * (gamma * rsqrt(var+eps)) + beta
        scale = gamma_ref[...] * lax.rsqrt(var_lane + eps)
        o_ref[b] = (centered * scale + beta_ref[...]).astype(o_ref.dtype)


def convbn3d_forward(x, weight, gamma, beta, *, stride=1, pad=1,
                     num_groups=4, eps=1e-5):
    """Forward matching ConvBn3D: Conv3d(bias=False) -> GroupNorm(affine).

    x      : (N, Cin, D, H, W)       NCDHW input
    weight : (Cout, Cin, K, K, K)    PyTorch Conv3d weight layout
    returns: (N, Cout, OD, OH, OW)   NCDHW, float32
    """
    N, Cin, D, H, W = x.shape
    Cout, Cin_w, K, _, _ = weight.shape
    assert Cin_w == Cin
    assert Cout % num_groups == 0
    # TODO(synk): only stride=1 (the module default) is implemented here.
    assert stride == 1

    out_d = D + 2 * pad - K + 1
    out_h = H + 2 * pad - K + 1
    out_w = W + 2 * pad - K + 1
    Dp, Hp, Wp = D + 2 * pad, H + 2 * pad, W + 2 * pad
    Cg = Cout // num_groups
    owc = out_w * Cout
    dh = out_d * out_h

    # Pad the folded contraction dim (Wp*Cin) up to a multiple of 128 so every
    # patch slice / reshape is lane-aligned and the bf16 RHS sublane dim is a
    # multiple of 16.
    kdim = Wp * Cin
    kp = -(-kdim // 128) * 128
    kpad = kp - kdim

    # NCDHW -> NDHWC, spatial zero-pad, fold (W, Cin) into the lane dim, zero-pad
    # that dim to kp, cast bf16.
    # TODO(synk): if adjacent ops adopted the lane-dense (N, D*H, W*C) layout this
    # transpose+pad preamble and the epilogue transpose could be dropped.
    x_ndhwc = jnp.transpose(x, (0, 2, 3, 4, 1)).astype(jnp.float32)
    x_pad = jnp.pad(x_ndhwc, ((0, 0), (pad, pad), (pad, pad), (pad, pad), (0, 0)))
    x_pad = x_pad.reshape(N, Dp, Hp, kdim)
    x_pad = jnp.pad(x_pad, ((0, 0), (0, 0), (0, 0), (0, kpad)))
    x_pad = x_pad.astype(jnp.bfloat16)

    # Banded (Toeplitz-in-W) weight built with a single one-hot einsum:
    #   w_band[kd*K+kh, q*Cin+ci, w*Cout+co] = weight[co, ci, kd, kh, q-w]
    wt = jnp.transpose(weight, (2, 3, 4, 1, 0)).reshape(K * K, K, Cin, Cout)
    wt = wt.astype(jnp.float32)
    sel = (jnp.arange(Wp)[None, :, None]
           == jnp.arange(out_w)[None, None, :] + jnp.arange(K)[:, None, None])
    sel = sel.astype(jnp.float32)                                  # (K, Wp, out_w)
    w_band = jnp.einsum('kqw,pkio->pqiwo', sel, wt)                # (KK,Wp,Cin,OW,Cout)
    w_band = w_band.reshape(K * K, kdim, owc)
    w_band = jnp.pad(w_band, ((0, 0), (0, kpad), (0, 0))).astype(jnp.bfloat16)
    # TODO(synk): for large out_w*Cout (v7x 64 MiB VMEM) tile the band / output
    # over out_w with an extra 'parallel' grid axis instead of keeping the whole
    # band resident; with the demo config owc == 128 so no tiling is needed.

    # Per-lane affine params and the 0/1 same-group projection matrix.
    gamma_lane = jnp.tile(gamma.astype(jnp.float32), out_w)[None, :]   # (1, OWC)
    beta_lane = jnp.tile(beta.astype(jnp.float32), out_w)[None, :]     # (1, OWC)
    grp = jnp.tile(jnp.arange(Cout), out_w) // Cg                      # (OWC,)
    proj = (grp[:, None] == grp[None, :]).astype(jnp.float32)          # (OWC, OWC)

    inv_count = 1.0 / float(out_d * out_h * out_w * Cg)

    # --- choose samples per grid step (block_n) under an explicit VMEM budget ---
    x_blk_1 = Dp * Hp * kp * 2            # bf16 per-sample input block
    out_blk_1 = dh * owc * 4              # f32 per-sample output block
    fixed = 2 * (w_band.size * 2 + proj.size * 4
                 + gamma_lane.size * 4 + beta_lane.size * 4)
    budget = 24 * 1024 * 1024             # conservative; fits v7x's 64 MiB easily
    block_n = 1
    for b in range(1, min(N, 8) + 1):
        if N % b:
            continue
        if fixed + 2 * b * (x_blk_1 + out_blk_1) <= budget:
            block_n = b
    needed = fixed + 2 * block_n * (x_blk_1 + out_blk_1)
    vmem_limit = int(min(max(2 * needed, 16 * 1024 * 1024), 48 * 1024 * 1024))

    kernel = functools.partial(_conv3d_gn_kernel, ksize=K, out_d=out_d,
                               out_h=out_h, eps=eps, inv_count=inv_count,
                               block_n=block_n)

    out_flat = pl.pallas_call(
        kernel,
        out_shape=jax.ShapeDtypeStruct((N, dh, owc), jnp.float32),
        grid=(N // block_n,),
        in_specs=[
            pl.BlockSpec((block_n, Dp, Hp, kp), lambda n: (n, 0, 0, 0)),
            pl.BlockSpec((K * K, kp, owc), lambda n: (0, 0, 0)),
            pl.BlockSpec((owc, owc), lambda n: (0, 0)),
            pl.BlockSpec((1, owc), lambda n: (0, 0)),
            pl.BlockSpec((1, owc), lambda n: (0, 0)),
        ],
        out_specs=pl.BlockSpec((block_n, dh, owc), lambda n: (n, 0, 0)),
        compiler_params=pltpu.CompilerParams(
            dimension_semantics=("parallel",),
            vmem_limit_bytes=vmem_limit),
    )(x_pad, w_band, proj, gamma_lane, beta_lane)

    out = out_flat.reshape(N, out_d, out_h, out_w, Cout)
    return jnp.transpose(out, (0, 4, 1, 2, 3))      # NCDHW


def _reference_forward(x, weight, gamma, beta, *, stride=1, pad=1,
                       num_groups=4, eps=1e-5):
    """Pure-JAX (f32) reference: lax conv3d + GroupNorm."""
    y = lax.conv_general_dilated(
        x.astype(jnp.float32), weight.astype(jnp.float32),
        window_strides=(stride,) * 3, padding=((pad, pad),) * 3,
        dimension_numbers=('NCDHW', 'OIDHW', 'NCDHW'))
    N, Cout, D, H, W = y.shape
    yg = y.reshape(N, num_groups, Cout // num_groups, D, H, W)
    mean = jnp.mean(yg, axis=(2, 3, 4, 5), keepdims=True)
    var = jnp.mean((yg - mean) ** 2, axis=(2, 3, 4, 5), keepdims=True)
    yn = ((yg - mean) / jnp.sqrt(var + eps)).reshape(N, Cout, D, H, W)
    return yn * gamma.reshape(1, Cout, 1, 1, 1) + beta.reshape(1, Cout, 1, 1, 1)


if __name__ == "__main__":
    # Small config consistent with ConvBn3D(in=4, out=8, kernel=3, stride=1, pad=1, gn_group=4)
    N, Cin, Cout, D, H, W, K = 2, 4, 8, 8, 16, 16, 3
    stride, pad, gn_group = 1, 1, 4

    key = jax.random.PRNGKey(0)
    kx, kw, kg, kb = jax.random.split(key, 4)
    x = jax.random.normal(kx, (N, Cin, D, H, W), dtype=jnp.float32)

    # kaiming_uniform_(a=sqrt(5))-style Conv3d init: bound = 1/sqrt(fan_in)
    fan_in = Cin * K * K * K
    bound = math.sqrt(1.0 / fan_in)
    weight = jax.random.uniform(kw, (Cout, Cin, K, K, K), dtype=jnp.float32,
                                minval=-bound, maxval=bound)
    gamma = 1.0 + 0.1 * jax.random.normal(kg, (Cout,), dtype=jnp.float32)
    beta = 0.1 * jax.random.normal(kb, (Cout,), dtype=jnp.float32)

    out = convbn3d_forward(x, weight, gamma, beta, stride=stride, pad=pad,
                           num_groups=gn_group, eps=1e-5)
    out = jax.block_until_ready(out)

    ref = _reference_forward(x, weight, gamma, beta, stride=stride, pad=pad,
                             num_groups=gn_group, eps=1e-5)
    ref = jax.block_until_ready(ref)

    assert out.shape == (N, Cout, D, H, W), out.shape
    max_err = float(jnp.max(jnp.abs(out - ref)))
    # bf16 matmul inputs with f32 accumulation: allow a small tolerance.
    assert max_err < 5e-2, f"max abs error vs reference: {max_err}"

    print("KERNEL_OK")
</pallas_src>

<mosaic_0001>
module attributes {stable_mosaic.version = 11 : i64} {
  func.func @_conv3d_gn_kernel(%arg0: i32, %arg1: memref<2x10x18x128xbf16, #tpu.memory_space<vmem>>, %arg2: memref<9x128x128xbf16, #tpu.memory_space<vmem>>, %arg3: memref<128x128xf32, #tpu.memory_space<vmem>>, %arg4: memref<1x128xf32, #tpu.memory_space<vmem>>, %arg5: memref<1x128xf32, #tpu.memory_space<vmem>>, %arg6: memref<2x128x128xf32, #tpu.memory_space<vmem>>) attributes {dimension_semantics = [#tpu.dimension_semantics<parallel>], iteration_bounds = array<i64: 1>, scalar_prefetch = 0 : i64, scratch_operands = 0 : i64, tpu.core_type = #tpu.core_type<tc>, window_params = [{transform_indices = @transform_0, window_bounds = array<i64: 2, 10, 18, 128>}, {pipeline_mode = #tpu.pipeline_mode<synchronous>, transform_indices = @transform_1, window_bounds = array<i64: 9, 128, 128>}, {pipeline_mode = #tpu.pipeline_mode<synchronous>, transform_indices = @transform_2, window_bounds = array<i64: 128, 128>}, {pipeline_mode = #tpu.pipeline_mode<synchronous>, transform_indices = @transform_3, window_bounds = array<i64: 1, 128>}, {pipeline_mode = #tpu.pipeline_mode<synchronous>, transform_indices = @transform_4, window_bounds = array<i64: 1, 128>}, {transform_indices = @transform_5, window_bounds = array<i64: 2, 128, 128>}]} {
    %c0 = arith.constant 0 : index
    %c0_0 = arith.constant 0 : index
    %c0_1 = arith.constant 0 : index
    %c0_2 = arith.constant 0 : index
    %0 = vector.load %arg1[%c0, %c0_0, %c0_1, %c0_2] : memref<2x10x18x128xbf16, #tpu.memory_space<vmem>>, vector<1x8x16x128xbf16>
    %1 = vector.shape_cast %0 : vector<1x8x16x128xbf16> to vector<8x16x128xbf16>
    %2 = vector.shape_cast %1 : vector<8x16x128xbf16> to vector<128x128xbf16>
    %c0_3 = arith.constant 0 : index
    %c0_4 = arith.constant 0 : index
    %c0_5 = arith.constant 0 : index
    %3 = vector.load %arg2[%c0_3, %c0_4, %c0_5] : memref<9x128x128xbf16, #tpu.memory_space<vmem>>, vector<1x128x128xbf16>
    %4 = vector.shape_cast %3 : vector<1x128x128xbf16> to vector<128x128xbf16>
    %cst = arith.constant dense<0.000000e+00> : vector<128x128xf32>
    %5 = tpu.matmul %2, %4, %cst {dimension_numbers = #tpu.dot_dimension_numbers<[1], [0], [0], [1], [0, 0, 1, 1], [], []>} : vector<128x128xbf16>, vector<128x128xbf16>, vector<128x128xf32> -> vector<128x128xf32>
    %c0_6 = arith.constant 0 : index
    %c0_7 = arith.constant 0 : index
    %c1 = arith.constant 1 : index
    %c0_8 = arith.constant 0 : index
    %6 = vector.load %arg1[%c0_6, %c0_7, %c1, %c0_8] : memref<2x10x18x128xbf16, #tpu.memory_space<vmem>>, vector<1x8x16x128xbf16>
    %7 = vector.shape_cast %6 : vector<1x8x16x128xbf16> to vector<8x16x128xbf16>
    %8 = vector.shape_cast %7 : vector<8x16x128xbf16> to vector<128x128xbf16>
    %c1_9 = arith.constant 1 : index
    %c0_10 = arith.constant 0 : index
    %c0_11 = arith.constant 0 : index
    %9 = vector.load %arg2[%c1_9, %c0_10, %c0_11] : memref<9x128x128xbf16, #tpu.memory_space<vmem>>, vector<1x128x128xbf16>
    %10 = vector.shape_cast %9 : vector<1x128x128xbf16> to vector<128x128xbf16>
    %cst_12 = arith.constant dense<0.000000e+00> : vector<128x128xf32>
    %11 = tpu.matmul %8, %10, %cst_12 {dimension_numbers = #tpu.dot_dimension_numbers<[1], [0], [0], [1], [0, 0, 1, 1], [], []>} : vector<128x128xbf16>, vector<128x128xbf16>, vector<128x128xf32> -> vector<128x128xf32>
    %12 = arith.addf %5, %11 : vector<128x128xf32>
    %c0_13 = arith.constant 0 : index
    %c0_14 = arith.constant 0 : index
    %c2 = arith.constant 2 : index
    %c0_15 = arith.constant 0 : index
    %13 = vector.load %arg1[%c0_13, %c0_14, %c2, %c0_15] : memref<2x10x18x128xbf16, #tpu.memory_space<vmem>>, vector<1x8x16x128xbf16>
    %14 = vector.shape_cast %13 : vector<1x8x16x128xbf16> to vector<8x16x128xbf16>
    %15 = vector.shape_cast %14 : vector<8x16x128xbf16> to vector<128x128xbf16>
    %c2_16 = arith.constant 2 : index
    %c0_17 = arith.constant 0 : index
    %c0_18 = arith.constant 0 : index
    %16 = vector.load %arg2[%c2_16, %c0_17, %c0_18] : memref<9x128x128xbf16, #tpu.memory_space<vmem>>, vector<1x128x128xbf16>
    %17 = vector.shape_cast %16 : vector<1x128x128xbf16> to vector<128x128xbf16>
    %cst_19 = arith.constant dense<0.000000e+00> : vector<128x128xf32>
    %18 = tpu.matmul %15, %17, %cst_19 {dimension_numbers = #tpu.dot_dimension_numbers<[1], [0], [0], [1], [0, 0, 1, 1], [], []>} : vector<128x128xbf16>, vector<128x128xbf16>, vector<128x128xf32> -> vector<128x128xf32>
    %19 = arith.addf %12, %18 : vector<128x128xf32>
    %c0_20 = arith.constant 0 : index
    %c1_21 = arith.constant 1 : index
    %c0_22 = arith.constant 0 : index
    %c0_23 = arith.constant 0 : index
    %20 = vector.load %arg1[%c0_20, %c1_21, %c0_22, %c0_23] : memref<2x10x18x128xbf16, #tpu.memory_space<vmem>>, vector<1x8x16x128xbf16>
    %21 = vector.shape_cast %20 : vector<1x8x16x128xbf16> to vector<8x16x128xbf16>
    %22 = vector.shape_cast %21 : vector<8x16x128xbf16> to vector<128x128xbf16>
    %c3 = arith.constant 3 : index
    %c0_24 = arith.constant 0 : index
    %c0_25 = arith.constant 0 : index
    %23 = vector.load %arg2[%c3, %c0_24, %c0_25] : memref<9x128x128xbf16, #tpu.memory_space<vmem>>, vector<1x128x128xbf16>
    %24 = vector.shape_cast %23 : vector<1x128x128xbf16> to vector<128x128xbf16>
    %cst_26 = arith.constant dense<0.000000e+00> : vector<128x128xf32>
    %25 = tpu.matmul %22, %24, %cst_26 {dimension_numbers = #tpu.dot_dimension_numbers<[1], [0], [0], [1], [0, 0, 1, 1], [], []>} : vector<128x128xbf16>, vector<128x128xbf16>, vector<128x128xf32> -> vector<128x128xf32>
    %26 = arith.addf %19, %25 : vector<128x128xf32>
    %c0_27 = arith.constant 0 : index
    %c1_28 = arith.constant 1 : index
    %c1_29 = arith.constant 1 : index
    %c0_30 = arith.constant 0 : index
    %27 = vector.load %arg1[%c0_27, %c1_28, %c1_29, %c0_30] : memref<2x10x18x128xbf16, #tpu.memory_space<vmem>>, vector<1x8x16x128xbf16>
    %28 = vector.shape_cast %27 : vector<1x8x16x128xbf16> to vector<8x16x128xbf16>
    %29 = vector.shape_cast %28 : vector<8x16x128xbf16> to vector<128x128xbf16>
    %c4 = arith.constant 4 : index
    %c0_31 = arith.constant 0 : index
    %c0_32 = arith.constant 0 : index
    %30 = vector.load %arg2[%c4, %c0_31, %c0_32] : memref<9x128x128xbf16, #tpu.memory_space<vmem>>, vector<1x128x128xbf16>
    %31 = vector.shape_cast %30 : vector<1x128x128xbf16> to vector<128x128xbf16>
    %cst_33 = arith.constant dense<0.000000e+00> : vector<128x128xf32>
    %32 = tpu.matmul %29, %31, %cst_33 {dimension_numbers = #tpu.dot_dimension_numbers<[1], [0], [0], [1], [0, 0, 1, 1], [], []>} : vector<128x128xbf16>, vector<128x128xbf16>, vector<128x128xf32> -> vector<128x128xf32>
    %33 = arith.addf %26, %32 : vector<128x128xf32>
    %c0_34 = arith.constant 0 : index
    %c1_35 = arith.constant 1 : index
    %c2_36 = arith.constant 2 : index
    %c0_37 = arith.constant 0 : index
    %34 = vector.load %arg1[%c0_34, %c1_35, %c2_36, %c0_37] : memref<2x10x18x128xbf16, #tpu.memory_space<vmem>>, vector<1x8x16x128xbf16>
    %35 = vector.shape_cast %34 : vector<1x8x16x128xbf16> to vector<8x16x128xbf16>
    %36 = vector.shape_cast %35 : vector<8x16x128xbf16> to vector<128x128xbf16>
    %c5 = arith.constant 5 : index
    %c0_38 = arith.constant 0 : index
    %c0_39 = arith.constant 0 : index
    %37 = vector.load %arg2[%c5, %c0_38, %c0_39] : memref<9x128x128xbf16, #tpu.memory_space<vmem>>, vector<1x128x128xbf16>
    %38 = vector.shape_cast %37 : vector<1x128x128xbf16> to vector<128x128xbf16>
    %cst_40 = arith.constant dense<0.000000e+00> : vector<128x128xf32>
    %39 = tpu.matmul %36, %38, %cst_40 {dimension_numbers = #tpu.dot_dimension_numbers<[1], [0], [0], [1], [0, 0, 1, 1], [], []>} : vector<128x128xbf16>, vector<128x128xbf16>, vector<128x128xf32> -> vector<128x128xf32>
    %40 = arith.addf %33, %39 : vector<128x128xf32>
    %c0_41 = arith.constant 0 : index
    %c2_42 = arith.constant 2 : index
    %c0_43 = arith.constant 0 : index
    %c0_44 = arith.constant 0 : index
    %41 = vector.load %arg1[%c0_41, %c2_42, %c0_43, %c0_44] : memref<2x10x18x128xbf16, #tpu.memory_space<vmem>>, vector<1x8x16x128xbf16>
    %42 = vector.shape_cast %41 : vector<1x8x16x128xbf16> to vector<8x16x128xbf16>
    %43 = vector.shape_cast %42 : vector<8x16x128xbf16> to vector<128x128xbf16>
    %c6 = arith.constant 6 : index
    %c0_45 = arith.constant 0 : index
    %c0_46 = arith.constant 0 : index
    %44 = vector.load %arg2[%c6, %c0_45, %c0_46] : memref<9x128x128xbf16, #tpu.memory_space<vmem>>, vector<1x128x128xbf16>
    %45 = vector.shape_cast %44 : vector<1x128x128xbf16> to vector<128x128xbf16>
    %cst_47 = arith.constant dense<0.000000e+00> : vector<128x128xf32>
    %46 = tpu.matmul %43, %45, %cst_47 {dimension_numbers = #tpu.dot_dimension_numbers<[1], [0], [0], [1], [0, 0, 1, 1], [], []>} : vector<128x128xbf16>, vector<128x128xbf16>, vector<128x128xf32> -> vector<128x128xf32>
    %47 = arith.addf %40, %46 : vector<128x128xf32>
    %c0_48 = arith.constant 0 : index
    %c2_49 = arith.constant 2 : index
    %c1_50 = arith.constant 1 : index
    %c0_51 = arith.constant 0 : index
    %48 = vector.load %arg1[%c0_48, %c2_49, %c1_50, %c0_51] : memref<2x10x18x128xbf16, #tpu.memory_space<vmem>>, vector<1x8x16x128xbf16>
    %49 = vector.shape_cast %48 : vector<1x8x16x128xbf16> to vector<8x16x128xbf16>
    %50 = vector.shape_cast %49 : vector<8x16x128xbf16> to vector<128x128xbf16>
    %c7 = arith.constant 7 : index
    %c0_52 = arith.constant 0 : index
    %c0_53 = arith.constant 0 : index
    %51 = vector.load %arg2[%c7, %c0_52, %c0_53] : memref<9x128x128xbf16, #tpu.memory_space<vmem>>, vector<1x128x128xbf16>
    %52 = vector.shape_cast %51 : vector<1x128x128xbf16> to vector<128x128xbf16>
    %cst_54 = arith.constant dense<0.000000e+00> : vector<128x128xf32>
    %53 = tpu.matmul %50, %52, %cst_54 {dimension_numbers = #tpu.dot_dimension_numbers<[1], [0], [0], [1], [0, 0, 1, 1], [], []>} : vector<128x128xbf16>, vector<128x128xbf16>, vector<128x128xf32> -> vector<128x128xf32>
    %54 = arith.addf %47, %53 : vector<128x128xf32>
    %c0_55 = arith.constant 0 : index
    %c2_56 = arith.constant 2 : index
    %c2_57 = arith.constant 2 : index
    %c0_58 = arith.constant 0 : index
    %55 = vector.load %arg1[%c0_55, %c2_56, %c2_57, %c0_58] : memref<2x10x18x128xbf16, #tpu.memory_space<vmem>>, vector<1x8x16x128xbf16>
    %56 = vector.shape_cast %55 : vector<1x8x16x128xbf16> to vector<8x16x128xbf16>
    %57 = vector.shape_cast %56 : vector<8x16x128xbf16> to vector<128x128xbf16>
    %c8 = arith.constant 8 : index
    %c0_59 = arith.constant 0 : index
    %c0_60 = arith.constant 0 : index
    %58 = vector.load %arg2[%c8, %c0_59, %c0_60] : memref<9x128x128xbf16, #tpu.memory_space<vmem>>, vector<1x128x128xbf16>
    %59 = vector.shape_cast %58 : vector<1x128x128xbf16> to vector<128x128xbf16>
    %cst_61 = arith.constant dense<0.000000e+00> : vector<128x128xf32>
    %60 = tpu.matmul %57, %59, %cst_61 {dimension_numbers = #tpu.dot_dimension_numbers<[1], [0], [0], [1], [0, 0, 1, 1], [], []>} : vector<128x128xbf16>, vector<128x128xbf16>, vector<128x128xf32> -> vector<128x128xf32>
    %61 = arith.addf %54, %60 : vector<128x128xf32>
    %cst_62 = arith.constant dense<0.000000e+00> : vector<128xf32>
    %62 = vector.multi_reduction <add>, %61, %cst_62 [0] : vector<128x128xf32> to vector<128xf32>
    %63 = vector.shape_cast %62 : vector<128xf32> to vector<1x128xf32>
    %c0_63 = arith.constant 0 : index
    %c0_64 = arith.constant 0 : index
    %64 = vector.load %arg3[%c0_63, %c0_64] : memref<128x128xf32, #tpu.memory_space<vmem>>, vector<128x128xf32>
    %cst_65 = arith.constant dense<0.000000e+00> : vector<1x128xf32>
    %65 = tpu.matmul %63, %64, %cst_65 {dimension_numbers = #tpu.dot_dimension_numbers<[1], [0], [0], [1], [0, 0, 1, 1], [], []>} : vector<1x128xf32>, vector<128x128xf32>, vector<1x128xf32> -> vector<1x128xf32>
    %cst_66 = arith.constant 2.44140625E-4 : f32
    %66 = vector.broadcast %cst_66 : f32 to vector<1x128xf32>
    %67 = arith.mulf %65, %66 : vector<1x128xf32>
    %68 = vector.broadcast %67 : vector<1x128xf32> to vector<128x128xf32>
    %69 = arith.subf %61, %68 : vector<128x128xf32>
    %70 = arith.mulf %69, %69 : vector<128x128xf32>
    %cst_67 = arith.constant dense<0.000000e+00> : vector<128xf32>
    %71 = vector.multi_reduction <add>, %70, %cst_67 [0] : vector<128x128xf32> to vector<128xf32>
    %72 = vector.shape_cast %71 : vector<128xf32> to vector<1x128xf32>
    %c0_68 = arith.constant 0 : index
    %c0_69 = arith.constant 0 : index
    %73 = vector.load %arg3[%c0_68, %c0_69] : memref<128x128xf32, #tpu.memory_space<vmem>>, vector<128x128xf32>
    %cst_70 = arith.constant dense<0.000000e+00> : vector<1x128xf32>
    %74 = tpu.matmul %72, %73, %cst_70 {dimension_numbers = #tpu.dot_dimension_numbers<[1], [0], [0], [1], [0, 0, 1, 1], [], []>} : vector<1x128xf32>, vector<128x128xf32>, vector<1x128xf32> -> vector<1x128xf32>
    %cst_71 = arith.constant 2.44140625E-4 : f32
    %75 = vector.broadcast %cst_71 : f32 to vector<1x128xf32>
    %76 = arith.mulf %74, %75 : vector<1x128xf32>
    %c0_72 = arith.constant 0 : index
    %c0_73 = arith.constant 0 : index
    %77 = vector.load %arg4[%c0_72, %c0_73] : memref<1x128xf32, #tpu.memory_space<vmem>>, vector<1x128xf32>
    %cst_74 = arith.constant 9.99999974E-6 : f32
    %78 = vector.broadcast %cst_74 : f32 to vector<1x128xf32>
    %79 = arith.addf %76, %78 : vector<1x128xf32>
    %80 = math.rsqrt %79 : vector<1x128xf32>
    %81 = arith.mulf %77, %80 : vector<1x128xf32>
    %82 = vector.broadcast %81 : vector<1x128xf32> to vector<128x128xf32>
    %83 = arith.mulf %69, %82 : vector<128x128xf32>
    %c0_75 = arith.constant 0 : index
    %c0_76 = arith.constant 0 : index
    %84 = vector.load %arg5[%c0_75, %c0_76] : memref<1x128xf32, #tpu.memory_space<vmem>>, vector<1x128xf32>
    %85 = vector.broadcast %84 : vector<1x128xf32> to vector<128x128xf32>
    %86 = arith.addf %83, %85 : vector<128x128xf32>
    %c0_77 = arith.constant 0 : index
    %c0_78 = arith.constant 0 : index
    %c0_79 = arith.constant 0 : index
    %87 = vector.load %arg6[%c0_77, %c0_78, %c0_79] : memref<2x128x128xf32, #tpu.memory_space<vmem>>, vector<1x128x128xf32>
    %88 = vector.shape_cast %87 : vector<1x128x128xf32> to vector<128x128xf32>
    %89 = vector.shape_cast %86 : vector<128x128xf32> to vector<1x128x128xf32>
    tpu.vector_store %arg6[%c0_77, %c0_78, %c0_79], %89 {strides = array<i32>} : memref<2x128x128xf32, #tpu.memory_space<vmem>>, vector<1x128x128xf32>,
    %c1_80 = arith.constant 1 : index
    %c0_81 = arith.constant 0 : index
    %c0_82 = arith.constant 0 : index
    %c0_83 = arith.constant 0 : index
    %90 = vector.load %arg1[%c1_80, %c0_81, %c0_82, %c0_83] : memref<2x10x18x128xbf16, #tpu.memory_space<vmem>>, vector<1x8x16x128xbf16>
    %91 = vector.shape_cast %90 : vector<1x8x16x128xbf16> to vector<8x16x128xbf16>
    %92 = vector.shape_cast %91 : vector<8x16x128xbf16> to vector<128x128xbf16>
    %c0_84 = arith.constant 0 : index
    %c0_85 = arith.constant 0 : index
    %c0_86 = arith.constant 0 : index
    %93 = vector.load %arg2[%c0_84, %c0_85, %c0_86] : memref<9x128x128xbf16, #tpu.memory_space<vmem>>, vector<1x128x128xbf16>
    %94 = vector.shape_cast %93 : vector<1x128x128xbf16> to vector<128x128xbf16>
    %cst_87 = arith.constant dense<0.000000e+00> : vector<128x128xf32>
    %95 = tpu.matmul %92, %94, %cst_87 {dimension_numbers = #tpu.dot_dimension_numbers<[1], [0], [0], [1], [0, 0, 1, 1], [], []>} : vector<128x128xbf16>, vector<128x128xbf16>, vector<128x128xf32> -> vector<128x128xf32>
    %c1_88 = arith.constant 1 : index
    %c0_89 = arith.constant 0 : index
    %c1_90 = arith.constant 1 : index
    %c0_91 = arith.constant 0 : index
    %96 = vector.load %arg1[%c1_88, %c0_89, %c1_90, %c0_91] : memref<2x10x18x128xbf16, #tpu.memory_space<vmem>>, vector<1x8x16x128xbf16>
    %97 = vector.shape_cast %96 : vector<1x8x16x128xbf16> to vector<8x16x128xbf16>
    %98 = vector.shape_cast %97 : vector<8x16x128xbf16> to vector<128x128xbf16>
    %c1_92 = arith.constant 1 : index
    %c0_93 = arith.constant 0 : index
    %c0_94 = arith.constant 0 : index
    %99 = vector.load %arg2[%c1_92, %c0_93, %c0_94] : memref<9x128x128xbf16, #tpu.memory_space<vmem>>, vector<1x128x128xbf16>
    %100 = vector.shape_cast %99 : vector<1x128x128xbf16> to vector<128x128xbf16>
    %cst_95 = arith.constant dense<0.000000e+00> : vector<128x128xf32>
    %101 = tpu.matmul %98, %100, %cst_95 {dimension_numbers = #tpu.dot_dimension_numbers<[1], [0], [0], [1], [0, 0, 1, 1], [], []>} : vector<128x128xbf16>, vector<128x128xbf16>, vector<128x128xf32> -> vector<128x128xf32>
    %102 = arith.addf %95, %101 : vector<128x128xf32>
    %c1_96 = arith.constant 1 : index
    %c0_97 = arith.constant 0 : index
    %c2_98 = arith.constant 2 : index
    %c0_99 = arith.constant 0 : index
    %103 = vector.load %arg1[%c1_96, %c0_97, %c2_98, %c0_99] : memref<2x10x18x128xbf16, #tpu.memory_space<vmem>>, vector<1x8x16x128xbf16>
    %104 = vector.shape_cast %103 : vector<1x8x16x128xbf16> to vector<8x16x128xbf16>
    %105 = vector.shape_cast %104 : vector<8x16x128xbf16> to vector<128x128xbf16>
    %c2_100 = arith.constant 2 : index
    %c0_101 = arith.constant 0 : index
    %c0_102 = arith.constant 0 : index
    %106 = vector.load %arg2[%c2_100, %c0_101, %c0_102] : memref<9x128x128xbf16, #tpu.memory_space<vmem>>, vector<1x128x128xbf16>
    %107 = vector.shape_cast %106 : vector<1x128x128xbf16> to vector<128x128xbf16>
    %cst_103 = arith.constant dense<0.000000e+00> : vector<128x128xf32>
    %108 = tpu.matmul %105, %107, %cst_103 {dimension_numbers = #tpu.dot_dimension_numbers<[1], [0], [0], [1], [0, 0, 1, 1], [], []>} : vector<128x128xbf16>, vector<128x128xbf16>, vector<128x128xf32> -> vector<128x128xf32>
    %109 = arith.addf %102, %108 : vector<128x128xf32>
    %c1_104 = arith.constant 1 : index
    %c1_105 = arith.constant 1 : index
    %c0_106 = arith.constant 0 : index
    %c0_107 = arith.constant 0 : index
    %110 = vector.load %arg1[%c1_104, %c1_105, %c0_106, %c0_107] : memref<2x10x18x128xbf16, #tpu.memory_space<vmem>>, vector<1x8x16x128xbf16>
    %111 = vector.shape_cast %110 : vector<1x8x16x128xbf16> to vector<8x16x128xbf16>
    %112 = vector.shape_cast %111 : vector<8x16x128xbf16> to vector<128x128xbf16>
    %c3_108 = arith.constant 3 : index
    %c0_109 = arith.constant 0 : index
    %c0_110 = arith.constant 0 : index
    %113 = vector.load %arg2[%c3_108, %c0_109, %c0_110] : memref<9x128x128xbf16, #tpu.memory_space<vmem>>, vector<1x128x128xbf16>
    %114 = vector.shape_cast %113 : vector<1x128x128xbf16> to vector<128x128xbf16>
    %cst_111 = arith.constant dense<0.000000e+00> : vector<128x128xf32>
    %115 = tpu.matmul %112, %114, %cst_111 {dimension_numbers = #tpu.dot_dimension_numbers<[1], [0], [0], [1], [0, 0, 1, 1], [], []>} : vector<128x128xbf16>, vector<128x128xbf16>, vector<128x128xf32> -> vector<128x128xf32>
    %116 = arith.addf %109, %115 : vector<128x128xf32>
    %c1_112 = arith.constant 1 : index
    %c1_113 = arith.constant 1 : index
    %c1_114 = arith.constant 1 : index
    %c0_115 = arith.constant 0 : index
    %117 = vector.load %arg1[%c1_112, %c1_113, %c1_114, %c0_115] : memref<2x10x18x128xbf16, #tpu.memory_space<vmem>>, vector<1x8x16x128xbf16>
    %118 = vector.shape_cast %117 : vector<1x8x16x128xbf16> to vector<8x16x128xbf16>
    %119 = vector.shape_cast %118 : vector<8x16x128xbf16> to vector<128x128xbf16>
    %c4_116 = arith.constant 4 : index
    %c0_117 = arith.constant 0 : index
    %c0_118 = arith.constant 0 : index
    %120 = vector.load %arg2[%c4_116, %c0_117, %c0_118] : memref<9x128x128xbf16, #tpu.memory_space<vmem>>, vector<1x128x128xbf16>
    %121 = vector.shape_cast %120 : vector<1x128x128xbf16> to vector<128x128xbf16>
    %cst_119 = arith.constant dense<0.000000e+00> : vector<128x128xf32>
    %122 = tpu.matmul %119, %121, %cst_119 {dimension_numbers = #tpu.dot_dimension_numbers<[1], [0], [0], [1], [0, 0, 1, 1], [], []>} : vector<128x128xbf16>, vector<128x128xbf16>, vector<128x128xf32> -> vector<128x128xf32>
    %123 = arith.addf %116, %122 : vector<128x128xf32>
    %c1_120 = arith.constant 1 : index
    %c1_121 = arith.constant 1 : index
    %c2_122 = arith.constant 2 : index
    %c0_123 = arith.constant 0 : index
    %124 = vector.load %arg1[%c1_120, %c1_121, %c2_122, %c0_123] : memref<2x10x18x128xbf16, #tpu.memory_space<vmem>>, vector<1x8x16x128xbf16>
    %125 = vector.shape_cast %124 : vector<1x8x16x128xbf16> to vector<8x16x128xbf16>
    %126 = vector.shape_cast %125 : vector<8x16x128xbf16> to vector<128x128xbf16>
    %c5_124 = arith.constant 5 : index
    %c0_125 = arith.constant 0 : index
    %c0_126 = arith.constant 0 : index
    %127 = vector.load %arg2[%c5_124, %c0_125, %c0_126] : memref<9x128x128xbf16, #tpu.memory_space<vmem>>, vector<1x128x128xbf16>
    %128 = vector.shape_cast %127 : vector<1x128x128xbf16> to vector<128x128xbf16>
    %cst_127 = arith.constant dense<0.000000e+00> : vector<128x128xf32>
    %129 = tpu.matmul %126, %128, %cst_127 {dimension_numbers = #tpu.dot_dimension_numbers<[1], [0], [0], [1], [0, 0, 1, 1], [], []>} : vector<128x128xbf16>, vector<128x128xbf16>, vector<128x128xf32> -> vector<128x128xf32>
    %130 = arith.addf %123, %129 : vector<128x128xf32>
    %c1_128 = arith.constant 1 : index
    %c2_129 = arith.constant 2 : index
    %c0_130 = arith.constant 0 : index
    %c0_131 = arith.constant 0 : index
    %131 = vector.load %arg1[%c1_128, %c2_129, %c0_130, %c0_131] : memref<2x10x18x128xbf16, #tpu.memory_space<vmem>>, vector<1x8x16x128xbf16>
    %132 = vector.shape_cast %131 : vector<1x8x16x128xbf16> to vector<8x16x128xbf16>
    %133 = vector.shape_cast %132 : vector<8x16x128xbf16> to vector<128x128xbf16>
    %c6_132 = arith.constant 6 : index
    %c0_133 = arith.constant 0 : index
    %c0_134 = arith.constant 0 : index
    %134 = vector.load %arg2[%c6_132, %c0_133, %c0_134] : memref<9x128x128xbf16, #tpu.memory_space<vmem>>, vector<1x128x128xbf16>
    %135 = vector.shape_cast %134 : vector<1x128x128xbf16> to vector<128x128xbf16>
    %cst_135 = arith.constant dense<0.000000e+00> : vector<128x128xf32>
    %136 = tpu.matmul %133, %135, %cst_135 {dimension_numbers = #tpu.dot_dimension_numbers<[1], [0], [0], [1], [0, 0, 1, 1], [], []>} : vector<128x128xbf16>, vector<128x128xbf16>, vector<128x128xf32> -> vector<128x128xf32>
    %137 = arith.addf %130, %136 : vector<128x128xf32>
    %c1_136 = arith.constant 1 : index
    %c2_137 = arith.constant 2 : index
    %c1_138 = arith.constant 1 : index
    %c0_139 = arith.constant 0 : index
    %138 = vector.load %arg1[%c1_136, %c2_137, %c1_138, %c0_139] : memref<2x10x18x128xbf16, #tpu.memory_space<vmem>>, vector<1x8x16x128xbf16>
    %139 = vector.shape_cast %138 : vector<1x8x16x128xbf16> to vector<8x16x128xbf16>
    %140 = vector.shape_cast %139 : vector<8x16x128xbf16> to vector<128x128xbf16>
    %c7_140 = arith.constant 7 : index
    %c0_141 = arith.constant 0 : index
    %c0_142 = arith.constant 0 : index
    %141 = vector.load %arg2[%c7_140, %c0_141, %c0_142] : memref<9x128x128xbf16, #tpu.memory_space<vmem>>, vector<1x128x128xbf16>
    %142 = vector.shape_cast %141 : vector<1x128x128xbf16> to vector<128x128xbf16>
    %cst_143 = arith.constant dense<0.000000e+00> : vector<128x128xf32>
    %143 = tpu.matmul %140, %142, %cst_143 {dimension_numbers = #tpu.dot_dimension_numbers<[1], [0], [0], [1], [0, 0, 1, 1], [], []>} : vector<128x128xbf16>, vector<128x128xbf16>, vector<128x128xf32> -> vector<128x128xf32>
    %144 = arith.addf %137, %143 : vector<128x128xf32>
    %c1_144 = arith.constant 1 : index
    %c2_145 = arith.constant 2 : index
    %c2_146 = arith.constant 2 : index
    %c0_147 = arith.constant 0 : index
    %145 = vector.load %arg1[%c1_144, %c2_145, %c2_146, %c0_147] : memref<2x10x18x128xbf16, #tpu.memory_space<vmem>>, vector<1x8x16x128xbf16>
    %146 = vector.shape_cast %145 : vector<1x8x16x128xbf16> to vector<8x16x128xbf16>
    %147 = vector.shape_cast %146 : vector<8x16x128xbf16> to vector<128x128xbf16>
    %c8_148 = arith.constant 8 : index
    %c0_149 = arith.constant 0 : index
    %c0_150 = arith.constant 0 : index
    %148 = vector.load %arg2[%c8_148, %c0_149, %c0_150] : memref<9x128x128xbf16, #tpu.memory_space<vmem>>, vector<1x128x128xbf16>
    %149 = vector.shape_cast %148 : vector<1x128x128xbf16> to vector<128x128xbf16>
    %cst_151 = arith.constant dense<0.000000e+00> : vector<128x128xf32>
    %150 = tpu.matmul %147, %149, %cst_151 {dimension_numbers = #tpu.dot_dimension_numbers<[1], [0], [0], [1], [0, 0, 1, 1], [], []>} : vector<128x128xbf16>, vector<128x128xbf16>, vector<128x128xf32> -> vector<128x128xf32>
    %151 = arith.addf %144, %150 : vector<128x128xf32>
    %cst_152 = arith.constant dense<0.000000e+00> : vector<128xf32>
    %152 = vector.multi_reduction <add>, %151, %cst_152 [0] : vector<128x128xf32> to vector<128xf32>
    %153 = vector.shape_cast %152 : vector<128xf32> to vector<1x128xf32>
    %c0_153 = arith.constant 0 : index
    %c0_154 = arith.constant 0 : index
    %154 = vector.load %arg3[%c0_153, %c0_154] : memref<128x128xf32, #tpu.memory_space<vmem>>, vector<128x128xf32>
    %cst_155 = arith.constant dense<0.000000e+00> : vector<1x128xf32>
    %155 = tpu.matmul %153, %154, %cst_155 {dimension_numbers = #tpu.dot_dimension_numbers<[1], [0], [0], [1], [0, 0, 1, 1], [], []>} : vector<1x128xf32>, vector<128x128xf32>, vector<1x128xf32> -> vector<1x128xf32>
    %cst_156 = arith.constant 2.44140625E-4 : f32
    %156 = vector.broadcast %cst_156 : f32 to vector<1x128xf32>
    %157 = arith.mulf %155, %156 : vector<1x128xf32>
    %158 = vector.broadcast %157 : vector<1x128xf32> to vector<128x128xf32>
    %159 = arith.subf %151, %158 : vector<128x128xf32>
    %160 = arith.mulf %159, %159 : vector<128x128xf32>
    %cst_157 = arith.constant dense<0.000000e+00> : vector<128xf32>
    %161 = vector.multi_reduction <add>, %160, %cst_157 [0] : vector<128x128xf32> to vector<128xf32>
    %162 = vector.shape_cast %161 : vector<128xf32> to vector<1x128xf32>
    %c0_158 = arith.constant 0 : index
    %c0_159 = arith.constant 0 : index
    %163 = vector.load %arg3[%c0_158, %c0_159] : memref<128x128xf32, #tpu.memory_space<vmem>>, vector<128x128xf32>
    %cst_160 = arith.constant dense<0.000000e+00> : vector<1x128xf32>
    %164 = tpu.matmul %162, %163, %cst_160 {dimension_numbers = #tpu.dot_dimension_numbers<[1], [0], [0], [1], [0, 0, 1, 1], [], []>} : vector<1x128xf32>, vector<128x128xf32>, vector<1x128xf32> -> vector<1x128xf32>
    %cst_161 = arith.constant 2.44140625E-4 : f32
    %165 = vector.broadcast %cst_161 : f32 to vector<1x128xf32>
    %166 = arith.mulf %164, %165 : vector<1x128xf32>
    %c0_162 = arith.constant 0 : index
    %c0_163 = arith.constant 0 : index
    %167 = vector.load %arg4[%c0_162, %c0_163] : memref<1x128xf32, #tpu.memory_space<vmem>>, vector<1x128xf32>
    %cst_164 = arith.constant 9.99999974E-6 : f32
    %168 = vector.broadcast %cst_164 : f32 to vector<1x128xf32>
    %169 = arith.addf %166, %168 : vector<1x128xf32>
    %170 = math.rsqrt %169 : vector<1x128xf32>
    %171 = arith.mulf %167, %170 : vector<1x128xf32>
    %172 = vector.broadcast %171 : vector<1x128xf32> to vector<128x128xf32>
    %173 = arith.mulf %159, %172 : vector<128x128xf32>
    %c0_165 = arith.constant 0 : index
    %c0_166 = arith.constant 0 : index
    %174 = vector.load %arg5[%c0_165, %c0_166] : memref<1x128xf32, #tpu.memory_space<vmem>>, vector<1x128xf32>
    %175 = vector.broadcast %174 : vector<1x128xf32> to vector<128x128xf32>
    %176 = arith.addf %173, %175 : vector<128x128xf32>
    %c1_167 = arith.constant 1 : index
    %c0_168 = arith.constant 0 : index
    %c0_169 = arith.constant 0 : index
    %177 = vector.load %arg6[%c1_167, %c0_168, %c0_169] : memref<2x128x128xf32, #tpu.memory_space<vmem>>, vector<1x128x128xf32>
    %178 = vector.shape_cast %177 : vector<1x128x128xf32> to vector<128x128xf32>
    %179 = vector.shape_cast %176 : vector<128x128xf32> to vector<1x128x128xf32>
    tpu.vector_store %arg6[%c1_167, %c0_168, %c0_169], %179 {strides = array<i32>} : memref<2x128x128xf32, #tpu.memory_space<vmem>>, vector<1x128x128xf32>,
    return
  }
  func.func @transform_0(%arg0: i32) -> (i32, i32, i32, i32) {
    %c0_i32 = arith.constant 0 : i32
    %c0_i32_0 = arith.constant 0 : i32
    %c0_i32_1 = arith.constant 0 : i32
    %c0_i32_2 = arith.constant 0 : i32
    return %arg0, %c0_i32, %c0_i32_0, %c0_i32_1 : i32, i32, i32, i32
  }
  func.func @transform_1(%arg0: i32) -> (i32, i32, i32) {
    %c0_i32 = arith.constant 0 : i32
    %c0_i32_0 = arith.constant 0 : i32
    %c0_i32_1 = arith.constant 0 : i32
    %c0_i32_2 = arith.constant 0 : i32
    return %c0_i32, %c0_i32_0, %c0_i32_1 : i32, i32, i32
  }
  func.func @transform_2(%arg0: i32) -> (i32, i32) {
    %c0_i32 = arith.constant 0 : i32
    %c0_i32_0 = arith.constant 0 : i32
    %c0_i32_1 = arith.constant 0 : i32
    return %c0_i32, %c0_i32_0 : i32, i32
  }
  func.func @transform_3(%arg0: i32) -> (i32, i32) {
    %c0_i32 = arith.constant 0 : i32
    %c0_i32_0 = arith.constant 0 : i32
    %c0_i32_1 = arith.constant 0 : i32
    return %c0_i32, %c0_i32_0 : i32, i32
  }
  func.func @transform_4(%arg0: i32) -> (i32, i32) {
    %c0_i32 = arith.constant 0 : i32
    %c0_i32_0 = arith.constant 0 : i32
    %c0_i32_1 = arith.constant 0 : i32
    return %c0_i32, %c0_i32_0 : i32, i32
  }
  func.func @transform_5(%arg0: i32) -> (i32, i32, i32) {
    %c0_i32 = arith.constant 0 : i32
    %c0_i32_0 = arith.constant 0 : i32
    %c0_i32_1 = arith.constant 0 : i32
    return %arg0, %c0_i32, %c0_i32_0 : i32, i32, i32
  }
}

</mosaic_0001>

<bundles_post_ra>
// kernel: tpu_custom_call.1
= control target key start
LH: loop header
LB: loop body
LE: loop exit
PB: predicated region body
PF: predicated region fallthrough
CT: control target
= control target key end

     0   :  { %10 = vsyncpa [#allocation3], 0  ;;  %s9094_s0 = inlined_call_operand.vmem [shape: bf16[2,10,18,128], index: 0, kind: input, shape index: {}]   ;;  %s9095_s1 = inlined_call_operand.hbm [shape: bf16[9,128,128], index: 1, kind: input, shape index: {}]   ;;  %s9096_s2 = inlined_call_operand.vmem [shape: f32[128,128], index: 2, kind: input, shape index: {}]   ;;  %s9097_s3 = inlined_call_operand.vmem [shape: f32[1,128], index: 3, kind: input, shape index: {}]   ;;  %s9098_s4 = inlined_call_operand.vmem [shape: f32[1,128], index: 4, kind: input, shape index: {}]   ;;  %s9099_s5 = inlined_call_operand.hbm [shape: f32[2,128,128], index: 5, kind: output, shape index: {}]  }
   0x1   :  { %11 = vsyncpa [#allocation4], 0  ;;  %s18_s20 = sshll.u32 %s9095_s1, 4  ;;  %s6598_s21 = smov [#allocation2]   ;;  %s19_s20 = int_to_ptr.hbm [resolvable:$true] %s18_s20 }
   0x2   :  { %s20_s22 = sshll.u32 %s6598_s21, 4  ;;  %s6599_s23 = smov 64   ;;  %s21_s22 = int_to_ptr.vmem [resolvable:$true] %s20_s22 }
   0x3   :  { %s6600_s24 = smov 4  }
   0x4   :  { %26 = dma.hbm_to_vmem [thread:$0]  %s19_s20, 9216, %s21_s22, [#allocation3], %s6599_s23, %s6599_s23, %s6600_s24  }
   0x5   :  { %6594 = dma.done.wait [#allocation3], 9216  }
   0x6   :  { %6595 = vsyncadd [#allocation3], 4294958080  ;;  %v6343_v0 = vld [vmem:[#allocation2 + $0x78] sm:$0xff]  ;;  %v6342_v2 = vld [vmem:[#allocation2 + $0x70] sm:$0xff]  ;;  %vm77_vm0 = vsmask.f32 3328 }
   0x7   :  { %v6351_v1 = vld [vmem:[#allocation2 + $0xb8] sm:$0xff]  ;;  %369 = vmatpush.bf16.msra.mxu0 %v6343_v0  ;;  %6512 = vmatpush.bf16.msra.mxu1 %v6343_v0  ;;  %v6350_v3 = vld [vmem:[#allocation2 + $0xb0] sm:$0xff]  ;;  %v37_v4 = vld [vmem:[%s9094_s0] sm:$0xf]  ;;  %vm78_vm1 = vsmask.f32 7440 }
   0x8   :  { %743 = vmatpush.bf16.msra.mxu2 %v6351_v1  ;;  %v6643_v5 = vld [vmem:[%s9094_s0 + $0x4] sm:$0xf]  ;;  %v6341_v6 = vld [vmem:[#allocation2 + $0x68] sm:$0xff]  ;;  %v81_v8 = vshrl.u32 %v37_v4, 16  ;;  %v84_v9 = vshll.u32 %v37_v4, 16  ;;  %vm587_vm2 = vcmask 1042432   ;;  %vm6675_vm4 = vmor %vm77_vm0, %vm78_vm1 }
   0x9   :  { %v6349_v7 = vld [vmem:[#allocation2 + $0xa8] sm:$0xff]  ;;  %v90_v10 = vshll.u32 %v6643_v5, 16  ;;  %v94_v11 = vshrl.u32 %v6643_v5, 16  ;;  %v6663_v19 = vld [vmem:[%s9094_s0 + $0x50] sm:$0x1]  ;;  %v6340_v23 = vld [vmem:[#allocation2 + $0x60] sm:$0xff] }
   0xa   :  { %v69_v12 = vld [vmem:[%s9094_s0 + $0x8] sm:$0x1]  ;;  %v6656_v14 = vld [vmem:[%s9094_s0 + $0x4c] sm:$0xf]  ;;  %v83_v15 = vrot.slane %v81_v8, 4  ;;  %v86_v16 = vrot.slane %v84_v9, 5 }
   0xb   :  { %370 = vmatpush.bf16.msra.mxu0 %v6342_v2  ;;  %6513 = vmatpush.bf16.msra.mxu1 %v6342_v2  ;;  %v49_v13 = vld [vmem:[%s9094_s0 + $0x48] sm:$0xf]  ;;  %v6658_v17 = vrot.slane %v90_v10, 5  ;;  %v96_v18 = vrot.slane %v94_v11, 4  ;;  %v234_v22 = vshll.u32 %v6656_v14, 16  ;;  %v100_v24 = vshll.u32 %v69_v12, 16 }
   0xc   :  { %744 = vmatpush.bf16.msra.mxu2 %v6350_v3  ;;  %v225_v20 = vshrl.u32 %v49_v13, 16  ;;  %v228_v21 = vshll.u32 %v49_v13, 16  ;;  %v238_v25 = vshrl.u32 %v6656_v14, 16  ;;  %v6348_v26 = vld [vmem:[#allocation2 + $0xa0] sm:$0xff]  ;;  %v87_v27 = vor.u32 %v86_v16, %v83_v15  ;;  %v6339_v37 = vld [vmem:[#allocation2 + $0x58] sm:$0xff]  ;;  %v6338_v52 = vld [vmem:[#allocation2 + $0x50] sm:$0xff] }
   0xd   :  { %v236_v30 = vrot.slane %v234_v22, 5  ;;  %v97_v31 = vor.u32 %v96_v18, %v6658_v17  ;;  %v244_v33 = vshll.u32 %v6663_v19, 16  ;;  %v563_v34 = vld [vmem:[%s9094_s0] sm:$0xe]  ;;  %v592_v35 = vrot.slane %v6643_v5, 5  ;;  %v6347_v39 = vld [vmem:[#allocation2 + $0x98] sm:$0xff] }
   0xe   :  { %v227_v28 = vrot.slane %v225_v20, 4  ;;  %v230_v29 = vrot.slane %v228_v21, 5  ;;  %v240_v32 = vrot.slane %v238_v25, 4  ;;  %vm588_vm3 = vcmask 1046532   ;;  %v39_v51 = vld [vmem:[%s9094_s0 + $0xc] sm:$0xf] }
   0xf   :  { %371 = vmatpush.bf16.msra.mxu0 %v6341_v6  ;;  %6514 = vmatpush.bf16.msra.mxu1 %v6341_v6  ;;  %v9105_v40 = vmov 0  ;;  %v88_v41 = vrot.slane %v87_v27, 4  ;;  %v102_v42 = vrot.slane %v100_v24, 5  ;;  %v5376_v43 = vrot.slane %v563_v34, 9  ;;  %vm6679_vm5 = vmor %vm587_vm2, %vm588_vm3  ;;  %v6689_v53 = vld [vmem:[%s9094_s0 + $0x10] sm:$0xf] }
  0x10   :  { %745 = vmatpush.bf16.msra.mxu2 %v6349_v7  ;;  %v231_v36 = vor.u32 %v230_v29, %v227_v28  ;;  %v241_v38 = vor.u32 %v240_v32, %v236_v30  ;;  %v9106_v40 = vsel %vm6675_vm4, 4294967295, %v9105_v40  ;;  %v98_v44 = vrot.slane %v97_v31, 4  ;;  %v6346_v54 = vld [vmem:[#allocation2 + $0x90] sm:$0xff]  ;;  %v6702_v58 = vld [vmem:[%s9094_s0 + $0x58] sm:$0xf]  ;;  %v6337_v3 = vld [vmem:[#allocation2 + $0x48] sm:$0xff] }
  0x11   :  { %9107 = vst [vmem:[#allocation8_spill] sm:$0xff] %v9106_v40  ;;  %v246_v45 = vrot.slane %v244_v33, 5  ;;  %v9108_v46 = vmov 0  ;;  %v594_v47 = vrot.slane %v592_v35, 4  ;;  %v595_v48 = vrot.slane %v69_v12, 5  ;;  %v6345_v8 = vld [vmem:[#allocation2 + $0x88] sm:$0xff] }
  0x12   :  { %v9109_v46 = vsel %vm6679_vm5, 4294967295, %v9108_v46  ;;  %v232_v49 = vrot.slane %v231_v36, 4  ;;  %v242_v50 = vrot.slane %v241_v38, 4  ;;  %v93_v55 = vsel %vm6675_vm4, %v88_v41, %v6658_v17  ;;  %v51_v57 = vld [vmem:[%s9094_s0 + $0x54] sm:$0xf]  ;;  %v6336_v16 = vld [vmem:[#allocation2 + $0x40] sm:$0xff] }
  0x13   :  { %372 = vmatpush.bf16.msra.mxu0 %v6340_v23  ;;  %6515 = vmatpush.bf16.msra.mxu1 %v6340_v23  ;;  %9110 = vst [vmem:[#allocation9_spill] sm:$0xff] %v9109_v46  ;;  %v593_v56 = vsel %vm6679_vm5, %v5376_v43, %v592_v35  ;;  %v103_v59 = vsel %vm6675_vm4, %v98_v44, %v102_v42  ;;  %v105_v61 = vshrl.u32 %v39_v51, 16  ;;  %v108_v62 = vshll.u32 %v39_v51, 16  ;;  %v6721_v22 = vld [vmem:[%s9094_s0 + $0x14] sm:$0x1]  ;;  %v6344_v27 = vld [vmem:[#allocation2 + $0x80] sm:$0xff] }
  0x14   :  { %746 = vmatpush.bf16.msra.mxu2 %v6348_v26  ;;  %v596_v60 = vsel %vm6679_vm5, %v594_v47, %v595_v48  ;;  %v237_v63 = vsel %vm6675_vm4, %v232_v49, %v236_v30  ;;  %v247_v0 = vsel %vm6675_vm4, %v242_v50, %v246_v45  ;;  %v114_v1 = vshll.u32 %v6689_v53, 16  ;;  %v6375_v28 = vld [vmem:[#allocation2 + $0x138] sm:$0xff]  ;;  %v6374_v42 = vld [vmem:[#allocation2 + $0x130] sm:$0xff]  ;;  %v564_v45 = vld [vmem:[%s9094_s0 + $0xc] sm:$0xe]  ;;  %s5267_s16 = sshll.u32 %s9099_s5, 4  ;;  %s5268_s16 = int_to_ptr.hbm [resolvable:$true] %s5267_s16 }
  0x15   :  { %v118_v2 = vshrl.u32 %v6689_v53, 16  ;;  %v249_v4 = vshrl.u32 %v51_v57, 16  ;;  %v252_v5 = vshll.u32 %v51_v57, 16  ;;  %v258_v6 = vshll.u32 %v6702_v58, 16  ;;  %v6728_v29 = vld [vmem:[%s9094_s0 + $0x5c] sm:$0x1] }
  0x16   :  { %v262_v7 = vshrl.u32 %v6702_v58, 16  ;;  %v289_v9 = vunpack.c.l.b16 %v93_v55  ;;  %v663_v10 = vunpack.c.l.b16 %v593_v56  ;;  %v290_v11 = vunpack.c.l.b16 %v103_v59  ;;  %v6335_v31 = vld [vmem:[#allocation2 + $0x38] sm:$0xff]  ;;  %v6334_v44 = vld [vmem:[#allocation2 + $0x30] sm:$0xff]  ;;  %v6373_v59 = vld [vmem:[#allocation2 + $0x128] sm:$0xff]  ;;  %s6602_s17 = smov 128   ;;  %s6603_s18 = smov 8  }
  0x17   :  { %373 = vmatpush.bf16.msra.mxu0 %v6339_v37  ;;  %6516 = vmatpush.bf16.msra.mxu1 %v6339_v37  ;;  %v301_v12 = vunpack.c.l.b16 %v237_v63  ;;  %v664_v13 = vunpack.c.l.b16 %v596_v60  ;;  %v107_v15 = vrot.slane %v105_v61, 4  ;;  %v302_v17 = vunpack.c.l.b16 %v247_v0  ;;  %v6367_v32 = vld [vmem:[#allocation2 + $0xf8] sm:$0xff]  ;;  %v6333_v61 = vld [vmem:[#allocation2 + $0x28] sm:$0xff] }
  0x18   :  { %747 = vmatpush.bf16.msra.mxu2 %v6347_v39  ;;  %v110_v18 = vrot.slane %v108_v62, 5  ;;  %v6716_v20 = vrot.slane %v114_v1, 5  ;;  %v120_v21 = vrot.slane %v118_v2, 4  ;;  %v251_v23 = vrot.slane %v249_v4, 4  ;;  %6520 = vmatpush.bf16.msra.mxu3 %v6367_v32  ;;  %v6745_v60 = vld [vmem:[%s9094_s0 + $0x1c] sm:$0xf] }
  0x19   :  { %v254_v24 = vrot.slane %v252_v5, 5  ;;  %v6723_v25 = vrot.slane %v258_v6, 5  ;;  %v264_v26 = vrot.slane %v262_v7, 4  ;;  %v305_v30 = vpack.c.b16 %v290_v11, %v289_v9  ;;  %v6365_v62 = vld [vmem:[#allocation2 + $0xe8] sm:$0xff]  ;;  %v6372_v9 = vld [vmem:[#allocation2 + $0x120] sm:$0xff] }
  0x1a   :  { %v311_v33 = vpack.c.b16 %v302_v17, %v301_v12  ;;  %v111_v34 = vor.u32 %v110_v18, %v107_v15  ;;  %v121_v35 = vor.u32 %v120_v21, %v6716_v20  ;;  %v124_v36 = vshll.u32 %v6721_v22, 16 }
  0x1b   :  { %374 = vmatpush.bf16.msra.mxu0 %v6338_v52  ;;  %6517 = vmatpush.bf16.msra.mxu1 %v6338_v52  ;;  %v679_v37 = vpack.c.b16 %v664_v13, %v663_v10  ;;  %v255_v38 = vor.u32 %v254_v24, %v251_v23  ;;  %v265_v39 = vor.u32 %v264_v26, %v6723_v25  ;;  %v268_v41 = vshll.u32 %v6728_v29, 16  ;;  %v6332_v10 = vld [vmem:[#allocation2 + $0x20] sm:$0xff]  ;;  %v6363_v26 = vld [vmem:[#allocation2 + $0xd8] sm:$0xff] }
  0x1c   :  { %748 = vmatpush.bf16.msra.mxu2 %v6346_v54  ;;  %v599_v43 = vrot.slane %v6689_v53, 5  ;;  %v112_v47 = vrot.slane %v111_v34, 4  ;;  %v122_v48 = vrot.slane %v121_v35, 4  ;;  %v126_v49 = vrot.slane %v124_v36, 5  ;;  %v41_v53 = vld [vmem:[%s9094_s0 + $0x18] sm:$0xf] }
  0x1d   :  { %v256_v50 = vrot.slane %v255_v38, 4  ;;  %v266_v51 = vrot.slane %v265_v39, 4  ;;  %v270_v52 = vrot.slane %v268_v41, 5  ;;  %v6366_v54 = vld [vmem:[#allocation2 + $0xf0] sm:$0xff]  ;;  %v5377_v55 = vrot.slane %v564_v45, 9  ;;  %v6364_v13 = vld [vmem:[#allocation2 + $0xe0] sm:$0xff] }
  0x1e   :  { %v601_v56 = vrot.slane %v599_v43, 4  ;;  %v602_v57 = vrot.slane %v6721_v22, 5  ;;  %6521 = vmatpush.bf16.msra.mxu3 %v6366_v54  ;;  %v117_v63 = vsel %vm6675_vm4, %v112_v47, %v6716_v20  ;;  %v127_v0 = vsel %vm6675_vm4, %v122_v48, %v126_v49  ;;  %v71_v24 = vld [vmem:[%s9094_s0 + $0x20] sm:$0x1]  ;;  %v565_v35 = vld [vmem:[%s9094_s0 + $0x18] sm:$0xe] }
  0x1f   :  { %375 = vmatpush.bf16.msra.mxu0 %v6337_v3  ;;  %6518 = vmatpush.bf16.msra.mxu1 %v6337_v3  ;;  %v129_v1 = vshrl.u32 %v41_v53, 16  ;;  %v132_v2 = vshll.u32 %v41_v53, 16  ;;  %v261_v3 = vsel %vm6675_vm4, %v256_v50, %v6723_v25  ;;  %v271_v4 = vsel %vm6675_vm4, %v266_v51, %v270_v52  ;;  %v6331_v25 = vld [vmem:[#allocation2 + $0x18] sm:$0xff]  ;;  %v6330_v36 = vld [vmem:[#allocation2 + $0x10] sm:$0xff]  ;;  %v6776_v48 = vld [vmem:[%s9094_s0 + $0x28] sm:$0xf] }
  0x20   :  { %749 = vmatpush.bf16.msra.mxu2 %v6345_v8  ;;  %v138_v5 = vshll.u32 %v6745_v60, 16  ;;  %v142_v6 = vshrl.u32 %v6745_v60, 16  ;;  %v600_v7 = vsel %vm6679_vm5, %v5377_v55, %v599_v43  ;;  %v603_v8 = vsel %vm6679_vm5, %v601_v56, %v602_v57  ;;  %v6371_v45 = vld [vmem:[#allocation2 + $0x118] sm:$0xff]  ;;  %v6362_v47 = vld [vmem:[#allocation2 + $0xd0] sm:$0xff]  ;;  %v6329_v49 = vld [vmem:[#allocation2 + $0x8] sm:$0xff] }
  0x21   :  { %v291_v11 = vunpack.c.l.b16 %v117_v63  ;;  %v292_v12 = vunpack.c.l.b16 %v127_v0  ;;  %v303_v15 = vunpack.c.l.b16 %v261_v3  ;;  %v131_v17 = vrot.slane %v129_v1, 4  ;;  %v6370_v50 = vld [vmem:[#allocation2 + $0x110] sm:$0xff]  ;;  %v6361_v55 = vld [vmem:[#allocation2 + $0xc8] sm:$0xff] }
  0x22   :  { %6522 = vmatpush.bf16.msra.mxu3 %v6365_v62  ;;  %v134_v18 = vrot.slane %v132_v2, 5  ;;  %v665_v20 = vunpack.c.l.b16 %v600_v7  ;;  %v666_v21 = vunpack.c.l.b16 %v603_v8  ;;  %v140_v22 = vrot.slane %v138_v5, 5  ;;  %v6360_v2 = vld [vmem:[#allocation2 + $0xc0] sm:$0xff]  ;;  %v72_v7 = vld [vmem:[%s9094_s0 + $0x2c] sm:$0x1] }
  0x23   :  { %376 = vmatpush.bf16.msra.mxu0 %v6336_v16  ;;  %6519 = vmatpush.bf16.msra.mxu1 %v6336_v16  ;;  %v304_v16 = vunpack.c.l.b16 %v271_v4  ;;  %v144_v23 = vrot.slane %v142_v6, 4  ;;  %v148_v34 = vshll.u32 %v71_v24, 16  ;;  %v5378_v38 = vrot.slane %v565_v35, 9  ;;  %v6354_v8 = vld [vmem:[%s9094_s0 + $0x24] sm:$0xff] }
  0x24   :  { %750 = vmatpush.bf16.msra.mxu2 %v6344_v27  ;;  %v306_v27 = vpack.c.b16 %v292_v12, %v291_v11  ;;  %v609_v41 = vrot.slane %v71_v24, 5  ;;  %v6369_v24 = vld [vmem:[#allocation2 + $0x108] sm:$0xff] }
  0x25   :  { %v150_v43 = vrot.slane %v148_v34, 5 }
  0x26   :  { %377 = vmatmul.bf16.vlgmr.msra.gmra.mxu0 %v305_v30  ;;  %407 = vmatmul.bf16.vlgmr.msra.gmra.mxu1 %v311_v33  ;;  %v135_v30 = vor.u32 %v134_v18, %v131_v17  ;;  %v145_v33 = vor.u32 %v144_v23, %v140_v22  ;;  %v566_v17 = vld [vmem:[%s9094_s0 + $0x24] sm:$0xe]  ;;  %v45_v18 = vld [vmem:[%s9094_s0 + $0x30] sm:$0xf]  ;;  %v46_v23 = vld [vmem:[%s9094_s0 + $0x34] sm:$0xf] }
  0x27   :  { %1316 = vmatpush.bf16.msrb.mxu0 %v6375_v28  ;;  %514 = vmatpush.bf16.msrb.mxu1 %v6335_v31  ;;  %v312_v28 = vpack.c.b16 %v304_v16, %v303_v15  ;;  %v606_v31 = vrot.slane %v6745_v60, 5  ;;  %v166_v60 = vshrl.u32 %v6776_v48, 16  ;;  %v172_v15 = vshll.u32 %v72_v7, 16 }
  0x28   :  { %751 = vmatmul.bf16.vlgmr.msra.gmra.mxu2 %v679_v37  ;;  %6523 = vmatpush.bf16.msra.mxu3 %v6364_v13  ;;  %v136_v37 = vrot.slane %v135_v30, 4  ;;  %v613_v16 = vrot.slane %v6776_v48, 5  ;;  %v180_v30 = vshll.u32 %v45_v18, 16 }
  0x29   :  { %938 = vmatpush.bf16.msrb.mxu2 %v6367_v32  ;;  %v680_v32 = vpack.c.b16 %v666_v21, %v665_v20  ;;  %v608_v39 = vrot.slane %v606_v31, 4  ;;  %v607_v52 = vsel %vm6679_vm5, %v5378_v38, %v606_v31  ;;  %v168_v6 = vrot.slane %v166_v60, 4 }
  0x2a   :  { %v141_v51 = vsel %vm6675_vm4, %v136_v37, %v140_v22  ;;  %v667_v0 = vunpack.c.l.b16 %v607_v52  ;;  %v174_v22 = vrot.slane %v172_v15, 5  ;;  %v186_v31 = vshll.u32 %v46_v23, 16  ;;  %v6321_v52 = vld [vmem:[%s9094_s0 + $0xc] sm:$0xff] }
  0x2b   :  { %1317 = vmatpush.bf16.msrb.mxu0 %v6374_v42  ;;  %515 = vmatpush.bf16.msrb.mxu1 %v6334_v44  ;;  %v146_v42 = vrot.slane %v145_v33, 4  ;;  %v43_v44 = vld [vmem:[%s9094_s0 + $0x24] sm:$0xf]  ;;  %v610_v53 = vsel %vm6679_vm5, %v608_v39, %v609_v41  ;;  %v182_v38 = vrot.slane %v180_v30, 5 }
  0x2c   :  { %6524 = vmatpush.bf16.msra.mxu3 %v6363_v26  ;;  %v156_v57 = vshll.u32 %v43_v44, 16  ;;  %v668_v1 = vunpack.c.l.b16 %v610_v53 }
  0x2d   :  { %939 = vmatpush.bf16.msrb.mxu2 %v6366_v54  ;;  %v153_v54 = vshrl.u32 %v43_v44, 16  ;;  %v151_v56 = vsel %vm6675_vm4, %v146_v42, %v150_v43  ;;  %v73_v42 = vld [vmem:[%s9094_s0 + $0x38] sm:$0x1]  ;;  %v188_v43 = vrot.slane %v186_v31, 5 }
  0x2e   :  { %v294_v63 = vunpack.c.l.b16 %v151_v56  ;;  %v158_v4 = vrot.slane %v156_v57, 5  ;;  %v681_v11 = vpack.c.b16 %v668_v1, %v667_v0  ;;  %v567_v56 = vld [vmem:[%s9094_s0 + $0x30] sm:$0xe]  ;;  %v6368_v0 = vld [vmem:[#allocation2 + $0x100] sm:$0xff]  ;;  %v6383_v1 = vld [vmem:[#allocation2 + $0x178] sm:$0xff] }
  0x2f   :  { %1318 = vmatpush.bf16.msrb.mxu0 %v6373_v59  ;;  %516 = vmatpush.bf16.msrb.mxu1 %v6333_v61  ;;  %v162_v59 = vshll.u32 %v6776_v48, 16  ;;  %v6328_v61 = vld [vmem:[#allocation2] sm:$0xff]  ;;  %v155_v3 = vrot.slane %v153_v54, 4  ;;  %v620_v54 = vrot.slane %v46_v23, 5 }
  0x30   :  { %6525 = vmatpush.bf16.msra.mxu3 %v6362_v47 }
  0x31   :  { %940 = vmatpush.bf16.msrb.mxu2 %v6365_v62  ;;  %v293_v62 = vunpack.c.l.b16 %v141_v51  ;;  %v164_v5 = vrot.slane %v162_v59, 5  ;;  %v159_v12 = vor.u32 %v158_v4, %v155_v3  ;;  %v48_v3 = vld [vmem:[%s9094_s0 + $0x40] sm:$0xf] }
  0x32   :  { %v627_v31 = vrot.slane %v48_v3, 5 }
  0x33   :  { %1319 = vmatpush.bf16.msrb.mxu0 %v6372_v9  ;;  %517 = vmatpush.bf16.msrb.mxu1 %v6332_v10  ;;  %v307_v9 = vpack.c.b16 %v294_v63, %v293_v62  ;;  %v6320_v10 = vld [vmem:[%s9094_s0] sm:$0xff]  ;;  %v160_v20 = vrot.slane %v159_v12, 4  ;;  %v622_v62 = vrot.slane %v620_v54, 4  ;;  %v623_v63 = vrot.slane %v73_v42, 5 }
  0x34   :  { %6526 = vmatpush.bf16.msra.mxu3 %v6361_v55 }
  0x35   :  { %941 = vmatpush.bf16.msrb.mxu2 %v6364_v13  ;;  %v169_v13 = vor.u32 %v168_v6, %v164_v5  ;;  %v165_v33 = vsel %vm6675_vm4, %v160_v20, %v164_v5 }
  0x36   :  { %382 = vmatmul.bf16.gmra.mxu0 %v306_v27  ;;  %412 = vmatmul.bf16.gmra.mxu1 %v312_v28  ;;  %v616_v27 = vrot.slane %v72_v7, 5  ;;  %v177_v28 = vshrl.u32 %v45_v18, 16  ;;  %v295_v39 = vunpack.c.l.b16 %v165_v33  ;;  %v624_v7 = vsel %vm6679_vm5, %v622_v62, %v623_v63  ;;  %v5496_v33 = vld [vmem:[%s9094_s0 + $0xc] sm:$0xf] }
  0x37   :  { %518 = vmatpush.bf16.msrb.mxu1 %v6331_v25  ;;  %1320 = vmatpush.bf16.msrb.mxu0 %v6371_v45  ;;  %v170_v21 = vrot.slane %v169_v13, 4  ;;  %v5379_v25 = vrot.slane %v566_v17, 9 }
  0x38   :  { %756 = vmatmul.bf16.gmra.mxu2 %v680_v32  ;;  %6527 = vmatpush.bf16.msra.mxu3 %v6360_v2  ;;  %v190_v32 = vshrl.u32 %v46_v23, 16  ;;  %v179_v37 = vrot.slane %v177_v28, 4  ;;  %v6356_v23 = vld [vmem:[%s9094_s0 + $0x3c] sm:$0xff] }
  0x39   :  { %942 = vmatpush.bf16.msrb.mxu2 %v6363_v26  ;;  %v615_v26 = vrot.slane %v613_v16, 4  ;;  %v175_v34 = vsel %vm6675_vm4, %v170_v21, %v174_v22  ;;  %v614_v35 = vsel %vm6679_vm5, %v5379_v25, %v613_v16  ;;  %v672_v16 = vunpack.c.l.b16 %v624_v7  ;;  %v74_v22 = vld [vmem:[%s9094_s0 + $0x44] sm:$0x1]  ;;  %v6322_v25 = vld [vmem:[%s9094_s0 + $0x18] sm:$0xff]  ;;  %v569_v7 = vld [vmem:[%s9094_s0 + $0x48] sm:$0xe] }
  0x3a   :  { %v296_v41 = vunpack.c.l.b16 %v175_v34  ;;  %v192_v44 = vrot.slane %v190_v32, 4  ;;  %v669_v45 = vunpack.c.l.b16 %v614_v35  ;;  %v183_v48 = vor.u32 %v182_v38, %v179_v37  ;;  %v568_v32 = vld [vmem:[%s9094_s0 + $0x3c] sm:$0xe]  ;;  %v6859_v34 = vld [vmem:[%s9094_s0 + $0x10] sm:$0xf] }
  0x3b   :  { %519 = vmatpush.bf16.msrb.mxu1 %v6330_v36  ;;  %1321 = vmatpush.bf16.msrb.mxu0 %v6370_v50  ;;  %v617_v36 = vsel %vm6679_vm5, %v615_v26, %v616_v27  ;;  %v6355_v50 = vld [vmem:[%s9094_s0 + $0x30] sm:$0xff]  ;;  %v220_v30 = vshll.u32 %v74_v22, 16  ;;  %v6415_v38 = vld [vmem:[#allocation2 + $0x238] sm:$0xff] }
  0x3c   :  { %956 = vmatmul.bf16.vlgmr.msra.gmra.mxu3 %v6354_v8  ;;  %v308_v51 = vpack.c.b16 %v296_v41, %v295_v39  ;;  %v193_v53 = vor.u32 %v192_v44, %v188_v43  ;;  %v184_v57 = vrot.slane %v183_v48, 4  ;;  %v6382_v39 = vld [vmem:[#allocation2 + $0x170] sm:$0xff]  ;;  %v5381_v41 = vrot.slane %v568_v32, 9 }
  0x3d   :  { %943 = vmatpush.bf16.msrb.mxu2 %v6362_v47  ;;  %v670_v47 = vunpack.c.l.b16 %v617_v36  ;;  %v222_v37 = vrot.slane %v220_v30, 5  ;;  %v1028_v44 = vshrl.u32 %v5496_v33, 16  ;;  %v1041_v48 = vshrl.u32 %v6859_v34, 16 }
  0x3e   :  { %v194_v60 = vrot.slane %v193_v53, 4  ;;  %v189_v4 = vsel %vm6675_vm4, %v184_v57, %v188_v43  ;;  %v630_v43 = vrot.slane %v74_v22, 5 }
  0x3f   :  { %520 = vmatpush.bf16.msrb.mxu1 %v6329_v49  ;;  %1322 = vmatpush.bf16.msrb.mxu0 %v6369_v24  ;;  %v196_v49 = vshll.u32 %v73_v42, 16  ;;  %v297_v12 = vunpack.c.l.b16 %v189_v4  ;;  %v629_v42 = vrot.slane %v627_v31, 4  ;;  %v1030_v53 = vrot.slane %v1028_v44, 4  ;;  %v6323_v4 = vld [vmem:[%s9094_s0 + $0x24] sm:$0xff] }
  0x41   :  { %944 = vmatpush.bf16.msrb.mxu2 %v6361_v55  ;;  %v682_v55 = vpack.c.b16 %v670_v47, %v669_v45  ;;  %v198_v59 = vrot.slane %v196_v49, 5  ;;  %v1031_v45 = vshll.u32 %v5496_v33, 16  ;;  %v1037_v47 = vshll.u32 %v6859_v34, 16 }
  0x43   :  { %521 = vmatpush.bf16.msrb.mxu1 %v6328_v61  ;;  %v5380_v61 = vrot.slane %v567_v56, 9  ;;  %1323 = vmatpush.bf16.msrb.mxu0 %v6368_v0  ;;  %v199_v5 = vsel %vm6675_vm4, %v194_v60, %v198_v59  ;;  %v1043_v56 = vrot.slane %v1041_v48, 4  ;;  %v6874_v60 = vld [vmem:[%s9094_s0 + $0x14] sm:$0x1] }
  0x44   :  { %v298_v13 = vunpack.c.l.b16 %v199_v5  ;;  %v6358_v48 = vld [vmem:[%s9094_s0 + $0x54] sm:$0xff] }
  0x45   :  { %945 = vmatpush.bf16.msrb.mxu2 %v6360_v2  ;;  %v47_v2 = vld [vmem:[%s9094_s0 + $0x3c] sm:$0xf]  ;;  %v621_v6 = vsel %vm6679_vm5, %v5380_v61, %v620_v54  ;;  %v1033_v54 = vrot.slane %v1031_v45, 5 }
  0x46   :  { %387 = vmatmul.bf16.gmra.mxu0 %v307_v9  ;;  %522 = vmatmul.bf16.vlgmr.msrb.gmra.mxu1 %v6320_v10  ;;  %v201_v8 = vshrl.u32 %v47_v2, 16  ;;  %v204_v9 = vshll.u32 %v47_v2, 16  ;;  %v210_v10 = vshll.u32 %v48_v3, 16  ;;  %v671_v15 = vunpack.c.l.b16 %v621_v6  ;;  %v6357_v2 = vld [vmem:[%s9094_s0 + $0x48] sm:$0xff] }
  0x47   :  { %1566 = vmatpush.bf16.msra.mxu1 %v6383_v1  ;;  %v309_v24 = vpack.c.b16 %v298_v13, %v297_v12  ;;  %2389 = vmatpush.bf16.msra.mxu0 %v6415_v38  ;;  %v1034_v63 = vor.u32 %v1033_v54, %v1030_v53  ;;  %v1047_v1 = vshll.u32 %v6874_v60, 16  ;;  %v634_v6 = vrot.slane %v6656_v14, 5  ;;  %v6893_v12 = vld [vmem:[%s9094_s0 + $0x1c] sm:$0xf]  ;;  %v6414_v14 = vld [vmem:[#allocation2 + $0x230] sm:$0xff] }
  0x48   :  { %761 = vmatmul.bf16.gmra.mxu2 %v681_v11  ;;  %v214_v11 = vshrl.u32 %v48_v3, 16  ;;  %v203_v17 = vrot.slane %v201_v8, 4  ;;  %v206_v18 = vrot.slane %v204_v9, 5  ;;  %v212_v20 = vrot.slane %v210_v10, 5  ;;  %v6407_v13 = vld [vmem:[#allocation2 + $0x1f8] sm:$0xff] }
  0x49   :  { %v683_v26 = vpack.c.b16 %v672_v16, %v671_v15  ;;  %v1035_v8 = vrot.slane %v1034_v63, 4  ;;  %v1049_v10 = vrot.slane %v1047_v1, 5  ;;  %v6381_v15 = vld [vmem:[#allocation2 + $0x168] sm:$0xff]  ;;  %v5382_v16 = vrot.slane %v569_v7, 9  ;;  %2139 = vmatpush.bf16.msrb.mxu3 %v6407_v13  ;;  %v6399_v54 = vld [vmem:[#allocation2 + $0x1b8] sm:$0xff]  ;;  %v6406_v63 = vld [vmem:[#allocation2 + $0x1f0] sm:$0xff] }
  0x4a   :  { %v216_v21 = vrot.slane %v214_v11, 4  ;;  %v207_v27 = vor.u32 %v206_v18, %v203_v17  ;;  %v5499_v11 = vld [vmem:[%s9094_s0 + $0x18] sm:$0xf]  ;;  %v636_v17 = vrot.slane %v634_v6, 4  ;;  %v637_v18 = vrot.slane %v6663_v19, 5  ;;  %1761 = vmatpush.bf16.msra.mxu2 %v6399_v54 }
  0x4b   :  { %1567 = vmatpush.bf16.msra.mxu1 %v6382_v39  ;;  %2390 = vmatpush.bf16.msra.mxu0 %v6414_v14  ;;  %v1052_v22 = vshrl.u32 %v5499_v11, 16  ;;  %v641_v38 = vrot.slane %v6702_v58, 5  ;;  %v6324_v39 = vld [vmem:[%s9094_s0 + $0x30] sm:$0xff] }
  0x4c   :  { %961 = vmatmul.bf16.gmra.mxu3 %v6355_v50  ;;  %v217_v28 = vor.u32 %v216_v21, %v212_v20  ;;  %v208_v35 = vrot.slane %v207_v27, 4  ;;  %v638_v19 = vsel %vm6679_vm5, %v636_v17, %v637_v18  ;;  %v6405_v17 = vld [vmem:[#allocation2 + $0x1e8] sm:$0xff]  ;;  %v6325_v18 = vld [vmem:[%s9094_s0 + $0x3c] sm:$0xff] }
  0x4d   :  { %v1054_v30 = vrot.slane %v1052_v22, 4  ;;  %v643_v58 = vrot.slane %v641_v38, 4  ;;  %2140 = vmatpush.bf16.msrb.mxu3 %v6406_v63  ;;  %v6980_v63 = vld [vmem:[%s9094_s0 + $0x20] sm:$0x1] }
  0x4e   :  { %v218_v36 = vrot.slane %v217_v28, 4  ;;  %v213_v49 = vsel %vm6675_vm4, %v208_v35, %v212_v20 }
  0x4f   :  { %v299_v57 = vunpack.c.l.b16 %v213_v49  ;;  %1568 = vmatpush.bf16.msra.mxu1 %v6381_v15 }
  0x50   :  { %v223_v50 = vsel %vm6675_vm4, %v218_v36, %v222_v37  ;;  %v676_v36 = vunpack.c.l.b16 %v638_v19  ;;  %v6909_v37 = vld [vmem:[%s9094_s0 + $0x20] sm:$0x1] }
  0x51   :  { %v300_v59 = vunpack.c.l.b16 %v223_v50  ;;  %v1071_v45 = vshll.u32 %v6909_v37, 16  ;;  %v644_v50 = vrot.slane %v6728_v29, 5  ;;  %2141 = vmatpush.bf16.msrb.mxu3 %v6405_v17  ;;  %v6404_v19 = vld [vmem:[#allocation2 + $0x1e0] sm:$0xff] }
  0x53   :  { %v310_v3 = vpack.c.b16 %v300_v59, %v299_v57  ;;  %v1073_v53 = vrot.slane %v1071_v45, 5  ;;  %v6929_v57 = vld [vmem:[%s9094_s0 + $0x28] sm:$0xf]  ;;  %v645_v59 = vsel %vm6679_vm5, %v643_v58, %v644_v50 }
  0x54   :  { %v6377_v58 = vld [vmem:[#allocation2 + $0x148] sm:$0xff] }
  0x55   :  { %2142 = vmatpush.bf16.msrb.mxu3 %v6404_v19  ;;  %v6393_v50 = vld [vmem:[#allocation2 + $0x188] sm:$0xff] }
  0x56   :  { %392 = vmatmul.bf16.gmra.mxu0 %v308_v51  ;;  %527 = vmatmul.bf16.gmra.mxu1 %v6321_v52  ;;  %v628_v51 = vsel %vm6679_vm5, %v5381_v41, %v627_v31  ;;  %v631_v52 = vsel %vm6679_vm5, %v629_v42, %v630_v43  ;;  %v570_v42 = vld [vmem:[%s9094_s0 + $0x54] sm:$0xe] }
  0x57   :  { %v673_v61 = vunpack.c.l.b16 %v628_v51  ;;  %v674_v62 = vunpack.c.l.b16 %v631_v52  ;;  %v5383_v49 = vrot.slane %v570_v42, 9  ;;  %v6378_v42 = vld [vmem:[#allocation2 + $0x150] sm:$0xff] }
  0x58   :  { %766 = vmatmul.bf16.gmra.mxu2 %v682_v55  ;;  %v1039_v55 = vrot.slane %v1037_v47, 5 }
  0x59   :  { %v684_v5 = vpack.c.b16 %v674_v62, %v673_v61  ;;  %v642_v29 = vsel %vm6679_vm5, %v5383_v49, %v641_v38  ;;  %v6403_v38 = vld [vmem:[#allocation2 + $0x1d8] sm:$0xff]  ;;  %v6402_v49 = vld [vmem:[#allocation2 + $0x1d0] sm:$0xff] }
  0x5a   :  { %v1044_v0 = vor.u32 %v1043_v56, %v1039_v55  ;;  %v1040_v20 = vsel %vm6675_vm4, %v1035_v8, %v1039_v55  ;;  %v6413_v55 = vld [vmem:[#allocation2 + $0x228] sm:$0xff]  ;;  %v5502_v56 = vld [vmem:[%s9094_s0 + $0x24] sm:$0xf]  ;;  %v677_v7 = vunpack.c.l.b16 %v642_v29  ;;  %v678_v8 = vunpack.c.l.b16 %v645_v59  ;;  %2143 = vmatpush.bf16.msrb.mxu3 %v6403_v38  ;;  %v6973_v59 = vld [vmem:[%s9094_s0 + $0x1c] sm:$0xf] }
  0x5b   :  { %v1236_v27 = vunpack.c.l.b16 %v1040_v20  ;;  %2391 = vmatpush.bf16.msra.mxu0 %v6413_v55  ;;  %v1076_v1 = vshrl.u32 %v5502_v56, 16 }
  0x5c   :  { %966 = vmatmul.bf16.gmra.mxu3 %v6356_v23  ;;  %v1045_v9 = vrot.slane %v1044_v0, 4  ;;  %v1055_v23 = vshll.u32 %v5499_v11, 16  ;;  %v6398_v0 = vld [vmem:[#allocation2 + $0x1b0] sm:$0xff]  ;;  %v686_v22 = vpack.c.b16 %v678_v8, %v677_v7  ;;  %v6326_v7 = vld [vmem:[%s9094_s0 + $0x48] sm:$0xff] }
  0x5d   :  { %1762 = vmatpush.bf16.msra.mxu2 %v6398_v0  ;;  %v1078_v11 = vrot.slane %v1076_v1, 4 }
  0x5e   :  { %v1050_v21 = vsel %vm6675_vm4, %v1045_v9, %v1049_v10  ;;  %v1057_v31 = vrot.slane %v1055_v23, 5  ;;  %2144 = vmatpush.bf16.msrb.mxu3 %v6402_v49 }
  0x5f   :  { %v1237_v28 = vunpack.c.l.b16 %v1050_v21  ;;  %v6396_v21 = vld [vmem:[#allocation2 + $0x1a0] sm:$0xff] }
  0x60   :  { %v1058_v43 = vor.u32 %v1057_v31, %v1054_v30 }
  0x61   :  { %v1252_v41 = vpack.c.b16 %v1237_v28, %v1236_v27  ;;  %v6379_v27 = vld [vmem:[#allocation2 + $0x158] sm:$0xff] }
  0x62   :  { %v1059_v51 = vrot.slane %v1058_v43, 4  ;;  %v6395_v28 = vld [vmem:[#allocation2 + $0x198] sm:$0xff]  ;;  %v6394_v43 = vld [vmem:[#allocation2 + $0x190] sm:$0xff] }
  0x66   :  { %397 = vmatmul.bf16.gmra.mxu0 %v309_v24  ;;  %532 = vmatmul.bf16.gmra.mxu1 %v6322_v25  ;;  %v1061_v24 = vshll.u32 %v6893_v12, 16  ;;  %v1065_v25 = vshrl.u32 %v6893_v12, 16 }
  0x68   :  { %771 = vmatmul.bf16.gmra.mxu2 %v683_v26  ;;  %v635_v26 = vsel %vm6679_vm5, %v5382_v16, %v634_v6  ;;  %v1063_v32 = vrot.slane %v1061_v24, 5  ;;  %v1067_v33 = vrot.slane %v1065_v25, 4  ;;  %v6397_v6 = vld [vmem:[#allocation2 + $0x1a8] sm:$0xff] }
  0x69   :  { %v675_v35 = vunpack.c.l.b16 %v635_v26  ;;  %v6944_v16 = vld [vmem:[%s9094_s0 + $0x2c] sm:$0x1]  ;;  %1763 = vmatpush.bf16.msra.mxu2 %v6397_v6  ;;  %v6359_v26 = vld [vmem:[%s9094_s0 + $0x60] sm:$0xff]  ;;  %v1864_v6 = vshrl.u32 %v6973_v59, 16 }
  0x6a   :  { %v1068_v44 = vor.u32 %v1067_v33, %v1063_v32  ;;  %v1064_v61 = vsel %vm6675_vm4, %v1059_v51, %v1063_v32  ;;  %v1095_v25 = vshll.u32 %v6944_v16, 16  ;;  %v5505_v33 = vld [vmem:[%s9094_s0 + $0x30] sm:$0xf]  ;;  %v5680_v51 = vld [vmem:[%s9094_s0 + $0x18] sm:$0xf] }
  0x6b   :  { %v685_v47 = vpack.c.b16 %v676_v36, %v675_v35  ;;  %v1238_v9 = vunpack.c.l.b16 %v1064_v61  ;;  %v6412_v35 = vld [vmem:[#allocation2 + $0x220] sm:$0xff]  ;;  %v6959_v36 = vld [vmem:[%s9094_s0 + $0x34] sm:$0xf] }
  0x6c   :  { %971 = vmatmul.bf16.gmra.mxu3 %v6357_v2  ;;  %v1069_v52 = vrot.slane %v1068_v44, 4  ;;  %v1079_v2 = vshll.u32 %v5502_v56, 16  ;;  %v1097_v32 = vrot.slane %v1095_v25, 5  ;;  %2392 = vmatpush.bf16.msra.mxu0 %v6412_v35  ;;  %v5508_v25 = vld [vmem:[%s9094_s0 + $0x3c] sm:$0xf] }
  0x6d   :  { %1764 = vmatpush.bf16.msra.mxu2 %v6396_v21  ;;  %v6400_v21 = vld [vmem:[#allocation2 + $0x1c0] sm:$0xff]  ;;  %v1124_v35 = vshrl.u32 %v5508_v25, 16  ;;  %v1127_v38 = vshll.u32 %v5508_v25, 16  ;;  %v1415_v25 = vrot.slane %v6859_v34, 5  ;;  %v7072_v34 = vld [vmem:[%s9094_s0 + $0x4c] sm:$0xf] }
  0x6e   :  { %v1074_v62 = vsel %vm6675_vm4, %v1069_v52, %v1073_v53  ;;  %v1081_v14 = vrot.slane %v1079_v2, 5  ;;  %v1851_v52 = vshrl.u32 %v5680_v51, 16  ;;  %v1854_v53 = vshll.u32 %v5680_v51, 16  ;;  %v6985_v2 = vld [vmem:[%s9094_s0 + $0x38] sm:$0x1] }
  0x6f   :  { %v1239_v10 = vunpack.c.l.b16 %v1074_v62  ;;  %v5683_v51 = vld [vmem:[%s9094_s0 + $0x24] sm:$0xf] }
  0x70   :  { %v1082_v23 = vor.u32 %v1081_v14, %v1078_v11  ;;  %v1853_v0 = vrot.slane %v1851_v52, 4  ;;  %v1856_v1 = vrot.slane %v1854_v53, 5  ;;  %v1870_v11 = vshll.u32 %v6980_v63, 16 }
  0x71   :  { %v1253_v20 = vpack.c.b16 %v1239_v10, %v1238_v9  ;;  %1765 = vmatpush.bf16.msra.mxu2 %v6395_v28  ;;  %v6376_v9 = vld [vmem:[#allocation2 + $0x140] sm:$0xff]  ;;  %v1126_v52 = vrot.slane %v1124_v35, 4  ;;  %v1129_v53 = vrot.slane %v1127_v38, 5  ;;  %v5511_v35 = vld [vmem:[%s9094_s0 + $0x48] sm:$0xf]  ;;  %v1418_v38 = vrot.slane %v6874_v60, 5 }
  0x72   :  { %v1083_v30 = vrot.slane %v1082_v23, 4  ;;  %v6392_v10 = vld [vmem:[#allocation2 + $0x180] sm:$0xff]  ;;  %v1872_v28 = vrot.slane %v1870_v11, 5 }
  0x75   :  { %1766 = vmatpush.bf16.msra.mxu2 %v6394_v43 }
  0x76   :  { %402 = vmatmul.bf16.gmra.mxu0 %v310_v3  ;;  %537 = vmatmul.bf16.gmra.mxu1 %v6323_v4  ;;  %v1085_v3 = vshll.u32 %v6929_v57, 16  ;;  %v1089_v4 = vshrl.u32 %v6929_v57, 16 }
  0x78   :  { %776 = vmatmul.bf16.gmra.mxu2 %v684_v5  ;;  %v6380_v5 = vld [vmem:[#allocation2 + $0x160] sm:$0xff]  ;;  %v1087_v13 = vrot.slane %v1085_v3, 5  ;;  %v1091_v15 = vrot.slane %v1089_v4, 4  ;;  %v6401_v3 = vld [vmem:[#allocation2 + $0x1c8] sm:$0xff]  ;;  %v1857_v4 = vor.u32 %v1856_v1, %v1853_v0 }
  0x79   :  { %1569 = vmatpush.bf16.msra.mxu1 %v6380_v5  ;;  %1767 = vmatpush.bf16.msra.mxu2 %v6393_v50  ;;  %v1860_v5 = vshll.u32 %v6973_v59, 16 }
  0x7a   :  { %v1092_v24 = vor.u32 %v1091_v15, %v1087_v13  ;;  %v1088_v44 = vsel %vm6675_vm4, %v1083_v30, %v1087_v13  ;;  %v6352_v15 = vld [vmem:[%s9094_s0 + $0xc] sm:$0xff]  ;;  %2145 = vmatpush.bf16.msrb.mxu3 %v6401_v3  ;;  %v7038_v3 = vld [vmem:[%s9094_s0 + $0x44] sm:$0x1] }
  0x7b   :  { %v1240_v54 = vunpack.c.l.b16 %v1088_v44  ;;  %v1862_v23 = vrot.slane %v1860_v5, 5 }
  0x7c   :  { %976 = vmatmul.bf16.gmra.mxu3 %v6358_v48  ;;  %v1093_v31 = vrot.slane %v1092_v24, 4  ;;  %v1113_v48 = vshrl.u32 %v6959_v36, 16  ;;  %v1866_v24 = vrot.slane %v1864_v6, 4 }
  0x7d   :  { %1570 = vmatpush.bf16.msra.mxu1 %v6379_v27  ;;  %1768 = vmatpush.bf16.msra.mxu2 %v6392_v10  ;;  %v1143_v10 = vshll.u32 %v7038_v3, 16 }
  0x7e   :  { %v1098_v45 = vsel %vm6675_vm4, %v1093_v31, %v1097_v32  ;;  %v1115_v62 = vrot.slane %v1113_v48, 4  ;;  %v1867_v27 = vor.u32 %v1866_v24, %v1862_v23  ;;  %2146 = vmatpush.bf16.msrb.mxu3 %v6400_v21  ;;  %v5552_v24 = vld [vmem:[%s9094_s0 + $0xc] sm:$0xe] }
  0x7f   :  { %v1241_v55 = vunpack.c.l.b16 %v1098_v45 }
  0x81   :  { %1571 = vmatpush.bf16.msra.mxu1 %v6378_v42  ;;  %v1254_v8 = vpack.c.b16 %v1241_v55, %v1240_v54  ;;  %v7033_v54 = vld [vmem:[%s9094_s0 + $0x28] sm:$0xf]  ;;  %v1875_v55 = vshrl.u32 %v5683_v51, 16 }
  0x82   :  { %v1884_v6 = vshll.u32 %v7033_v54, 16 }
  0x85   :  { %1572 = vmatpush.bf16.msra.mxu1 %v6377_v58 }
  0x86   :  { %542 = vmatmul.bf16.gmra.mxu1 %v6324_v39  ;;  %1324 = vmatmul.bf16.vlgmr.msrb.gmra.mxu0 %v1252_v41  ;;  %v1100_v39 = vshrl.u32 %v5505_v33, 16  ;;  %v1103_v41 = vshll.u32 %v5505_v33, 16  ;;  %v6411_v33 = vld [vmem:[#allocation2 + $0x218] sm:$0xff] }
  0x87   :  { %2393 = vmatpush.bf16.msra.mxu0 %v6411_v33  ;;  %v1145_v33 = vrot.slane %v1143_v10, 5 }
  0x88   :  { %781 = vmatmul.bf16.gmra.mxu2 %v685_v47  ;;  %v1109_v47 = vshll.u32 %v6959_v36, 16  ;;  %v1102_v56 = vrot.slane %v1100_v39, 4  ;;  %v1105_v29 = vrot.slane %v1103_v41, 5  ;;  %v1868_v39 = vrot.slane %v1867_v27, 4 }
  0x89   :  { %1573 = vmatpush.bf16.msra.mxu1 %v6376_v9 }
  0x8a   :  { %v6975_v61 = vrot.slane %v1109_v47, 5  ;;  %v1106_v17 = vor.u32 %v1105_v29, %v1102_v56  ;;  %v1873_v45 = vsel %vm6675_vm4, %v1868_v39, %v1872_v28  ;;  %v5560_v39 = vrot.slane %v5552_v24, 9 }
  0x8b   :  { %v2060_v50 = vunpack.c.l.b16 %v1873_v45 }
  0x8c   :  { %981 = vmatmul.bf16.gmra.mxu3 %v6359_v26  ;;  %v7008_v26 = vld [vmem:[%s9094_s0 + $0x40] sm:$0xf]  ;;  %v1107_v30 = vrot.slane %v1106_v17, 4 }
  0x8d   :  { %v1133_v41 = vshll.u32 %v7008_v26, 16  ;;  %v1137_v42 = vshrl.u32 %v7008_v26, 16 }
  0x8e   :  { %v1112_v49 = vsel %vm6675_vm4, %v1107_v30, %v6975_v61 }
  0x8f   :  { %v1135_v56 = vrot.slane %v1133_v41, 5  ;;  %v1139_v29 = vrot.slane %v1137_v42, 4  ;;  %v1242_v0 = vunpack.c.l.b16 %v1112_v49  ;;  %v1417_v41 = vrot.slane %v1415_v25, 4  ;;  %v6410_v42 = vld [vmem:[#allocation2 + $0x210] sm:$0xff] }
  0x90   :  { %2394 = vmatpush.bf16.msra.mxu0 %v6410_v42 }
  0x91   :  { %v1140_v9 = vor.u32 %v1139_v29, %v1135_v56  ;;  %v1157_v29 = vshll.u32 %v7072_v34, 16 }
  0x96   :  { %547 = vmatmul.bf16.gmra.mxu1 %v6325_v18  ;;  %1329 = vmatmul.bf16.gmra.mxu0 %v1253_v20  ;;  %v1116_v18 = vor.u32 %v1115_v62, %v6975_v61  ;;  %v1119_v20 = vshll.u32 %v6985_v2, 16  ;;  %v1878_v61 = vshll.u32 %v5683_v51, 16 }
  0x98   :  { %786 = vmatmul.bf16.gmra.mxu2 %v686_v22  ;;  %v1858_v22 = vrot.slane %v1857_v4, 4  ;;  %v1117_v31 = vrot.slane %v1116_v18, 4  ;;  %v1121_v32 = vrot.slane %v1119_v20, 5  ;;  %v1877_v4 = vrot.slane %v1875_v55, 4  ;;  %v6327_v18 = vld [vmem:[%s9094_s0 + $0x54] sm:$0xff] }
  0x99   :  { %v1880_v5 = vrot.slane %v1878_v61, 5  ;;  %v1416_v55 = vsel %vm6679_vm5, %v5560_v39, %v1415_v25  ;;  %v7105_v25 = vld [vmem:[%s9094_s0 + $0x50] sm:$0x1]  ;;  %v1422_v39 = vrot.slane %v6893_v12, 5  ;;  %v6384_v12 = vld [vmem:[%s9094_s0 + $0x18] sm:$0xff] }
  0x9a   :  { %v1863_v19 = vsel %vm6675_vm4, %v1858_v22, %v1862_v23  ;;  %v1122_v58 = vsel %vm6675_vm4, %v1117_v31, %v1121_v32  ;;  %v6353_v23 = vld [vmem:[%s9094_s0 + $0x18] sm:$0xff]  ;;  %v1141_v32 = vrot.slane %v1140_v9, 4 }
  0x9b   :  { %v2059_v43 = vunpack.c.l.b16 %v1863_v19  ;;  %v1243_v1 = vunpack.c.l.b16 %v1122_v58  ;;  %v1881_v11 = vor.u32 %v1880_v5, %v1877_v4  ;;  %v1886_v19 = vrot.slane %v1884_v6, 5  ;;  %v5686_v5 = vld [vmem:[%s9094_s0 + $0x30] sm:$0xf] }
  0x9c   :  { %v1148_v58 = vshrl.u32 %v5511_v35, 16  ;;  %v1146_v51 = vsel %vm6675_vm4, %v1141_v32, %v1145_v33 }
  0x9d   :  { %v2075_v62 = vpack.c.b16 %v2060_v50, %v2059_v43  ;;  %v1255_v20 = vpack.c.b16 %v1243_v1, %v1242_v0  ;;  %v1882_v28 = vrot.slane %v1881_v11, 4  ;;  %v1151_v50 = vshll.u32 %v5511_v35, 16  ;;  %v7100_v11 = vld [vmem:[%s9094_s0 + $0x34] sm:$0xf]  ;;  %v7113_v35 = vld [vmem:[%s9094_s0 + $0x38] sm:$0x1] }
  0x9e   :  { %v1908_v32 = vshll.u32 %v7100_v11, 16 }
  0x9f   :  { %2147 = vmatmul.bf16.vlgmr.msrb.gmra.mxu3 %v2075_v62  ;;  %v1887_v43 = vsel %vm6675_vm4, %v1882_v28, %v1886_v19  ;;  %v1161_v62 = vshrl.u32 %v7072_v34, 16  ;;  %v1153_v9 = vrot.slane %v1151_v50, 5  ;;  %v1912_v50 = vshrl.u32 %v7100_v11, 16 }
  0xa0   :  { %v2061_v61 = vunpack.c.l.b16 %v1887_v43 }
  0xa3   :  { %v6993_v14 = vpop.f32.mrf.mxu0  ;;  %v6995_v13 = vpop.f32.mrf.mxu1 }
  0xa4   :  { %9111 = vst [vmem:[#allocation10_spill] sm:$0xff] %v6995_v13 }
  0xa6   :  { %552 = vmatmul.bf16.gmra.mxu1 %v6326_v7  ;;  %1334 = vmatmul.bf16.gmra.mxu0 %v1254_v8  ;;  %v1130_v7 = vor.u32 %v1129_v53, %v1126_v52  ;;  %v7044_v8 = vld [vmem:[%s9094_s0 + $0x2c] sm:$0x1] }
  0xa7   :  { %v1894_v27 = vshll.u32 %v7044_v8, 16 }
  0xa8   :  { %946 = vmatmul.bf16.vlgmr.msrb.gmra.mxu2 %v6352_v15  ;;  %v1888_v15 = vshrl.u32 %v7033_v54, 16  ;;  %v1131_v31 = vrot.slane %v1130_v7, 4  ;;  %v1150_v7 = vrot.slane %v1148_v58, 4  ;;  %v5553_v58 = vld [vmem:[%s9094_s0 + $0x18] sm:$0xe] }
  0xa9   :  { %v1896_v49 = vrot.slane %v1894_v27, 5  ;;  %v1163_v27 = vrot.slane %v1161_v62, 4 }
  0xaa   :  { %v1890_v30 = vrot.slane %v1888_v15, 4  ;;  %v1136_v60 = vsel %vm6675_vm4, %v1131_v31, %v1135_v56  ;;  %v1419_v56 = vsel %vm6679_vm5, %v1417_v41, %v1418_v38  ;;  %v1245_v15 = vunpack.c.l.b16 %v1146_v51 }
  0xab   :  { %v7014_v44 = vpop.f32.mrf.mxu2  ;;  %v7018_v47 = vpop.f32.mrf.mxu0  ;;  %v1244_v6 = vunpack.c.l.b16 %v1136_v60  ;;  %v1487_v24 = vunpack.c.l.b16 %v1419_v56  ;;  %v1154_v33 = vor.u32 %v1153_v9, %v1150_v7  ;;  %v1167_v38 = vshll.u32 %v7105_v25, 16  ;;  %v7137_v7 = vld [vmem:[%s9094_s0 + $0x58] sm:$0xf] }
  0xac   :  { %v7020_v48 = vpop.f32.mrf.mxu1  ;;  %v1891_v45 = vor.u32 %v1890_v30, %v1886_v19  ;;  %v7107_v19 = vrot.slane %v1157_v29, 5  ;;  %v1918_v29 = vshll.u32 %v7113_v35, 16  ;;  %v1914_v9 = vrot.slane %v1912_v50, 4 }
  0xad   :  { %v1256_v43 = vpack.c.b16 %v1245_v15, %v1244_v6  ;;  %v1424_v6 = vrot.slane %v1422_v39, 4 }
  0xae   :  { %v1892_v52 = vrot.slane %v1891_v45, 4 }
  0xb0   :  { %v1897_v4 = vsel %vm6675_vm4, %v1892_v52, %v1896_v49  ;;  %v1164_v49 = vor.u32 %v1163_v27, %v7107_v19  ;;  %v5514_v52 = vld [vmem:[%s9094_s0 + $0x54] sm:$0xf] }
  0xb1   :  { %v2062_v10 = vunpack.c.l.b16 %v1897_v4  ;;  %v1169_v4 = vrot.slane %v1167_v38, 5 }
  0xb2   :  { %v1165_v15 = vrot.slane %v1164_v49, 4 }
  0xb3   :  { %v7048_v17 = vpop.f32.mrf.mxu2  ;;  %v7053_v21 = vpop.f32.mrf.mxu0  ;;  %v2076_v28 = vpack.c.b16 %v2062_v10, %v2061_v61  ;;  %v1155_v61 = vrot.slane %v1154_v33, 4 }
  0xb4   :  { %v7055_v22 = vpop.f32.mrf.mxu1 }
  0xb5   :  { %9112 = vst [vmem:[#allocation11_spill] sm:$0xff] %v7055_v22  ;;  %2152 = vmatmul.bf16.gmra.mxu3 %v2076_v28  ;;  %v1920_v28 = vrot.slane %v1918_v29, 5 }
  0xb6   :  { %557 = vmatmul.bf16.gmra.mxu1 %v6327_v18  ;;  %1339 = vmatmul.bf16.gmra.mxu0 %v1255_v20  ;;  %v1486_v18 = vunpack.c.l.b16 %v1416_v55  ;;  %v1899_v20 = vshrl.u32 %v5686_v5, 16  ;;  %v1910_v55 = vrot.slane %v1908_v32, 5 }
  0xb8   :  { %951 = vmatmul.bf16.gmra.mxu2 %v6353_v23  ;;  %v1902_v23 = vshll.u32 %v5686_v5, 16  ;;  %v1901_v30 = vrot.slane %v1899_v20, 4  ;;  %v1502_v45 = vpack.c.b16 %v1487_v24, %v1486_v18  ;;  %v5561_v5 = vrot.slane %v5553_v58, 9 }
  0xb9   :  { %v1172_v18 = vshrl.u32 %v5514_v52, 16  ;;  %v1175_v20 = vshll.u32 %v5514_v52, 16  ;;  %v1915_v27 = vor.u32 %v1914_v9, %v1910_v55 }
  0xba   :  { %v1904_v31 = vrot.slane %v1902_v23, 5  ;;  %v6409_v23 = vld [vmem:[#allocation2 + $0x208] sm:$0xff]  ;;  %v1423_v58 = vsel %vm6679_vm5, %v5561_v5, %v1422_v39  ;;  %v7171_v39 = vld [vmem:[%s9094_s0 + $0x5c] sm:$0x1] }
  0xbb   :  { %v7080_v53 = vpop.f32.mrf.mxu2  ;;  %v7086_v0 = vpop.f32.mrf.mxu0  ;;  %2395 = vmatpush.bf16.msra.mxu0 %v6409_v23  ;;  %v1916_v32 = vrot.slane %v1915_v27, 4  ;;  %v1174_v38 = vrot.slane %v1172_v18, 4 }
  0xbc   :  { %v7088_v1 = vpop.f32.mrf.mxu1  ;;  %v1905_v41 = vor.u32 %v1904_v31, %v1901_v30  ;;  %v1181_v30 = vshll.u32 %v7137_v7, 16  ;;  %v1185_v31 = vshrl.u32 %v7137_v7, 16 }
  0xbd   :  { %9113 = vst [vmem:[#allocation12_spill] sm:$0xff] %v7088_v1 }
  0xbe   :  { %v1906_v56 = vrot.slane %v1905_v41, 4  ;;  %v1177_v41 = vrot.slane %v1175_v20, 5  ;;  %v1183_v52 = vrot.slane %v1181_v30, 5  ;;  %v5554_v20 = vld [vmem:[%s9094_s0 + $0x24] sm:$0xe] }
  0xbf   :  { %v7166_v29 = vpop.f32.mrf.mxu3  ;;  %v7188_v30 = vld [vmem:[%s9094_s0 + $0x44] sm:$0x1] }
  0xc0   :  { %v1911_v24 = vsel %vm6675_vm4, %v1906_v56, %v1910_v55  ;;  %v1187_v55 = vrot.slane %v1185_v31, 4 }
  0xc2   :  { %v1188_v27 = vor.u32 %v1187_v55, %v1183_v52 }
  0xc3   :  { %v7117_v42 = vpop.f32.mrf.mxu2  ;;  %v7124_v60 = vpop.f32.mrf.mxu0 }
  0xc4   :  { %v523_v51 = vpop.f32.mrf.mxu1 }
  0xc5   :  { %v524_v62 = vadd.f32 %v523_v51, %v6993_v14  ;;  %v1425_v14 = vrot.slane %v6909_v37, 5  ;;  %v1170_v37 = vsel %vm6675_vm4, %v1165_v15, %v1169_v4  ;;  %v5689_v51 = vld [vmem:[%s9094_s0 + $0x3c] sm:$0xf]  ;;  %v1178_v15 = vor.u32 %v1177_v41, %v1174_v38 }
  0xc6   :  { %1344 = vmatmul.bf16.gmra.mxu0 %v1256_v43  ;;  %1574 = vmatmul.bf16.vlgmr.msra.gmra.mxu1 %v1502_v45  ;;  %v2063_v43 = vunpack.c.l.b16 %v1911_v24  ;;  %v1247_v56 = vunpack.c.l.b16 %v1170_v37  ;;  %v1923_v4 = vshrl.u32 %v5689_v51, 16  ;;  %v1926_v5 = vshll.u32 %v5689_v51, 16  ;;  %v6385_v51 = vld [vmem:[%s9094_s0 + $0x24] sm:$0xff] }
  0xc7   :  { %v7140_v10 = vadd.f32 %v7014_v44, %v524_v62  ;;  %v1160_v44 = vsel %vm6675_vm4, %v1155_v61, %v7107_v19  ;;  %v1426_v50 = vsel %vm6679_vm5, %v1424_v6, %v1425_v14  ;;  %v1921_v19 = vsel %vm6675_vm4, %v1916_v32, %v1920_v28 }
  0xc8   :  { %1769 = vmatmul.bf16.vlgmr.msra.gmra.mxu2 %v6384_v12  ;;  %v2064_v62 = vunpack.c.l.b16 %v1921_v19  ;;  %v1246_v61 = vunpack.c.l.b16 %v1160_v44  ;;  %v1488_v6 = vunpack.c.l.b16 %v1423_v58  ;;  %v1489_v9 = vunpack.c.l.b16 %v1426_v50 }
  0xc9   :  { %v1925_v14 = vrot.slane %v1923_v4, 4  ;;  %v1928_v23 = vrot.slane %v1926_v5, 5  ;;  %v1191_v28 = vshll.u32 %v7171_v39, 16  ;;  %v1429_v44 = vrot.slane %v6929_v57, 5  ;;  %v5517_v57 = vld [vmem:[%s9094_s0 + $0x60] sm:$0xf] }
  0xca   :  { %v2077_v18 = vpack.c.b16 %v2064_v62, %v2063_v43  ;;  %v1257_v31 = vpack.c.b16 %v1247_v56, %v1246_v61  ;;  %v1503_v41 = vpack.c.b16 %v1489_v9, %v1488_v6  ;;  %v5562_v43 = vrot.slane %v5554_v20, 9 }
  0xcb   :  { %v7150_v33 = vpop.f32.mrf.mxu2  ;;  %v7154_v45 = vpop.f32.mrf.mxu0  ;;  %v1929_v32 = vor.u32 %v1928_v23, %v1925_v14  ;;  %v9100_v58 = vrot.slane %v6973_v59, 5  ;;  %v1189_v62 = vrot.slane %v1188_v27, 4  ;;  %v1193_v61 = vrot.slane %v1191_v28, 5  ;;  %v7219_v14 = vld [vmem:[%s9094_s0 + $0x64] sm:$0xf] }
  0xcc   :  { %v525_v49 = vpop.f32.mrf.mxu1  ;;  %2157 = vmatmul.bf16.gmra.mxu3 %v2077_v18  ;;  %v1431_v4 = vrot.slane %v1429_v44, 4  ;;  %v1432_v5 = vrot.slane %v6944_v16, 5  ;;  %v1430_v20 = vsel %vm6679_vm5, %v5562_v43, %v1429_v44  ;;  %v1196_v16 = vshrl.u32 %v5517_v57, 16 }
  0xcd   :  { %v526_v12 = vadd.f32 %v525_v49, %v7018_v47  ;;  %v7176_v47 = vld [vmem:[%s9094_s0 + $0x40] sm:$0xf]  ;;  %v1930_v56 = vrot.slane %v1929_v32, 4  ;;  %v1199_v23 = vshll.u32 %v5517_v57, 16  ;;  %v1194_v44 = vsel %vm6675_vm4, %v1189_v62, %v1193_v61 }
  0xce   :  { %v1932_v37 = vshll.u32 %v7176_v47, 16  ;;  %v1936_v49 = vshrl.u32 %v7176_v47, 16  ;;  %v2240_v32 = vrot.slane %v9100_v58, 4  ;;  %v1198_v62 = vrot.slane %v1196_v16, 4  ;;  %v7252_v16 = vld [vmem:[%s9094_s0 + $0x68] sm:$0x1] }
  0xcf   :  { %v7182_v24 = vadd.f32 %v7048_v17, %v526_v12  ;;  %v1179_v17 = vrot.slane %v1178_v15, 4  ;;  %v1942_v12 = vshll.u32 %v7188_v30, 16  ;;  %v1201_v61 = vrot.slane %v1199_v23, 5 }
  0xd0   :  { %v1934_v6 = vrot.slane %v1932_v37, 5  ;;  %v1938_v9 = vrot.slane %v1936_v49, 4  ;;  %v1433_v49 = vsel %vm6679_vm5, %v1431_v4, %v1432_v5  ;;  %v7246_v4 = vld [vmem:[%s9094_s0 + $0x4c] sm:$0xf] }
  0xd1   :  { %v1184_v18 = vsel %vm6675_vm4, %v1179_v17, %v1183_v52  ;;  %v2241_v52 = vrot.slane %v6980_v63, 5  ;;  %v1209_v63 = vshrl.u32 %v7219_v14, 16 }
  0xd2   :  { %v1935_v27 = vsel %vm6675_vm4, %v1930_v56, %v1934_v6  ;;  %v1939_v28 = vor.u32 %v1938_v9, %v1934_v6  ;;  %v7228_v37 = vunpack.c.l.b16 %v1184_v18  ;;  %v5692_v6 = vld [vmem:[%s9094_s0 + $0x48] sm:$0xf] }
  0xd3   :  { %v7192_v38 = vpop.f32.mrf.mxu2  ;;  %v7196_v50 = vpop.f32.mrf.mxu0  ;;  %v1947_v18 = vshrl.u32 %v5692_v6, 16 }
  0xd4   :  { %v528_v19 = vpop.f32.mrf.mxu1  ;;  %v1940_v17 = vrot.slane %v1939_v28, 4  ;;  %v1960_v28 = vshrl.u32 %v7246_v4, 16 }
  0xd5   :  { %v529_v55 = vadd.f32 %v528_v19, %v7053_v21  ;;  %v7214_v21 = vpop.f32.mrf.mxu3  ;;  %v1490_v19 = vunpack.c.l.b16 %v1430_v20  ;;  %v1950_v20 = vshll.u32 %v5692_v6, 16 }
  0xd6   :  { %1349 = vmatmul.bf16.gmra.mxu0 %v1257_v31  ;;  %1579 = vmatmul.bf16.gmra.mxu1 %v1503_v41  ;;  %v1944_v31 = vrot.slane %v1942_v12, 5  ;;  %v1205_v41 = vshll.u32 %v7219_v14, 16 }
  0xd7   :  { %v7208_v15 = vadd.f32 %v7080_v53, %v529_v55  ;;  %v6408_v53 = vld [vmem:[#allocation2 + $0x200] sm:$0xff]  ;;  %v1249_v55 = vunpack.c.l.b16 %v1194_v44  ;;  %v1952_v58 = vrot.slane %v1950_v20, 5  ;;  %v1962_v20 = vrot.slane %v1960_v28, 4 }
  0xd8   :  { %1774 = vmatmul.bf16.gmra.mxu2 %v6385_v51  ;;  %2396 = vmatpush.bf16.msra.mxu0 %v6408_v53  ;;  %v2065_v51 = vunpack.c.l.b16 %v1935_v27  ;;  %v1945_v56 = vsel %vm6675_vm4, %v1940_v17, %v1944_v31  ;;  %v1491_v53 = vunpack.c.l.b16 %v1433_v49  ;;  %v7254_v23 = vrot.slane %v1205_v41, 5  ;;  %v7264_v49 = vld [vmem:[%s9094_s0 + $0x50] sm:$0x1] }
  0xd9   :  { %v2066_v9 = vunpack.c.l.b16 %v1945_v56  ;;  %v1956_v27 = vshll.u32 %v7246_v4, 16  ;;  %v1211_v31 = vrot.slane %v1209_v63, 4  ;;  %v1949_v17 = vrot.slane %v1947_v18, 4 }
  0xda   :  { %v1202_v56 = vor.u32 %v1201_v61, %v1198_v62  ;;  %v1215_v63 = vshll.u32 %v7252_v16, 16  ;;  %v1966_v22 = vshll.u32 %v7264_v49, 16  ;;  %v1504_v1 = vpack.c.b16 %v1491_v53, %v1490_v19  ;;  %v6386_v19 = vld [vmem:[%s9094_s0 + $0x30] sm:$0xff] }
  0xdb   :  { %v7231_v43 = vpop.f32.mrf.mxu2  ;;  %v7236_v57 = vpop.f32.mrf.mxu0  ;;  %v2078_v44 = vpack.c.b16 %v2066_v9, %v2065_v51  ;;  %v1953_v9 = vor.u32 %v1952_v58, %v1949_v17  ;;  %v1958_v18 = vrot.slane %v1956_v27, 5  ;;  %v2242_v58 = vsel %vm6679_vm5, %v2240_v32, %v2241_v52 }
  0xdc   :  { %v530_v12 = vpop.f32.mrf.mxu1  ;;  %v1436_v53 = vrot.slane %v6959_v36, 5  ;;  %v2310_v28 = vunpack.c.l.b16 %v2242_v58  ;;  %v1968_v17 = vrot.slane %v1966_v22, 5 }
  0xdd   :  { %v531_v5 = vadd.f32 %v530_v12, %v7086_v0  ;;  %v5736_v0 = vld [vmem:[%s9094_s0 + $0x18] sm:$0xe]  ;;  %v1258_v12 = vpack.c.b16 %v1249_v55, %v7228_v37  ;;  %v7271_v51 = vpop.f32.mrf.mxu3  ;;  %2162 = vmatmul.bf16.gmra.mxu3 %v2078_v44  ;;  %v5555_v37 = vld [vmem:[%s9094_s0 + $0x30] sm:$0xe]  ;;  %v9115_v55 = vrot.slane %v6973_v59, 5  ;;  %v1954_v59 = vrot.slane %v1953_v9, 4 }
  0xde   :  { %v5744_v6 = vrot.slane %v5736_v0, 9  ;;  %v1963_v44 = vor.u32 %v1962_v20, %v1958_v18  ;;  %v1203_v0 = vrot.slane %v1202_v56, 4  ;;  %v1438_v58 = vrot.slane %v1436_v53, 4 }
  0xdf   :  { %v7267_v41 = vadd.f32 %v7117_v42, %v531_v5  ;;  %v1212_v42 = vor.u32 %v1211_v31, %v7254_v23  ;;  %v1959_v36 = vsel %vm6675_vm4, %v1954_v59, %v1958_v18 }
  0xe0   :  { %v2239_v62 = vsel %vm6679_vm5, %v5744_v6, %v9115_v55  ;;  %v1217_v6 = vrot.slane %v1215_v63, 5  ;;  %v5563_v55 = vrot.slane %v5555_v37, 9  ;;  %v2067_v63 = vunpack.c.l.b16 %v1959_v36  ;;  %v5695_v37 = vld [vmem:[%s9094_s0 + $0x54] sm:$0xf] }
  0xe1   :  { %9114 = vst [vmem:[#allocation13_spill] sm:$0xff] %v7267_v41  ;;  %v2309_v27 = vunpack.c.l.b16 %v2239_v62  ;;  %v1213_v41 = vrot.slane %v1212_v42, 4  ;;  %v1964_v62 = vrot.slane %v1963_v44, 4 }
  0xe3   :  { %v7274_v13 = vpop.f32.mrf.mxu2  ;;  %v7286_v61 = vpop.f32.mrf.mxu0  ;;  %v7293_v52 = vpack.c.b16 %v2310_v28, %v2309_v27  ;;  %v1969_v56 = vsel %vm6675_vm4, %v1964_v62, %v1968_v17  ;;  %v1218_v9 = vsel %vm6675_vm4, %v1213_v41, %v1217_v6 }
  0xe4   :  { %v533_v5 = vpop.f32.mrf.mxu1  ;;  %v1251_v27 = vunpack.c.l.b16 %v1218_v9 }
  0xe5   :  { %v534_v31 = vadd.f32 %v533_v5, %v7124_v60  ;;  %v1439_v60 = vrot.slane %v6985_v2, 5  ;;  %v1437_v2 = vsel %vm6679_vm5, %v5563_v55, %v1436_v53  ;;  %v7313_v18 = vpop.f32.mrf.mxu3 }
  0xe6   :  { %1354 = vmatmul.bf16.gmra.mxu0 %v1258_v12  ;;  %1584 = vmatmul.bf16.gmra.mxu1 %v1504_v1  ;;  %v2068_v12 = vunpack.c.l.b16 %v1969_v56  ;;  %v1492_v28 = vunpack.c.l.b16 %v1437_v2 }
  0xe7   :  { %v796_v32 = vadd.f32 %v7150_v33, %v534_v31  ;;  %v1208_v33 = vsel %vm6675_vm4, %v1203_v0, %v7254_v23  ;;  %v1440_v42 = vsel %vm6679_vm5, %v1438_v58, %v1439_v60  ;;  %v7325_v23 = vld [vmem:[%s9094_s0 + $0x58] sm:$0xf]  ;;  %v1974_v31 = vshll.u32 %v5695_v37, 16  ;;  %v7339_v58 = vld [vmem:[%s9094_s0 + $0x5c] sm:$0x1] }
  0xe8   :  { %1779 = vmatmul.bf16.gmra.mxu2 %v6386_v19  ;;  %v2079_v5 = vpack.c.b16 %v2068_v12, %v2067_v63  ;;  %v1971_v19 = vshrl.u32 %v5695_v37, 16  ;;  %v1250_v53 = vunpack.c.l.b16 %v1208_v33  ;;  %v1493_v44 = vunpack.c.l.b16 %v1440_v42  ;;  %v5556_v12 = vld [vmem:[%s9094_s0 + $0x3c] sm:$0xe] }
  0xe9   :  { %v7300_v22 = vadd.f32 %v7166_v29, %v796_v32  ;;  %v1980_v17 = vshll.u32 %v7325_v23, 16  ;;  %v1984_v0 = vshrl.u32 %v7325_v23, 16  ;;  %v1976_v32 = vrot.slane %v1974_v31, 5 }
  0xea   :  { %v1973_v55 = vrot.slane %v1971_v19, 4  ;;  %v1259_v36 = vpack.c.b16 %v1251_v27, %v1250_v53  ;;  %v1505_v62 = vpack.c.b16 %v1493_v44, %v1492_v28  ;;  %v1443_v33 = vrot.slane %v7008_v26, 5 }
  0xeb   :  { %v7304_v1 = vpop.f32.mrf.mxu2  ;;  %v7315_v29 = vpop.f32.mrf.mxu0  ;;  %v1986_v60 = vrot.slane %v1984_v0, 4  ;;  %v1990_v37 = vshll.u32 %v7339_v58, 16  ;;  %v1446_v27 = vrot.slane %v7038_v3, 5 }
  0xec   :  { %v535_v20 = vpop.f32.mrf.mxu1  ;;  %v1445_v53 = vrot.slane %v1443_v33, 4 }
  0xed   :  { %v536_v41 = vadd.f32 %v535_v20, %v7154_v45  ;;  %2167 = vmatmul.bf16.gmra.mxu3 %v2079_v5  ;;  %v7351_v2 = vpop.f32.mrf.mxu3  ;;  %v1977_v20 = vor.u32 %v1976_v32, %v1973_v55  ;;  %v5564_v5 = vrot.slane %v5556_v12, 9  ;;  %v1992_v26 = vrot.slane %v1990_v37, 5  ;;  %v5698_v32 = vld [vmem:[%s9094_s0 + $0x60] sm:$0xf] }
  0xef   :  { %v797_v59 = vadd.f32 %v7192_v38, %v536_v41  ;;  %v1982_v38 = vrot.slane %v1980_v17, 5  ;;  %v1978_v19 = vrot.slane %v1977_v20, 4 }
  0xf1   :  { %v7332_v6 = vadd.f32 %v7214_v21, %v797_v59  ;;  %v6387_v21 = vld [vmem:[%s9094_s0 + $0x3c] sm:$0xff]  ;;  %v1987_v42 = vor.u32 %v1986_v60, %v1982_v38  ;;  %v1983_v31 = vsel %vm6675_vm4, %v1978_v19, %v1982_v38  ;;  %v1995_v60 = vshrl.u32 %v5698_v32, 16 }
  0xf2   :  { %v2069_v44 = vunpack.c.l.b16 %v1983_v31 }
  0xf3   :  { %v7334_v45 = vpop.f32.mrf.mxu2  ;;  %v7341_v56 = vpop.f32.mrf.mxu0  ;;  %v1988_v28 = vrot.slane %v1987_v42, 4 }
  0xf4   :  { %v538_v63 = vpop.f32.mrf.mxu1 }
  0xf5   :  { %v539_v9 = vadd.f32 %v538_v63, %v7196_v50  ;;  %v1993_v59 = vsel %vm6675_vm4, %v1988_v28, %v1992_v26  ;;  %v5737_v28 = vld [vmem:[%s9094_s0 + $0x24] sm:$0xe] }
  0xf6   :  { %1359 = vmatmul.bf16.gmra.mxu0 %v1259_v36  ;;  %1589 = vmatmul.bf16.gmra.mxu1 %v1505_v62  ;;  %v2070_v0 = vunpack.c.l.b16 %v1993_v59  ;;  %v7377_v36 = vld [vmem:[%s9094_s0 + $0x64] sm:$0xf] }
  0xf7   :  { %v798_v41 = vadd.f32 %v7231_v43, %v539_v9  ;;  %v1444_v43 = vsel %vm6679_vm5, %v5564_v5, %v1443_v33  ;;  %v7381_v9 = vpop.f32.mrf.mxu3  ;;  %v2004_v20 = vshll.u32 %v7377_v36, 16  ;;  %v2008_v42 = vshrl.u32 %v7377_v36, 16  ;;  %v5557_v5 = vld [vmem:[%s9094_s0 + $0x48] sm:$0xe] }
  0xf8   :  { %1784 = vmatmul.bf16.gmra.mxu2 %v6387_v21  ;;  %v2080_v38 = vpack.c.b16 %v2070_v0, %v2069_v44  ;;  %v1494_v63 = vunpack.c.l.b16 %v1444_v43  ;;  %v1998_v21 = vshll.u32 %v5698_v32, 16  ;;  %v5565_v43 = vrot.slane %v5557_v5, 9 }
  0xf9   :  { %v7357_v50 = vadd.f32 %v7271_v51, %v798_v41  ;;  %v1447_v51 = vsel %vm6679_vm5, %v1445_v53, %v1446_v27  ;;  %v1450_v41 = vrot.slane %v7072_v34, 5  ;;  %v7401_v34 = vld [vmem:[%s9094_s0 + $0x68] sm:$0x1]  ;;  %v2010_v26 = vrot.slane %v2008_v42, 4 }
  0xfa   :  { %v1495_v33 = vunpack.c.l.b16 %v1447_v51  ;;  %v2000_v19 = vrot.slane %v1998_v21, 5  ;;  %v1453_v51 = vrot.slane %v7105_v25, 5  ;;  %v5745_v32 = vrot.slane %v5737_v28, 9 }
  0xfb   :  { %v7363_v17 = vpop.f32.mrf.mxu2  ;;  %v7367_v55 = vpop.f32.mrf.mxu0  ;;  %v1452_v0 = vrot.slane %v1450_v41, 4  ;;  %v2248_v21 = vrot.slane %v7044_v8, 5 }
  0xfc   :  { %v540_v3 = vpop.f32.mrf.mxu1  ;;  %v1506_v27 = vpack.c.b16 %v1495_v33, %v1494_v63 }
  0xfd   :  { %v541_v62 = vadd.f32 %v540_v3, %v7236_v57  ;;  %2172 = vmatmul.bf16.gmra.mxu3 %v2080_v38  ;;  %v1997_v57 = vrot.slane %v1995_v60, 4  ;;  %v2014_v38 = vshll.u32 %v7401_v34, 16  ;;  %v1454_v5 = vsel %vm6679_vm5, %v1452_v0, %v1453_v51 }
  0xff   :  { %v799_v12 = vadd.f32 %v7274_v13, %v541_v62  ;;  %v2245_v13 = vrot.slane %v7033_v54, 5  ;;  %v6388_v54 = vld [vmem:[%s9094_s0 + $0x48] sm:$0xff]  ;;  %v2001_v3 = vor.u32 %v2000_v19, %v1997_v57  ;;  %v2016_v33 = vrot.slane %v2014_v38, 5  ;;  %v7417_v25 = vpop.f32.mrf.mxu3 }
 0x101   :  { %v7386_v37 = vadd.f32 %v7313_v18, %v799_v12  ;;  %v2006_v18 = vrot.slane %v2004_v20, 5  ;;  %v2247_v63 = vrot.slane %v2245_v13, 4  ;;  %v2002_v12 = vrot.slane %v2001_v3, 4 }
 0x103   :  { %v7393_v53 = vpop.f32.mrf.mxu2  ;;  %v7403_v59 = vpop.f32.mrf.mxu0  ;;  %v2011_v62 = vor.u32 %v2010_v26, %v2006_v18  ;;  %v2007_v42 = vsel %vm6675_vm4, %v2002_v12, %v2006_v18  ;;  %v2249_v19 = vsel %vm6679_vm5, %v2247_v63, %v2248_v21  ;;  %v7441_v26 = vld [vmem:[%s9094_s0 + $0x70] sm:$0xf]  ;;  %v5558_v63 = vld [vmem:[%s9094_s0 + $0x54] sm:$0xe]  ;;  %v1457_v21 = vrot.slane %v7137_v7, 5 }
 0x104   :  { %v543_v31 = vpop.f32.mrf.mxu1  ;;  %v2071_v57 = vunpack.c.l.b16 %v2007_v42  ;;  %v2312_v3 = vunpack.c.l.b16 %v2249_v19  ;;  %v2028_v38 = vshll.u32 %v7441_v26, 16 }
 0x105   :  { %v544_v44 = vadd.f32 %v543_v31, %v7286_v61  ;;  %v2012_v61 = vrot.slane %v2011_v62, 4  ;;  %v2259_v62 = vrot.slane %v7176_v47, 5  ;;  %v2262_v47 = vrot.slane %v7188_v30, 5  ;;  %v6389_v30 = vld [vmem:[%s9094_s0 + $0x54] sm:$0xff] }
 0x106   :  { %1594 = vmatmul.bf16.gmra.mxu1 %v1506_v27  ;;  %2397 = vmatmul.bf16.vlgmr.msra.gmra.mxu0 %v7293_v52  ;;  %v1451_v52 = vsel %vm6679_vm5, %v5565_v43, %v1450_v41  ;;  %v5701_v41 = vld [vmem:[%s9094_s0 + $0x6c] sm:$0xf]  ;;  %v1497_v43 = vunpack.c.l.b16 %v1454_v5  ;;  %v7465_v5 = vld [vmem:[%s9094_s0 + $0x74] sm:$0x1] }
 0x107   :  { %v800_v60 = vadd.f32 %v7304_v1, %v544_v44  ;;  %v2017_v1 = vsel %vm6675_vm4, %v2012_v61, %v2016_v33  ;;  %v2019_v44 = vshrl.u32 %v5701_v41, 16  ;;  %v2022_v51 = vshll.u32 %v5701_v41, 16  ;;  %v5738_v41 = vld [vmem:[%s9094_s0 + $0x30] sm:$0xe] }
 0x108   :  { %1789 = vmatmul.bf16.gmra.mxu2 %v6388_v54  ;;  %v2072_v27 = vunpack.c.l.b16 %v2017_v1  ;;  %v1496_v54 = vunpack.c.l.b16 %v1451_v52  ;;  %v2261_v61 = vrot.slane %v2259_v62, 4 }
 0x109   :  { %v7415_v20 = vadd.f32 %v7351_v2, %v800_v60  ;;  %v2246_v2 = vsel %vm6679_vm5, %v5745_v32, %v2245_v13  ;;  %v2032_v60 = vshrl.u32 %v7441_v26, 16  ;;  %v2021_v12 = vrot.slane %v2019_v44, 4 }
 0x10a   :  { %v2081_v13 = vpack.c.b16 %v2072_v27, %v2071_v57  ;;  %v2311_v0 = vunpack.c.l.b16 %v2246_v2  ;;  %v2024_v33 = vrot.slane %v2022_v51, 5  ;;  %v1507_v52 = vpack.c.b16 %v1497_v43, %v1496_v54  ;;  %v7460_v57 = vpop.f32.mrf.mxu3 }
 0x10b   :  { %v7425_v8 = vpop.f32.mrf.mxu2  ;;  %v7433_v18 = vpop.f32.mrf.mxu0  ;;  %v2030_v2 = vrot.slane %v2028_v38, 5  ;;  %v2034_v7 = vrot.slane %v2032_v60, 4  ;;  %v1459_v51 = vrot.slane %v1457_v21, 4  ;;  %v1460_v38 = vrot.slane %v7171_v39, 5 }
 0x10c   :  { %v545_v28 = vpop.f32.mrf.mxu1  ;;  %v2326_v1 = vpack.c.b16 %v2312_v3, %v2311_v0  ;;  %v2025_v3 = vor.u32 %v2024_v33, %v2021_v12 }
 0x10d   :  { %v546_v31 = vadd.f32 %v545_v28, %v7315_v29  ;;  %v5739_v29 = vld [vmem:[%s9094_s0 + $0x3c] sm:$0xe]  ;;  %2177 = vmatmul.bf16.gmra.mxu3 %v2081_v13  ;;  %v5566_v28 = vrot.slane %v5558_v63, 9  ;;  %v2263_v13 = vsel %vm6679_vm5, %v2261_v61, %v2262_v47  ;;  %v2035_v60 = vor.u32 %v2034_v7, %v2030_v2 }
 0x10e   :  { %v2316_v0 = vunpack.c.l.b16 %v2263_v13  ;;  %v5746_v63 = vrot.slane %v5738_v41, 9 }
 0x10f   :  { %v7445_v32 = vadd.f32 %v7334_v45, %v546_v31  ;;  %v5747_v45 = vrot.slane %v5739_v29, 9  ;;  %v2252_v31 = vrot.slane %v7100_v11, 5  ;;  %v2038_v29 = vshll.u32 %v7465_v5, 16 }
 0x110   :  { %v2036_v47 = vrot.slane %v2035_v60, 4  ;;  %v1458_v7 = vsel %vm6679_vm5, %v5566_v28, %v1457_v21 }
 0x111   :  { %v2260_v54 = vsel %vm6679_vm5, %v5747_v45, %v2259_v62  ;;  %v2026_v45 = vrot.slane %v2025_v3, 4  ;;  %v2254_v61 = vrot.slane %v2252_v31, 4  ;;  %v2040_v12 = vrot.slane %v2038_v29, 5 }
 0x112   :  { %v2315_v43 = vunpack.c.l.b16 %v2260_v54  ;;  %v2253_v41 = vsel %vm6679_vm5, %v5746_v63, %v2252_v31  ;;  %v7507_v13 = vpop.f32.mrf.mxu3 }
 0x113   :  { %v7458_v42 = vpop.f32.mrf.mxu2  ;;  %v7467_v27 = vpop.f32.mrf.mxu0  ;;  %v2031_v39 = vsel %vm6675_vm4, %v2026_v45, %v2030_v2 }
 0x114   :  { %v548_v19 = vpop.f32.mrf.mxu1  ;;  %v7484_v62 = vpack.c.b16 %v2316_v0, %v2315_v43  ;;  %v1498_v43 = vunpack.c.l.b16 %v1458_v7  ;;  %v2313_v0 = vunpack.c.l.b16 %v2253_v41 }
 0x115   :  { %v549_v44 = vadd.f32 %v548_v19, %v7341_v56  ;;  %v2255_v56 = vrot.slane %v7113_v35, 5 }
 0x116   :  { %1599 = vmatmul.bf16.gmra.mxu1 %v1507_v52  ;;  %2402 = vmatmul.bf16.gmra.mxu0 %v2326_v1  ;;  %v2041_v52 = vsel %vm6675_vm4, %v2036_v47, %v2040_v12  ;;  %v1467_v47 = vrot.slane %v7252_v16, 5 }
 0x117   :  { %v802_v11 = vadd.f32 %v7363_v17, %v549_v44  ;;  %v2073_v17 = vunpack.c.l.b16 %v2031_v39  ;;  %v2074_v19 = vunpack.c.l.b16 %v2041_v52  ;;  %v2256_v2 = vsel %vm6679_vm5, %v2254_v61, %v2255_v56 }
 0x118   :  { %1794 = vmatmul.bf16.gmra.mxu2 %v6389_v30  ;;  %v2314_v3 = vunpack.c.l.b16 %v2256_v2 }
 0x119   :  { %v7488_v33 = vadd.f32 %v7417_v25, %v802_v11  ;;  %v1461_v25 = vsel %vm6679_vm5, %v1459_v51, %v1460_v38  ;;  %v2082_v44 = vpack.c.b16 %v2074_v19, %v2073_v17  ;;  %v1464_v11 = vrot.slane %v7219_v14, 5 }
 0x11a   :  { %v1499_v28 = vunpack.c.l.b16 %v1461_v25  ;;  %v2327_v60 = vpack.c.b16 %v2314_v3, %v2313_v0  ;;  %v7524_v45 = vpop.f32.mrf.mxu3 }
 0x11b   :  { %v7494_v1 = vpop.f32.mrf.mxu2  ;;  %v7498_v35 = vpop.f32.mrf.mxu0  ;;  %v1466_v56 = vrot.slane %v1464_v11, 4 }
 0x11c   :  { %v550_v30 = vpop.f32.mrf.mxu1  ;;  %v1508_v38 = vpack.c.b16 %v1499_v28, %v1498_v43 }
 0x11d   :  { %v551_v54 = vadd.f32 %v550_v30, %v7367_v55  ;;  %2182 = vmatmul.bf16.gmra.mxu3 %v2082_v44  ;;  %v6390_v55 = vld [vmem:[%s9094_s0 + $0x60] sm:$0xff]  ;;  %v1468_v17 = vsel %vm6679_vm5, %v1466_v56, %v1467_v47 }
 0x11f   :  { %v7510_v21 = vadd.f32 %v7393_v53, %v551_v54  ;;  %v5559_v53 = vld [vmem:[%s9094_s0 + $0x60] sm:$0xe] }
 0x120   :  { %v5567_v61 = vrot.slane %v5559_v53, 9  ;;  %v9116_v53 = vld [vmem:[#allocation12_spill] sm:$0xff] }
 0x122   :  { %v7540_v41 = vpop.f32.mrf.mxu3 }
 0x123   :  { %v789_v51 = vpop.f32.mrf.mxu2  ;;  %v1335_v29 = vpop.f32.mrf.mxu0 }
 0x124   :  { %v7512_v31 = vpop.f32.mrf.mxu1  ;;  %v7519_v63 = vadd.f32 %v1335_v29, %v7300_v22  ;;  %v1465_v22 = vsel %vm6679_vm5, %v5567_v61, %v1464_v11 }
 0x125   :  { %v1500_v25 = vunpack.c.l.b16 %v1465_v22 }
 0x126   :  { %1604 = vmatmul.bf16.gmra.mxu1 %v1508_v38  ;;  %2407 = vmatmul.bf16.gmra.mxu0 %v2327_v60  ;;  %v2269_v38 = vrot.slane %v7264_v49, 5 }
 0x128   :  { %1799 = vmatmul.bf16.gmra.mxu2 %v6390_v55 }
 0x12a   :  { %v7558_v29 = vpop.f32.mrf.mxu3 }
 0x12b   :  { %v947_v12 = vpop.f32.mrf.mxu2  ;;  %v1337_v52 = vpop.f32.mrf.mxu0 }
 0x12c   :  { %v987_v39 = vadd.f32 %v947_v12, %v7140_v10  ;;  %v555_v14 = vpop.f32.mrf.mxu1  ;;  %v7534_v19 = vadd.f32 %v1337_v52, %v7332_v6  ;;  %v1501_v10 = vunpack.c.l.b16 %v1468_v17  ;;  %v2266_v6 = vrot.slane %v7246_v4, 5  ;;  %v9117_v52 = vld [vmem:[#allocation13_spill] sm:$0xff] }
 0x12d   :  { %v556_v7 = vadd.f32 %v555_v14, %v7020_v48  ;;  %v6391_v48 = vld [vmem:[%s9094_s0 + $0x6c] sm:$0xff] }
 0x12e   :  { %v1365_v30 = vadd.f32 %v7403_v59, %v987_v39  ;;  %v1509_v54 = vpack.c.b16 %v1501_v10, %v1500_v25  ;;  %v2268_v3 = vrot.slane %v2266_v6, 4  ;;  %v2273_v25 = vrot.slane %v7325_v23, 5 }
 0x12f   :  { %v7538_v16 = vadd.f32 %v7458_v42, %v556_v7  ;;  %v5740_v42 = vld [vmem:[%s9094_s0 + $0x48] sm:$0xe] }
 0x132   :  { %v2148_v14 = vpop.f32.mrf.mxu3 }
 0x133   :  { %v949_v2 = vpop.f32.mrf.mxu2  ;;  %v1340_v28 = vpop.f32.mrf.mxu0 }
 0x134   :  { %v988_v44 = vadd.f32 %v949_v2, %v7182_v24  ;;  %v7543_v43 = vpop.f32.mrf.mxu1  ;;  %v7550_v59 = vadd.f32 %v1340_v28, %v7357_v50  ;;  %v5748_v24 = vrot.slane %v5740_v42, 9  ;;  %v2275_v2 = vrot.slane %v2273_v25, 4 }
 0x136   :  { %v1366_v0 = vadd.f32 %v7433_v18, %v988_v44  ;;  %1609 = vmatmul.bf16.gmra.mxu1 %v1509_v54  ;;  %2412 = vmatmul.bf16.gmra.mxu0 %v7484_v62  ;;  %v2267_v11 = vsel %vm6679_vm5, %v5748_v24, %v2266_v6  ;;  %v2270_v18 = vsel %vm6679_vm5, %v2268_v3, %v2269_v38  ;;  %v2276_v54 = vrot.slane %v7339_v58, 5 }
 0x137   :  { %v2317_v47 = vunpack.c.l.b16 %v2267_v11  ;;  %v2318_v12 = vunpack.c.l.b16 %v2270_v18  ;;  %v2280_v11 = vrot.slane %v7377_v36, 5 }
 0x138   :  { %1804 = vmatmul.bf16.gmra.mxu2 %v6391_v48  ;;  %v2277_v42 = vsel %vm6679_vm5, %v2275_v2, %v2276_v54 }
 0x139   :  { %v2329_v39 = vpack.c.b16 %v2318_v12, %v2317_v47  ;;  %v2282_v47 = vrot.slane %v2280_v11, 4  ;;  %v2283_v12 = vrot.slane %v7401_v34, 5 }
 0x13a   :  { %v7588_v3 = vpop.f32.mrf.mxu3 }
 0x13b   :  { %v952_v60 = vpop.f32.mrf.mxu2  ;;  %v1342_v55 = vpop.f32.mrf.mxu0 }
 0x13c   :  { %v989_v4 = vadd.f32 %v952_v60, %v7208_v15  ;;  %v560_v50 = vpop.f32.mrf.mxu1  ;;  %v7567_v61 = vadd.f32 %v1342_v55, %v7386_v37  ;;  %v5741_v37 = vld [vmem:[%s9094_s0 + $0x54] sm:$0xe]  ;;  %v2320_v60 = vunpack.c.l.b16 %v2277_v42 }
 0x13d   :  { %v561_v62 = vadd.f32 %v560_v50, %v9116_v53 }
 0x13e   :  { %v1367_v49 = vadd.f32 %v7467_v27, %v989_v4 }
 0x13f   :  { %v7570_v56 = vadd.f32 %v789_v51, %v561_v62  ;;  %v5749_v51 = vrot.slane %v5741_v37, 9 }
 0x142   :  { %v2153_v53 = vpop.f32.mrf.mxu3 }
 0x143   :  { %v954_v15 = vpop.f32.mrf.mxu2  ;;  %v1345_v17 = vpop.f32.mrf.mxu0 }
 0x144   :  { %v990_v22 = vadd.f32 %v954_v15, %v9117_v52  ;;  %v1575_v7 = vpop.f32.mrf.mxu1  ;;  %v7575_v10 = vadd.f32 %v1345_v17, %v7415_v20  ;;  %v2274_v20 = vsel %vm6679_vm5, %v5749_v51, %v2273_v25 }
 0x145   :  { %v1615_v44 = vadd.f32 %v1575_v7, %v1365_v30  ;;  %v2319_v38 = vunpack.c.l.b16 %v2274_v20  ;;  %v2284_v7 = vsel %vm6679_vm5, %v2282_v47, %v2283_v12 }
 0x146   :  { %v1368_v27 = vadd.f32 %v7498_v35, %v990_v22  ;;  %2417 = vmatmul.bf16.gmra.mxu0 %v2329_v39  ;;  %v9118_v39 = vld [vmem:[#allocation10_spill] sm:$0xff] }
 0x147   :  { %v2330_v30 = vpack.c.b16 %v2320_v60, %v2319_v38  ;;  %v2290_v38 = vrot.slane %v7465_v5, 5  ;;  %v9119_v60 = vld [vmem:[#allocation11_spill] sm:$0xff] }
 0x14a   :  { %v7611_v2 = vpop.f32.mrf.mxu3 }
 0x14b   :  { %v1770_v28 = vpop.f32.mrf.mxu2  ;;  %v7582_v6 = vpop.f32.mrf.mxu0 }
 0x14c   :  { %v1810_v48 = vadd.f32 %v1770_v28, %v1615_v44  ;;  %v1577_v23 = vpop.f32.mrf.mxu1 }
 0x14d   :  { %v1616_v24 = vadd.f32 %v1577_v23, %v1366_v0  ;;  %v5742_v0 = vld [vmem:[%s9094_s0 + $0x60] sm:$0xe]  ;;  %v2287_v23 = vrot.slane %v7441_v26, 5 }
 0x14e   :  { %v7590_v35 = vadd.f32 %v2148_v14, %v1810_v48  ;;  %v5750_v62 = vrot.slane %v5742_v0, 9  ;;  %v554_v14 = vadd.f32 %v7512_v31, %v9118_v39 }
 0x150   :  { %v2281_v17 = vsel %vm6679_vm5, %v5750_v62, %v2280_v11  ;;  %v804_v51 = vadd.f32 %v7425_v8, %v554_v14  ;;  %v2489_v14 = vld [vmem:[%s9096_s2 + $0x70] sm:$0xff] }
 0x151   :  { %v2321_v34 = vunpack.c.l.b16 %v2281_v17 }
 0x152   :  { %v999_v31 = vadd.f32 %v7507_v13, %v804_v51  ;;  %v2486_v51 = vld [vmem:[%s9096_s2 + $0x58] sm:$0xff] }
 0x153   :  { %v1772_v58 = vpop.f32.mrf.mxu2  ;;  %v1350_v50 = vpop.f32.mrf.mxu0 }
 0x154   :  { %v7592_v4 = vadd.f32 %v1772_v58, %v1616_v24  ;;  %v1580_v55 = vpop.f32.mrf.mxu1  ;;  %v7596_v18 = vadd.f32 %v1350_v50, %v7488_v33  ;;  %v2289_v24 = vrot.slane %v2287_v23, 4  ;;  %v559_v58 = vadd.f32 %v7543_v43, %v9119_v60  ;;  %v2158_v50 = vpop.f32.mrf.mxu3 }
 0x155   :  { %v1617_v15 = vadd.f32 %v1580_v55, %v1367_v49  ;;  %v2322_v49 = vunpack.c.l.b16 %v2284_v7 }
 0x156   :  { %2422 = vmatmul.bf16.gmra.mxu0 %v2330_v30  ;;  %v2291_v0 = vsel %vm6679_vm5, %v2289_v24, %v2290_v38  ;;  %v806_v62 = vadd.f32 %v7494_v1, %v559_v58  ;;  %v2483_v38 = vld [vmem:[%s9096_s2 + $0x40] sm:$0xff] }
 0x157   :  { %v2331_v44 = vpack.c.b16 %v2322_v49, %v2321_v34  ;;  %v2324_v47 = vunpack.c.l.b16 %v2291_v0 }
 0x158   :  { %v1001_v43 = vadd.f32 %v7540_v41, %v806_v62 }
 0x15b   :  { %v1775_v52 = vpop.f32.mrf.mxu2  ;;  %v7604_v36 = vpop.f32.mrf.mxu0 }
 0x15c   :  { %v1812_v22 = vadd.f32 %v1775_v52, %v1617_v15  ;;  %v1582_v33 = vpop.f32.mrf.mxu1  ;;  %v2488_v52 = vld [vmem:[%s9096_s2 + $0x68] sm:$0xff] }
 0x15d   :  { %v1618_v25 = vadd.f32 %v1582_v33, %v1368_v27  ;;  %v5743_v27 = vld [vmem:[%s9094_s0 + $0x6c] sm:$0xe]  ;;  %v2487_v33 = vld [vmem:[%s9096_s2 + $0x60] sm:$0xff] }
 0x15e   :  { %v2190_v37 = vadd.f32 %v2153_v53, %v1812_v22  ;;  %v5751_v42 = vrot.slane %v5743_v27, 9  ;;  %v2484_v27 = vld [vmem:[%s9096_s2 + $0x48] sm:$0xff] }
 0x160   :  { %v2288_v11 = vsel %vm6679_vm5, %v5751_v42, %v2287_v23 }
 0x161   :  { %v2323_v5 = vunpack.c.l.b16 %v2288_v11 }
 0x163   :  { %v1777_v54 = vpop.f32.mrf.mxu2  ;;  %v1355_v48 = vpop.f32.mrf.mxu0  ;;  %v2332_v12 = vpack.c.b16 %v2324_v47, %v2323_v5  ;;  %v2481_v5 = vld [vmem:[%s9096_s2 + $0x30] sm:$0xff] }
 0x164   :  { %v7614_v28 = vadd.f32 %v1777_v54, %v1618_v25  ;;  %v7617_v20 = vadd.f32 %v1355_v48, %v999_v31  ;;  %v1585_v8 = vpop.f32.mrf.mxu1  ;;  %v2485_v54 = vld [vmem:[%s9096_s2 + $0x50] sm:$0xff] }
 0x165   :  { %v1619_v13 = vadd.f32 %v1585_v8, %v7519_v63  ;;  %v2490_v63 = vld [vmem:[%s9096_s2 + $0x78] sm:$0xff]  ;;  %v6438_v47 = vld [vmem:[#allocation2 + $0x70] sm:$0xff] }
 0x166   :  { %2427 = vmatmul.bf16.gmra.mxu0 %v2331_v44  ;;  %2491 = vmatpush.msrb.mxu1 %v2490_v63 }
 0x167   :  { %2566 = vmatpush.msrb.mxu2 %v2490_v63 }
 0x168   :  { %2492 = vmatpush.msrb.mxu1 %v2489_v14 }
 0x169   :  { %2567 = vmatpush.msrb.mxu2 %v2489_v14 }
 0x16a   :  { %2493 = vmatpush.msrb.mxu1 %v2488_v52 }
 0x16b   :  { %v1780_v30 = vpop.f32.mrf.mxu2  ;;  %v7626_v55 = vpop.f32.mrf.mxu0  ;;  %2568 = vmatpush.msrb.mxu2 %v2488_v52 }
 0x16c   :  { %v1814_v26 = vadd.f32 %v1780_v30, %v1619_v13  ;;  %2494 = vmatpush.msrb.mxu1 %v2487_v33  ;;  %v7655_v7 = vpop.f32.mrf.mxu1  ;;  %v6439_v13 = vld [vmem:[#allocation2 + $0x78] sm:$0xff] }
 0x16d   :  { %2569 = vmatpush.msrb.mxu2 %v2487_v33  ;;  %2984 = vmatpush.bf16.msra.mxu3 %v6439_v13  ;;  %v2479_v33 = vld [vmem:[%s9096_s2 + $0x20] sm:$0xff]  ;;  %v1620_v40 = vadd.f32 %v7655_v7, %v7534_v19 }
 0x16e   :  { %v2192_v53 = vadd.f32 %v2158_v50, %v1814_v26  ;;  %2495 = vmatpush.msrb.mxu1 %v2486_v51  ;;  %v2482_v26 = vld [vmem:[%s9096_s2 + $0x38] sm:$0xff] }
 0x16f   :  { %2570 = vmatpush.msrb.mxu2 %v2486_v51  ;;  %v6437_v51 = vld [vmem:[#allocation2 + $0x68] sm:$0xff] }
 0x170   :  { %2496 = vmatpush.msrb.mxu1 %v2485_v54 }
 0x171   :  { %2571 = vmatpush.msrb.mxu2 %v2485_v54  ;;  %2985 = vmatpush.bf16.msra.mxu3 %v6438_v47  ;;  %v2477_v47 = vld [vmem:[%s9096_s2 + $0x10] sm:$0xff] }
 0x172   :  { %2497 = vmatpush.msrb.mxu1 %v2484_v27 }
 0x173   :  { %v1360_v15 = vpop.f32.mrf.mxu0  ;;  %v7657_v25 = vpop.f32.mrf.mxu2  ;;  %2572 = vmatpush.msrb.mxu2 %v2484_v27 }
 0x174   :  { %v7637_v39 = vadd.f32 %v1360_v15, %v1001_v43  ;;  %v7666_v31 = vpop.f32.mrf.mxu1  ;;  %2498 = vmatpush.msrb.mxu1 %v2483_v38  ;;  %v2480_v15 = vld [vmem:[%s9096_s2 + $0x28] sm:$0xff] }
 0x175   :  { %2573 = vmatpush.msrb.mxu2 %v2483_v38  ;;  %2986 = vmatpush.bf16.msra.mxu3 %v6437_v51  ;;  %v2189_v51 = vadd.f32 %v7588_v3, %v7592_v4  ;;  %v996_v3 = vadd.f32 %v7381_v9, %v7445_v32 }
 0x176   :  { %2432 = vmatmul.bf16.gmra.mxu0 %v2332_v12  ;;  %2499 = vmatpush.msrb.mxu1 %v2482_v26 }
 0x177   :  { %2574 = vmatpush.msrb.mxu2 %v2482_v26  ;;  %v1374_v7 = vadd.f32 %v7582_v6, %v996_v3 }
 0x178   :  { %2500 = vmatpush.msrb.mxu1 %v2481_v5 }
 0x179   :  { %2575 = vmatpush.msrb.mxu2 %v2481_v5 }
 0x17a   :  { %2501 = vmatpush.msrb.mxu1 %v2480_v15 }
 0x17b   :  { %v7642_v1 = vpop.f32.mrf.mxu0  ;;  %v7671_v44 = vpop.f32.mrf.mxu2  ;;  %2576 = vmatpush.msrb.mxu2 %v2480_v15  ;;  %v6436_v15 = vld [vmem:[#allocation2 + $0x60] sm:$0xff] }
 0x17c   :  { %9120 = vst [vmem:[#allocation12_spill] sm:$0xff] %v7642_v1  ;;  %2502 = vmatpush.msrb.mxu1 %v2479_v33  ;;  %2987 = vmatpush.bf16.msra.mxu3 %v6436_v15  ;;  %v1815_v15 = vadd.f32 %v7657_v25, %v1620_v40 }
 0x17d   :  { %2577 = vmatpush.msrb.mxu2 %v2479_v33 }
 0x183   :  { %v2398_v41 = vpop.f32.mrf.mxu0  ;;  %v7682_v8 = vpop.f32.mrf.mxu2 }
 0x184   :  { %v7648_v22 = vadd.f32 %v2398_v41, %v7590_v35  ;;  %v7662_v35 = vpop.f32.mrf.mxu3 }
 0x18b   :  { %v7653_v17 = vpop.f32.mrf.mxu0  ;;  %v7693_v50 = vpop.f32.mrf.mxu2 }
 0x18c   :  { %v7675_v23 = vpop.f32.mrf.mxu3 }
 0x193   :  { %v2403_v34 = vpop.f32.mrf.mxu0  ;;  %v7702_v62 = vpop.f32.mrf.mxu2 }
 0x194   :  { %v7664_v49 = vadd.f32 %v2403_v34, %v2190_v37  ;;  %v7680_v37 = vpop.f32.mrf.mxu1  ;;  %v7689_v60 = vpop.f32.mrf.mxu3 }
 0x195   :  { %v1622_v19 = vadd.f32 %v7680_v37, %v7567_v61  ;;  %v998_v61 = vadd.f32 %v7460_v57, %v7510_v21 }
 0x197   :  { %v1817_v40 = vadd.f32 %v7682_v8, %v1622_v19  ;;  %v9123_v19 = vld [vmem:[#allocation12_spill] sm:$0xff] }
 0x19b   :  { %v7673_v48 = vpop.f32.mrf.mxu0  ;;  %v1795_v14 = vpop.f32.mrf.mxu2 }
 0x19c   :  { %v1595_v58 = vpop.f32.mrf.mxu1  ;;  %v7698_v11 = vpop.f32.mrf.mxu3 }
 0x1a3   :  { %v2408_v42 = vpop.f32.mrf.mxu0  ;;  %v1797_v54 = vpop.f32.mrf.mxu2 }
 0x1a4   :  { %v7684_v24 = vadd.f32 %v2408_v42, %v2192_v53  ;;  %v1597_v53 = vpop.f32.mrf.mxu1  ;;  %v7707_v63 = vpop.f32.mrf.mxu3  ;;  %v2478_v42 = vld [vmem:[%s9096_s2 + $0x18] sm:$0xff] }
 0x1a5   :  { %2503 = vmatpush.msrb.mxu1 %v2478_v42  ;;  %2578 = vmatpush.msrb.mxu2 %v2478_v42  ;;  %v1624_v6 = vadd.f32 %v1597_v53, %v1374_v7 }
 0x1a7   :  { %2504 = vmatpush.msrb.mxu1 %v2477_v47  ;;  %2579 = vmatpush.msrb.mxu2 %v2477_v47  ;;  %v2191_v47 = vadd.f32 %v7611_v2, %v7614_v28  ;;  %v2193_v2 = vadd.f32 %v7662_v35, %v1815_v15  ;;  %v1623_v28 = vadd.f32 %v1595_v58, %v7575_v10  ;;  %v6431_v15 = vld [vmem:[#allocation2 + $0x38] sm:$0xff] }
 0x1a8   :  { %v1376_v10 = vadd.f32 %v7604_v36, %v998_v61  ;;  %v2195_v58 = vadd.f32 %v7689_v60, %v1817_v40  ;;  %v2476_v60 = vld [vmem:[%s9096_s2 + $0x8] sm:$0xff] }
 0x1a9   :  { %2505 = vmatpush.msrb.mxu1 %v2476_v60  ;;  %2580 = vmatpush.msrb.mxu2 %v2476_v60  ;;  %v6433_v40 = vld [vmem:[#allocation2 + $0x48] sm:$0xff] }
 0x1ab   :  { %v7691_v30 = vpop.f32.mrf.mxu0  ;;  %v1800_v5 = vpop.f32.mrf.mxu2 }
 0x1ac   :  { %v1600_v12 = vpop.f32.mrf.mxu1  ;;  %v7716_v41 = vpop.f32.mrf.mxu3 }
 0x1ad   :  { %v1625_v37 = vadd.f32 %v1600_v12, %v7596_v18 }
 0x1b3   :  { %v7700_v0 = vpop.f32.mrf.mxu0  ;;  %v7746_v1 = vpop.f32.mrf.mxu2 }
 0x1b4   :  { %v1602_v34 = vpop.f32.mrf.mxu1  ;;  %v7726_v38 = vpop.f32.mrf.mxu3 }
 0x1b5   :  { %9121 = vst [vmem:[#allocation13_spill] sm:$0xff] %v7726_v38  ;;  %v1621_v38 = vadd.f32 %v7666_v31, %v7550_v59  ;;  %v7759_v59 = vadd.f32 %v7673_v48, %v2191_v47  ;;  %v7776_v48 = vadd.f32 %v7691_v30, %v2193_v2  ;;  %v1000_v30 = vadd.f32 %v7524_v45, %v7538_v16  ;;  %v6435_v45 = vld [vmem:[#allocation2 + $0x58] sm:$0xff]  ;;  %v6434_v47 = vld [vmem:[#allocation2 + $0x50] sm:$0xff] }
 0x1b6   :  { %2988 = vmatpush.bf16.msra.mxu3 %v6435_v45 }
 0x1b7   :  { %v1816_v4 = vadd.f32 %v7671_v44, %v1621_v38  ;;  %v1818_v44 = vadd.f32 %v7693_v50, %v1623_v28  ;;  %v1819_v38 = vadd.f32 %v7702_v62, %v1624_v6  ;;  %v1626_v50 = vadd.f32 %v1602_v34, %v1376_v10  ;;  %v7827_v28 = vld [vmem:[%s9094_s0 + $0x7c] sm:$0xf] }
 0x1b8   :  { %v1378_v16 = vadd.f32 %v7626_v55, %v1000_v30  ;;  %v2710_v6 = vshrl.u32 %v7827_v28, 16 }
 0x1b9   :  { %v2194_v31 = vadd.f32 %v7675_v23, %v1816_v4  ;;  %v1820_v23 = vadd.f32 %v1795_v14, %v1625_v37  ;;  %v2196_v36 = vadd.f32 %v7698_v11, %v1818_v44  ;;  %v1821_v62 = vadd.f32 %v1797_v54, %v1626_v50  ;;  %v2475_v14 = vld [vmem:[%s9096_s2] sm:$0xff] }
 0x1ba   :  { %v2197_v11 = vadd.f32 %v7707_v63, %v1819_v38  ;;  %2506 = vmatpush.msrb.mxu1 %v2475_v14  ;;  %2581 = vmatpush.msrb.mxu2 %v2475_v14  ;;  %v2706_v44 = vshll.u32 %v7827_v28, 16  ;;  %v6429_v38 = vld [vmem:[#allocation2 + $0x28] sm:$0xff] }
 0x1bb   :  { %v7709_v43 = vpop.f32.mrf.mxu0  ;;  %v7784_v21 = vadd.f32 %v7700_v0, %v2194_v31  ;;  %v1805_v53 = vpop.f32.mrf.mxu2  ;;  %v2198_v54 = vadd.f32 %v7716_v41, %v1820_v23  ;;  %v6430_v41 = vld [vmem:[#allocation2 + $0x30] sm:$0xff]  ;;  %2989 = vmatpush.bf16.msra.mxu3 %v6434_v47 }
 0x1bc   :  { %v1605_v13 = vpop.f32.mrf.mxu1  ;;  %v7733_v33 = vpop.f32.mrf.mxu3  ;;  %v7791_v12 = vadd.f32 %v7709_v43, %v2195_v58  ;;  %3129 = vmatpush.bf16.msra.mxu1 %v6431_v15  ;;  %v2708_v50 = vrot.slane %v2706_v44, 5  ;;  %v6428_v15 = vld [vmem:[#allocation2 + $0x20] sm:$0xff]  ;;  %v6427_v44 = vld [vmem:[#allocation2 + $0x18] sm:$0xff] }
 0x1bd   :  { %v1627_v0 = vadd.f32 %v1605_v13, %v7617_v20  ;;  %v1002_v20 = vadd.f32 %v7558_v29, %v7570_v56  ;;  %v9124_v29 = vld [vmem:[#allocation13_spill] sm:$0xff] }
 0x1be   :  { %v2199_v56 = vadd.f32 %v9124_v29, %v1821_v62  ;;  %v6432_v62 = vld [vmem:[#allocation2 + $0x40] sm:$0xff] }
 0x1bf   :  { %v1822_v13 = vadd.f32 %v1800_v5, %v1627_v0  ;;  %2990 = vmatpush.bf16.msra.mxu3 %v6433_v40 }
 0x1c0   :  { %3130 = vmatpush.bf16.msra.mxu1 %v6430_v41 }
 0x1c3   :  { %v7714_v52 = vpop.f32.mrf.mxu0  ;;  %v1807_v58 = vpop.f32.mrf.mxu2  ;;  %2991 = vmatpush.bf16.msra.mxu3 %v6432_v62 }
 0x1c4   :  { %v1607_v42 = vpop.f32.mrf.mxu1  ;;  %v7766_v32 = vpop.f32.mrf.mxu3  ;;  %v7804_v34 = vadd.f32 %v7714_v52, %v2196_v36  ;;  %3131 = vmatpush.bf16.msra.mxu1 %v6429_v38 }
 0x1c5   :  { %v1628_v3 = vadd.f32 %v1607_v42, %v1378_v16  ;;  %v6463_v16 = vld [vmem:[#allocation2 + $0xf8] sm:$0xff] }
 0x1c6   :  { %3548 = vmatpush.bf16.msrb.mxu0 %v6463_v16  ;;  %v6462_v16 = vld [vmem:[#allocation2 + $0xf0] sm:$0xff] }
 0x1c7   :  { %v1823_v5 = vadd.f32 %v7746_v1, %v1628_v3  ;;  %v7832_v1 = vld [vmem:[%s9094_s0 + $0x80] sm:$0x1] }
 0x1c8   :  { %3132 = vmatpush.bf16.msra.mxu1 %v6428_v15 }
 0x1c9   :  { %v2201_v30 = vadd.f32 %v7766_v32, %v1823_v5 }
 0x1ca   :  { %3549 = vmatpush.bf16.msrb.mxu0 %v6462_v16 }
 0x1cb   :  { %v7721_v27 = vpop.f32.mrf.mxu0 }
 0x1cc   :  { %v1610_v8 = vpop.f32.mrf.mxu1  ;;  %v2183_v63 = vpop.f32.mrf.mxu3  ;;  %v7812_v52 = vadd.f32 %v7721_v27, %v2197_v11  ;;  %v5784_v27 = vld [vmem:[%s9094_s0 + $0x78] sm:$0xf]  ;;  %v5786_v11 = vld [vmem:[%s9094_s0 + $0x84] sm:$0xf]  ;;  %3133 = vmatpush.bf16.msra.mxu1 %v6427_v44 }
 0x1cd   :  { %v1629_v55 = vadd.f32 %v1610_v8, %v7637_v39  ;;  %v2697_v61 = vshrl.u32 %v5784_v27, 16  ;;  %v2700_v31 = vshll.u32 %v5784_v27, 16  ;;  %v2716_v8 = vshll.u32 %v7832_v1, 16 }
 0x1cf   :  { %v1824_v7 = vadd.f32 %v1805_v53, %v1629_v55  ;;  %v2702_v23 = vrot.slane %v2700_v31, 5  ;;  %v2712_v53 = vrot.slane %v2710_v6, 4  ;;  %v2718_v45 = vrot.slane %v2716_v8, 5 }
 0x1d1   :  { %v2713_v14 = vor.u32 %v2712_v53, %v2708_v50 }
 0x1d3   :  { %v7728_v26 = vpop.f32.mrf.mxu0  ;;  %v2714_v55 = vrot.slane %v2713_v14, 4 }
 0x1d4   :  { %9122 = vst [vmem:[#allocation10_spill] sm:$0xff] %v7728_v26  ;;  %v7742_v26 = vadd.f32 %v7653_v17, %v2189_v51 }
 0x1d6   :  { %v2454_v17 = vadd.f32 %v7742_v26, %v7648_v22 }
 0x1d8   :  { %v2455_v9 = vadd.f32 %v2454_v17, %v7664_v49  ;;  %v1380_v17 = vadd.f32 %v9123_v19, %v1002_v20  ;;  %v6471_v20 = vld [vmem:[#allocation2 + $0x138] sm:$0xff] }
 0x1d9   :  { %3925 = vmatpush.bf16.msrb.mxu3 %v6471_v20  ;;  %v7888_v20 = vld [vmem:[%s9094_s0 + $0x94] sm:$0xf] }
 0x1da   :  { %v2456_v35 = vadd.f32 %v2455_v9, %v7759_v59  ;;  %v1612_v9 = vpop.f32.mrf.mxu1 }
 0x1db   :  { %v7737_v46 = vpop.f32.mrf.mxu0  ;;  %v9125_v2 = vld [vmem:[#allocation10_spill] sm:$0xff]  ;;  %v1630_v36 = vadd.f32 %v1612_v9, %v1380_v17  ;;  %v7863_v17 = vld [vmem:[%s9094_s0 + $0x8c] sm:$0x1] }
 0x1dc   :  { %v2457_v57 = vadd.f32 %v2456_v35, %v7684_v24  ;;  %v7819_v39 = vadd.f32 %v9125_v2, %v2198_v54  ;;  %v2200_v35 = vadd.f32 %v7733_v33, %v1822_v13  ;;  %v7839_v37 = vadd.f32 %v7737_v46, %v2199_v56 }
 0x1dd   :  { %v2202_v46 = vadd.f32 %v2183_v63, %v1824_v7  ;;  %v2721_v54 = vshrl.u32 %v5786_v11, 16  ;;  %v2724_v13 = vshll.u32 %v5786_v11, 16  ;;  %v5788_v11 = vld [vmem:[%s9094_s0 + $0x90] sm:$0xf] }
 0x1de   :  { %v2458_v18 = vadd.f32 %v2457_v57, %v7776_v48  ;;  %v2699_v57 = vrot.slane %v2697_v61, 4 }
 0x1df   :  { %v2723_v29 = vrot.slane %v2721_v54, 4  ;;  %v2726_v56 = vrot.slane %v2724_v13, 5  ;;  %v2745_v54 = vshrl.u32 %v5788_v11, 16  ;;  %v2748_v13 = vshll.u32 %v5788_v11, 16 }
 0x1e0   :  { %v2459_v43 = vadd.f32 %v2458_v18, %v7784_v21  ;;  %v2703_v0 = vor.u32 %v2702_v23, %v2699_v57 }
 0x1e1   :  { %v2727_v6 = vor.u32 %v2726_v56, %v2723_v29  ;;  %v2750_v29 = vrot.slane %v2748_v13, 5 }
 0x1e2   :  { %v2460_v4 = vadd.f32 %v2459_v43, %v7791_v12  ;;  %v1825_v43 = vadd.f32 %v1807_v58, %v1630_v36  ;;  %v2704_v3 = vrot.slane %v2703_v0, 4 }
 0x1e3   :  { %v7768_v25 = vpop.f32.mrf.mxu0  ;;  %v2728_v53 = vrot.slane %v2727_v6, 4  ;;  %v6416_v6 = vld [vmem:[%s9094_s0 + $0x78] sm:$0xff] }
 0x1e4   :  { %v2461_v42 = vadd.f32 %v2460_v4, %v7804_v34  ;;  %v7845_v33 = vadd.f32 %v7768_v25, %v2200_v35  ;;  %v7854_v25 = vld [vmem:[%s9094_s0 + $0x88] sm:$0xf]  ;;  %v2185_v4 = vpop.f32.mrf.mxu3  ;;  %v2709_v7 = vsel %vm6675_vm4, %v2704_v3, %v2708_v50  ;;  %v2740_v35 = vshll.u32 %v7863_v17, 16  ;;  %v6426_v50 = vld [vmem:[#allocation2 + $0x10] sm:$0xff]  ;;  %v6424_v3 = vld [vmem:[#allocation2] sm:$0xff] }
 0x1e5   :  { %v2730_v63 = vshll.u32 %v7854_v25, 16  ;;  %v2904_v40 = vunpack.c.l.b16 %v2709_v7  ;;  %v2203_v61 = vadd.f32 %v2185_v4, %v1825_v43  ;;  %3134 = vmatpush.bf16.msra.mxu1 %v6426_v50  ;;  %v7895_v4 = vld [vmem:[%s9094_s0 + $0x98] sm:$0x1] }
 0x1e6   :  { %v2462_v10 = vadd.f32 %v2461_v42, %v7812_v52  ;;  %v2719_v42 = vsel %vm6675_vm4, %v2714_v55, %v2718_v45  ;;  %v2742_v36 = vrot.slane %v2740_v35, 5  ;;  %v6470_v45 = vld [vmem:[#allocation2 + $0x130] sm:$0xff]  ;;  %v2754_v55 = vshll.u32 %v7888_v20, 16 }
 0x1e7   :  { %v2732_v2 = vrot.slane %v2730_v63, 5  ;;  %v2905_v27 = vunpack.c.l.b16 %v2719_v42  ;;  %3926 = vmatpush.bf16.msrb.mxu3 %v6470_v45  ;;  %v2758_v63 = vshrl.u32 %v7888_v20, 16 }
 0x1e8   :  { %v2463_v18 = vadd.f32 %v2462_v10, %v7819_v39 }
 0x1e9   :  { %v2920_v8 = vpack.c.b16 %v2905_v27, %v2904_v40  ;;  %v2733_v62 = vsel %vm6675_vm4, %v2728_v53, %v2732_v2  ;;  %v2760_v7 = vrot.slane %v2758_v63, 4  ;;  %v7911_v53 = vld [vmem:[%s9094_s0 + $0xa0] sm:$0xf] }
 0x1ea   :  { %v2464_v32 = vadd.f32 %v2463_v18, %v7839_v37  ;;  %v2906_v43 = vunpack.c.l.b16 %v2733_v62 }
 0x1eb   :  { %v2430_v51 = vpop.f32.mrf.mxu0  ;;  %2992 = vmatmul.bf16.vlgmr.msra.gmra.mxu3 %v2920_v8  ;;  %v6469_v8 = vld [vmem:[#allocation2 + $0x128] sm:$0xff] }
 0x1ec   :  { %v7856_v47 = vadd.f32 %v2430_v51, %v2201_v30  ;;  %v2465_v19 = vadd.f32 %v2464_v32, %v7845_v33  ;;  %v2734_v51 = vshrl.u32 %v7854_v25, 16  ;;  %3927 = vmatpush.bf16.msrb.mxu3 %v6469_v8 }
 0x1ee   :  { %v2736_v9 = vrot.slane %v2734_v51, 4  ;;  %v2466_v31 = vadd.f32 %v2465_v19, %v7856_v47  ;;  %v2747_v19 = vrot.slane %v2745_v54, 4  ;;  %v2756_v51 = vrot.slane %v2754_v55, 5 }
 0x1f0   :  { %v2737_v58 = vor.u32 %v2736_v9, %v2732_v2  ;;  %v2751_v40 = vor.u32 %v2750_v29, %v2747_v19  ;;  %v2761_v27 = vor.u32 %v2760_v7, %v2756_v51  ;;  %v2764_v9 = vshll.u32 %v7895_v4, 16  ;;  %v6468_v19 = vld [vmem:[#allocation2 + $0x120] sm:$0xff] }
 0x1f1   :  { %v6460_v29 = vld [vmem:[#allocation2 + $0xe0] sm:$0xff]  ;;  %3928 = vmatpush.bf16.msrb.mxu3 %v6468_v19 }
 0x1f2   :  { %v2738_v30 = vrot.slane %v2737_v58, 4  ;;  %v2766_v44 = vrot.slane %v2764_v9, 5  ;;  %v6461_v58 = vld [vmem:[#allocation2 + $0xe8] sm:$0xff] }
 0x1f3   :  { %v2433_v60 = vpop.f32.mrf.mxu0  ;;  %3550 = vmatpush.bf16.msrb.mxu0 %v6461_v58 }
 0x1f4   :  { %v7866_v41 = vadd.f32 %v2433_v60, %v2202_v46  ;;  %v6425_v46 = vld [vmem:[#allocation2 + $0x8] sm:$0xff]  ;;  %v2743_v0 = vsel %vm6675_vm4, %v2738_v30, %v2742_v36 }
 0x1f5   :  { %v2907_v32 = vunpack.c.l.b16 %v2743_v0  ;;  %3135 = vmatpush.bf16.msra.mxu1 %v6425_v46  ;;  %v7918_v46 = vld [vmem:[%s9094_s0 + $0xa4] sm:$0x1] }
 0x1f6   :  { %v2467_v38 = vadd.f32 %v2466_v31, %v7866_v41  ;;  %v2762_v31 = vrot.slane %v2761_v27, 4 }
 0x1f7   :  { %v2921_v42 = vpack.c.b16 %v2907_v32, %v2906_v43  ;;  %v2788_v32 = vshll.u32 %v7918_v46, 16  ;;  %3551 = vmatpush.bf16.msrb.mxu0 %v6460_v29 }
 0x1f9   :  { %3136 = vmatpush.bf16.msra.mxu1 %v6424_v3  ;;  %v6417_v3 = vld [vmem:[%s9094_s0 + $0x84] sm:$0xff] }
 0x1fb   :  { %v2435_v10 = vpop.f32.mrf.mxu0  ;;  %2997 = vmatmul.bf16.gmra.mxu3 %v2921_v42  ;;  %v7934_v42 = vld [vmem:[%s9094_s0 + $0xac] sm:$0xf] }
 0x1fc   :  { %v7875_v57 = vadd.f32 %v2435_v10, %v2203_v61  ;;  %v2752_v61 = vrot.slane %v2751_v40, 4  ;;  %v2767_v10 = vsel %vm6675_vm4, %v2762_v31, %v2766_v44  ;;  %v2802_v27 = vshll.u32 %v7934_v42, 16 }
 0x1fd   :  { %v2909_v50 = vunpack.c.l.b16 %v2767_v10  ;;  %v2806_v9 = vshrl.u32 %v7934_v42, 16 }
 0x1fe   :  { %v2468_v23 = vadd.f32 %v2467_v38, %v7875_v57  ;;  %v2757_v35 = vsel %vm6675_vm4, %v2752_v61, %v2756_v51  ;;  %v5790_v38 = vld [vmem:[%s9094_s0 + $0x9c] sm:$0xf]  ;;  %v7941_v61 = vld [vmem:[%s9094_s0 + $0xb0] sm:$0x1] }
 0x1ff   :  { %v2769_v30 = vshrl.u32 %v5790_v38, 16  ;;  %v2772_v36 = vshll.u32 %v5790_v38, 16  ;;  %v2812_v38 = vshll.u32 %v7941_v61, 16 }
 0x200   :  { %v2469_v18 = vrot.slane %v2468_v23, 4 }
 0x201   :  { %v2771_v62 = vrot.slane %v2769_v30, 4  ;;  %v2774_v0 = vrot.slane %v2772_v36, 5  ;;  %v2814_v30 = vrot.slane %v2812_v38, 5  ;;  %v6418_v36 = vld [vmem:[%s9094_s0 + $0x90] sm:$0xff] }
 0x202   :  { %v2470_v60 = vadd.f32 %v2469_v18, %v2468_v23  ;;  %v2908_v23 = vunpack.c.l.b16 %v2757_v35  ;;  %v2778_v18 = vshll.u32 %v7911_v53, 16  ;;  %v2808_v35 = vrot.slane %v2806_v9, 4  ;;  %v6458_v38 = vld [vmem:[#allocation2 + $0xd0] sm:$0xff] }
 0x203   :  { %v2775_v11 = vor.u32 %v2774_v0, %v2771_v62  ;;  %v6467_v62 = vld [vmem:[#allocation2 + $0x118] sm:$0xff] }
 0x204   :  { %v2471_v14 = vrot.slane %v2470_v60, 2  ;;  %v2922_v16 = vpack.c.b16 %v2909_v50, %v2908_v23  ;;  %3929 = vmatpush.bf16.msrb.mxu3 %v6467_v62 }
 0x205   :  { %v2776_v54 = vrot.slane %v2775_v11, 4  ;;  %v6420_v11 = vld [vmem:[%s9094_s0 + $0xa8] sm:$0xff] }
 0x206   :  { %v2472_v15 = vadd.f32 %v2471_v14, %v2470_v60  ;;  %v2782_v60 = vshrl.u32 %v7911_v53, 16  ;;  %v2780_v14 = vrot.slane %v2778_v18, 5 }
 0x208   :  { %v2473_v56 = vrot.slane %v2472_v15, 1  ;;  %v2784_v45 = vrot.slane %v2782_v60, 4  ;;  %v2781_v55 = vsel %vm6675_vm4, %v2776_v54, %v2780_v14 }
 0x209   :  { %v2910_v51 = vunpack.c.l.b16 %v2781_v55 }
 0x20a   :  { %v2474_v2 = vadd.f32 %v2473_v56, %v2472_v15  ;;  %v2785_v43 = vor.u32 %v2784_v45, %v2780_v14  ;;  %v2790_v15 = vrot.slane %v2788_v32, 5  ;;  %v5792_v56 = vld [vmem:[%s9094_s0 + $0xa8] sm:$0xf]  ;;  %v5795_v32 = vld [vmem:[%s9094_s0 + $0xb8] sm:$0xf] }
 0x20b   :  { %3002 = vmatmul.bf16.gmra.mxu3 %v2922_v16  ;;  %v2796_v40 = vshll.u32 %v5792_v56, 16  ;;  %v6419_v16 = vld [vmem:[%s9094_s0 + $0x9c] sm:$0xff] }
 0x20c   :  { %2507 = vmatmul.f32.vlgmr.msrb.gmra.mxu1 %v2474_v2  ;;  %v2786_v13 = vrot.slane %v2785_v43, 4  ;;  %v2793_v2 = vshrl.u32 %v5792_v56, 16  ;;  %v5794_v43 = vld [vmem:[%s9094_s0 + $0xb4] sm:$0xf]  ;;  %v5805_v56 = vld [vmem:[%s9094_s0 + $0xbc] sm:$0x1] }
 0x20d   :  { %v2798_v44 = vrot.slane %v2796_v40, 5  ;;  %v2817_v54 = vshrl.u32 %v5794_v43, 16 }
 0x20e   :  { %v2791_v63 = vsel %vm6675_vm4, %v2786_v13, %v2790_v15  ;;  %v2795_v31 = vrot.slane %v2793_v2, 4  ;;  %v2820_v13 = vshll.u32 %v5794_v43, 16  ;;  %v2826_v15 = vshll.u32 %v5795_v32, 16 }
 0x20f   :  { %v2911_v7 = vunpack.c.l.b16 %v2791_v63  ;;  %v2819_v55 = vrot.slane %v2817_v54, 4  ;;  %v2836_v2 = vshll.u32 %v5805_v56, 16  ;;  %v5799_v56 = vld [vmem:[%s9094_s0 + $0xd0] sm:$0xf] }
 0x210   :  { %v2799_v8 = vor.u32 %v2798_v44, %v2795_v31  ;;  %v2822_v63 = vrot.slane %v2820_v13, 5  ;;  %v2828_v19 = vrot.slane %v2826_v15, 5  ;;  %v6459_v31 = vld [vmem:[#allocation2 + $0xd8] sm:$0xff]  ;;  %v6446_v13 = vld [vmem:[#allocation2 + $0xb0] sm:$0xff] }
 0x211   :  { %v2923_v10 = vpack.c.b16 %v2911_v7, %v2910_v51  ;;  %v2838_v9 = vrot.slane %v2836_v2, 5  ;;  %3552 = vmatpush.bf16.msrb.mxu0 %v6459_v31  ;;  %v6478_v2 = vld [vmem:[#allocation2 + $0x170] sm:$0xff] }
 0x212   :  { %v2800_v23 = vrot.slane %v2799_v8, 4  ;;  %v2823_v51 = vor.u32 %v2822_v63, %v2819_v55  ;;  %v6457_v63 = vld [vmem:[#allocation2 + $0xc8] sm:$0xff] }
 0x214   :  { %3137 = vmatmul.bf16.vlgmr.msra.gmra.mxu1 %v6416_v6  ;;  %v2804_v6 = vrot.slane %v2802_v27, 5  ;;  %v2824_v40 = vrot.slane %v2823_v51, 4 }
 0x215   :  { %3553 = vmatpush.bf16.msrb.mxu0 %v6458_v38 }
 0x216   :  { %v2809_v58 = vor.u32 %v2808_v35, %v2804_v6  ;;  %v2805_v18 = vsel %vm6675_vm4, %v2800_v23, %v2804_v6  ;;  %v2829_v44 = vsel %vm6675_vm4, %v2824_v40, %v2828_v19  ;;  %v6421_v35 = vld [vmem:[%s9094_s0 + $0xb4] sm:$0xff]  ;;  %v5796_v23 = vld [vmem:[%s9094_s0 + $0xc0] sm:$0xf] }
 0x217   :  { %v2912_v0 = vunpack.c.l.b16 %v2805_v18  ;;  %v2914_v8 = vunpack.c.l.b16 %v2829_v44  ;;  %v2844_v18 = vshll.u32 %v5796_v23, 16  ;;  %v6464_v40 = vld [vmem:[#allocation2 + $0x100] sm:$0xff] }
 0x218   :  { %v2810_v50 = vrot.slane %v2809_v58, 4 }
 0x219   :  { %v2846_v43 = vrot.slane %v2844_v18, 5  ;;  %3554 = vmatpush.bf16.msrb.mxu0 %v6457_v63 }
 0x21a   :  { %v2815_v60 = vsel %vm6675_vm4, %v2810_v50, %v2814_v30  ;;  %v5797_v50 = vld [vmem:[%s9094_s0 + $0xc4] sm:$0xf]  ;;  %v5806_v30 = vld [vmem:[%s9094_s0 + $0xc8] sm:$0x1] }
 0x21b   :  { %3007 = vmatmul.bf16.gmra.mxu3 %v2923_v10  ;;  %v2913_v14 = vunpack.c.l.b16 %v2815_v60  ;;  %v6466_v10 = vld [vmem:[#allocation2 + $0x110] sm:$0xff]  ;;  %v2850_v60 = vshll.u32 %v5797_v50, 16  ;;  %v2854_v62 = vshrl.u32 %v5797_v50, 16  ;;  %v6422_v50 = vld [vmem:[%s9094_s0 + $0xc0] sm:$0xff] }
 0x21c   :  { %3930 = vmatpush.bf16.msrb.mxu3 %v6466_v10  ;;  %v2878_v10 = vshrl.u32 %v5799_v56, 16 }
 0x21d   :  { %v2924_v45 = vpack.c.b16 %v2913_v14, %v2912_v0  ;;  %v2860_v14 = vshll.u32 %v5806_v30, 16  ;;  %v2856_v54 = vrot.slane %v2854_v62, 4  ;;  %v5807_v62 = vld [vmem:[%s9094_s0 + $0xd4] sm:$0x1] }
 0x21f   :  { %v2862_v55 = vrot.slane %v2860_v14, 5  ;;  %v6443_v14 = vld [vmem:[#allocation2 + $0x98] sm:$0xff] }
 0x224   :  { %3142 = vmatmul.bf16.gmra.mxu1 %v6417_v3  ;;  %v2830_v3 = vshrl.u32 %v5795_v32, 16  ;;  %v2852_v32 = vrot.slane %v2850_v60, 5  ;;  %v2880_v60 = vrot.slane %v2878_v10, 4 }
 0x226   :  { %v2832_v29 = vrot.slane %v2830_v3, 4  ;;  %v2857_v3 = vor.u32 %v2856_v54, %v2852_v32 }
 0x228   :  { %v2833_v7 = vor.u32 %v2832_v29, %v2828_v19  ;;  %v5798_v19 = vld [vmem:[%s9094_s0 + $0xcc] sm:$0xf]  ;;  %v6479_v29 = vld [vmem:[#allocation2 + $0x178] sm:$0xff] }
 0x229   :  { %4174 = vmatpush.bf16.msrb.mxu1 %v6479_v29  ;;  %v2868_v31 = vshll.u32 %v5798_v19, 16 }
 0x22a   :  { %v2834_v27 = vrot.slane %v2833_v7, 4  ;;  %v2858_v7 = vrot.slane %v2857_v3, 4 }
 0x22b   :  { %3012 = vmatmul.bf16.gmra.mxu3 %v2924_v45  ;;  %v6447_v45 = vld [vmem:[#allocation2 + $0xb8] sm:$0xff] }
 0x22c   :  { %v2839_v6 = vsel %vm6675_vm4, %v2834_v27, %v2838_v9  ;;  %3354 = vmatpush.bf16.msra.mxu2 %v6447_v45  ;;  %v6445_v27 = vld [vmem:[#allocation2 + $0xa8] sm:$0xff]  ;;  %v2865_v9 = vshrl.u32 %v5798_v19, 16 }
 0x22d   :  { %v2915_v58 = vunpack.c.l.b16 %v2839_v6  ;;  %v2863_v6 = vsel %vm6675_vm4, %v2858_v7, %v2862_v55  ;;  %4175 = vmatpush.bf16.msrb.mxu1 %v6478_v2 }
 0x22e   :  { %v2917_v38 = vunpack.c.l.b16 %v2863_v6  ;;  %v2867_v30 = vrot.slane %v2865_v9, 4 }
 0x22f   :  { %v2925_v0 = vpack.c.b16 %v2915_v58, %v2914_v8  ;;  %v6477_v8 = vld [vmem:[#allocation2 + $0x168] sm:$0xff] }
 0x230   :  { %3355 = vmatpush.bf16.msra.mxu2 %v6446_v13 }
 0x231   :  { %4176 = vmatpush.bf16.msrb.mxu1 %v6477_v8 }
 0x234   :  { %3147 = vmatmul.bf16.gmra.mxu1 %v6418_v36  ;;  %v2841_v36 = vshrl.u32 %v5796_v23, 16  ;;  %3356 = vmatpush.bf16.msra.mxu2 %v6445_v27  ;;  %v6444_v23 = vld [vmem:[#allocation2 + $0xa0] sm:$0xff] }
 0x238   :  { %3357 = vmatpush.bf16.msra.mxu2 %v6444_v23 }
 0x23b   :  { %3017 = vmatmul.bf16.gmra.mxu3 %v2925_v0 }
 0x23c   :  { %3358 = vmatpush.bf16.msra.mxu2 %v6443_v14 }
 0x244   :  { %3152 = vmatmul.bf16.gmra.mxu1 %v6419_v16  ;;  %v6465_v16 = vld [vmem:[#allocation2 + $0x108] sm:$0xff] }
 0x245   :  { %3931 = vmatpush.bf16.msrb.mxu3 %v6465_v16 }
 0x249   :  { %3932 = vmatpush.bf16.msrb.mxu3 %v6464_v40 }
 0x254   :  { %3157 = vmatmul.bf16.gmra.mxu1 %v6420_v11  ;;  %v2843_v11 = vrot.slane %v2841_v36, 4  ;;  %v2870_v36 = vrot.slane %v2868_v31, 5 }
 0x256   :  { %v2847_v15 = vor.u32 %v2846_v43, %v2843_v11  ;;  %v2871_v45 = vor.u32 %v2870_v36, %v2867_v30  ;;  %v2884_v11 = vshll.u32 %v5807_v62, 16  ;;  %v6442_v43 = vld [vmem:[#allocation2 + $0x90] sm:$0xff] }
 0x257   :  { %3359 = vmatpush.bf16.msra.mxu2 %v6442_v43 }
 0x258   :  { %v2848_v51 = vrot.slane %v2847_v15, 4  ;;  %v2886_v13 = vrot.slane %v2884_v11, 5 }
 0x25a   :  { %v2853_v44 = vsel %vm6675_vm4, %v2848_v51, %v2852_v32  ;;  %v2872_v32 = vrot.slane %v2871_v45, 4 }
 0x25b   :  { %v2916_v58 = vunpack.c.l.b16 %v2853_v44 }
 0x25d   :  { %v2926_v0 = vpack.c.b16 %v2917_v38, %v2916_v58 }
 0x25f   :  { %3022 = vmatmul.bf16.gmra.mxu3 %v2926_v0  ;;  %v8062_v0 = vld [vmem:[%s9094_s0 + $0x8c] sm:$0x1] }
 0x260   :  { %v3657_v11 = vshll.u32 %v8062_v0, 16 }
 0x264   :  { %3162 = vmatmul.bf16.gmra.mxu1 %v6421_v35  ;;  %v2874_v35 = vshll.u32 %v5799_v56, 16  ;;  %v6423_v56 = vld [vmem:[%s9094_s0 + $0xcc] sm:$0xff] }
 0x266   :  { %v2876_v18 = vrot.slane %v2874_v35, 5 }
 0x268   :  { %v2881_v16 = vor.u32 %v2880_v60, %v2876_v18  ;;  %v2877_v15 = vsel %vm6675_vm4, %v2872_v32, %v2876_v18 }
 0x269   :  { %v2918_v63 = vunpack.c.l.b16 %v2877_v15  ;;  %v3659_v15 = vrot.slane %v3657_v11, 5  ;;  %v6511_v11 = vld [vmem:[#allocation2 + $0x238] sm:$0xff] }
 0x26a   :  { %v2882_v54 = vrot.slane %v2881_v16, 4  ;;  %4994 = vmatpush.bf16.msra.mxu3 %v6511_v11 }
 0x26c   :  { %v2887_v3 = vsel %vm6675_vm4, %v2882_v54, %v2886_v13 }
 0x26d   :  { %v2919_v19 = vunpack.c.l.b16 %v2887_v3 }
 0x26f   :  { %v2927_v7 = vpack.c.b16 %v2919_v19, %v2918_v63 }
 0x271   :  { %3027 = vmatmul.bf16.gmra.mxu3 %v2927_v7 }
 0x274   :  { %3167 = vmatmul.bf16.gmra.mxu1 %v6422_v50 }
 0x284   :  { %3172 = vmatmul.bf16.gmra.mxu1 %v6423_v56  ;;  %v6441_v56 = vld [vmem:[#allocation2 + $0x88] sm:$0xff] }
 0x285   :  { %3360 = vmatpush.bf16.msra.mxu2 %v6441_v56  ;;  %v4027_v56 = vrot.slane %v8062_v0, 5 }
 0x289   :  { %v2508_v55 = vpop.f32.mrf.mxu1 }
 0x28a   :  { %v2511_v29 = vmul.f32 0.00024414063, %v2508_v55 }
 0x28c   :  { %v8005_v51 = vperm.slane %v2511_v29, 0  ;;  %v6456_v29 = vld [vmem:[#allocation2 + $0xc0] sm:$0xff] }
 0x28d   :  { %3555 = vmatpush.bf16.msrb.mxu0 %v6456_v29 }
 0x28e   :  { %v8009_v2 = vsub.f32 %v7648_v22, %v8005_v51  ;;  %v8013_v40 = vsub.f32 %v7742_v26, %v8005_v51  ;;  %v8017_v27 = vsub.f32 %v7664_v49, %v8005_v51  ;;  %v8025_v44 = vsub.f32 %v7759_v59, %v8005_v51  ;;  %v6032_v59 = vld [vmem:[%s9094_s0 + $0x84] sm:$0xf] }
 0x28f   :  { %v8029_v22 = vsub.f32 %v7684_v24, %v8005_v51  ;;  %v8035_v49 = vsub.f32 %v7776_v48, %v8005_v51  ;;  %v8045_v24 = vld [vmem:[%s9094_s0 + $0x88] sm:$0xf]  ;;  %v3638_v8 = vshrl.u32 %v6032_v59, 16  ;;  %v3641_v58 = vshll.u32 %v6032_v59, 16 }
 0x290   :  { %v2529_v9 = vmul.f32 %v8009_v2, %v8009_v2  ;;  %v2530_v31 = vmul.f32 %v8013_v40, %v8013_v40  ;;  %v2531_v26 = vmul.f32 %v8017_v27, %v8017_v27  ;;  %v2532_v35 = vmul.f32 %v8025_v44, %v8025_v44 }
 0x291   :  { %v3647_v38 = vshll.u32 %v8045_v24, 16  ;;  %v8050_v48 = vsub.f32 %v7784_v21, %v8005_v51  ;;  %v2533_v23 = vmul.f32 %v8029_v22, %v8029_v22  ;;  %v3651_v50 = vshrl.u32 %v8045_v24, 16 }
 0x292   :  { %v2545_v6 = vadd.f32 %v2530_v31, %v2529_v9  ;;  %v3640_v36 = vrot.slane %v3638_v8, 4  ;;  %v3643_v18 = vrot.slane %v3641_v58, 5  ;;  %v8057_v62 = vsub.f32 %v7791_v12, %v8005_v51  ;;  %v2993_v9 = vpop.f32.mrf.mxu3  ;;  %v3138_v31 = vpop.f32.mrf.mxu1  ;;  %v6440_v58 = vld [vmem:[#allocation2 + $0x80] sm:$0xff] }
 0x293   :  { %v3649_v60 = vrot.slane %v3647_v38, 5  ;;  %v3653_v21 = vrot.slane %v3651_v50, 4  ;;  %v2534_v14 = vmul.f32 %v8035_v49, %v8035_v49  ;;  %v8069_v43 = vsub.f32 %v7804_v34, %v8005_v51  ;;  %v6476_v34 = vld [vmem:[#allocation2 + $0x160] sm:$0xff]  ;;  %3361 = vmatpush.bf16.msra.mxu2 %v6440_v58 }
 0x294   :  { %v2546_v10 = vadd.f32 %v2545_v6, %v2531_v26  ;;  %v3644_v16 = vor.u32 %v3643_v18, %v3640_v36  ;;  %v2535_v12 = vmul.f32 %v8050_v48, %v8050_v48  ;;  %v8075_v55 = vsub.f32 %v7812_v52, %v8005_v51  ;;  %4177 = vmatpush.bf16.msrb.mxu1 %v6476_v34 }
 0x295   :  { %v3654_v32 = vor.u32 %v3653_v21, %v3649_v60  ;;  %v2536_v63 = vmul.f32 %v8057_v62, %v8057_v62  ;;  %v8087_v52 = vsub.f32 %v7819_v39, %v8005_v51  ;;  %v2537_v59 = vmul.f32 %v8069_v43, %v8069_v43 }
 0x296   :  { %v2547_v30 = vadd.f32 %v2546_v10, %v2532_v35  ;;  %v3645_v13 = vrot.slane %v3644_v16, 4  ;;  %v8083_v35 = vadd.f32 %v3138_v31, %v2993_v9  ;;  %v8093_v38 = vsub.f32 %v7839_v37, %v8005_v51 }
 0x297   :  { %v3655_v3 = vrot.slane %v3654_v32, 4  ;;  %v2538_v50 = vmul.f32 %v8075_v55, %v8075_v55  ;;  %v8099_v36 = vsub.f32 %v7845_v33, %v8005_v51  ;;  %v2539_v18 = vmul.f32 %v8087_v52, %v8087_v52  ;;  %v6448_v33 = vld [vmem:[%s9094_s0 + $0x84] sm:$0xff] }
 0x298   :  { %v2548_v45 = vadd.f32 %v2547_v30, %v2533_v23  ;;  %v3650_v7 = vsel %vm6675_vm4, %v3645_v13, %v3649_v60  ;;  %v6475_v23 = vld [vmem:[#allocation2 + $0x158] sm:$0xff]  ;;  %v8105_v37 = vsub.f32 %v7856_v47, %v8005_v51  ;;  %v8109_v21 = vsub.f32 %v7866_v41, %v8005_v51  ;;  %v8122_v47 = vld [vmem:[%s9094_s0 + $0x94] sm:$0xf]  ;;  %3556 = vmatmul.bf16.vlgmr.msrb.gmra.mxu0 %v6448_v33 }
 0x299   :  { %v3660_v26 = vsel %vm6675_vm4, %v3655_v3, %v3659_v15  ;;  %v3845_v6 = vunpack.c.l.b16 %v3650_v7  ;;  %4178 = vmatpush.bf16.msrb.mxu1 %v6475_v23  ;;  %v6474_v41 = vld [vmem:[#allocation2 + $0x150] sm:$0xff]  ;;  %v3671_v15 = vshll.u32 %v8122_v47, 16  ;;  %v2541_v3 = vmul.f32 %v8099_v36, %v8099_v36  ;;  %v8137_v7 = vld [vmem:[%s9094_s0 + $0x98] sm:$0x1] }
 0x29a   :  { %v2549_v54 = vadd.f32 %v2548_v45, %v2534_v14  ;;  %v3846_v8 = vunpack.c.l.b16 %v3660_v26  ;;  %v2540_v14 = vmul.f32 %v8093_v38, %v8093_v38  ;;  %v6035_v45 = vld [vmem:[%s9094_s0 + $0x90] sm:$0xf]  ;;  %v8124_v32 = vpop.f32.mrf.mxu3  ;;  %v4024_v29 = vrot.slane %v8045_v24, 5 }
 0x29b   :  { %v3665_v13 = vshll.u32 %v6035_v45, 16  ;;  %v3673_v26 = vrot.slane %v3671_v15, 5  ;;  %v3681_v0 = vshll.u32 %v8137_v7, 16  ;;  %v2542_v58 = vmul.f32 %v8105_v37, %v8105_v37 }
 0x29c   :  { %v2550_v19 = vadd.f32 %v2549_v54, %v2535_v12  ;;  %v3861_v39 = vpack.c.b16 %v3846_v8, %v3845_v6  ;;  %v8126_v12 = vpop.f32.mrf.mxu1  ;;  %v3662_v54 = vshrl.u32 %v6035_v45, 16  ;;  %v8141_v6 = vsub.f32 %v7875_v57, %v8005_v51 }
 0x29d   :  { %v3667_v31 = vrot.slane %v3665_v13, 5  ;;  %4179 = vmatpush.bf16.msrb.mxu1 %v6474_v41  ;;  %v4026_v8 = vrot.slane %v4024_v29, 4  ;;  %v2543_v57 = vmul.f32 %v8109_v21, %v8109_v21  ;;  %v6472_v41 = vld [vmem:[#allocation2 + $0x140] sm:$0xff] }
 0x29e   :  { %v2551_v10 = vadd.f32 %v2550_v19, %v2536_v63  ;;  %3933 = vmatmul.bf16.vlgmr.msrb.gmra.mxu3 %v3861_v39  ;;  %v6503_v63 = vld [vmem:[#allocation2 + $0x1f8] sm:$0xff]  ;;  %v3675_v19 = vshrl.u32 %v8122_v47, 16  ;;  %v3664_v9 = vrot.slane %v3662_v54, 4  ;;  %v3683_v39 = vrot.slane %v3681_v0, 5 }
 0x29f   :  { %4745 = vmatpush.bf16.msra.mxu0 %v6503_v63  ;;  %v2544_v13 = vmul.f32 %v8141_v6, %v8141_v6 }
 0x2a0   :  { %v2552_v30 = vadd.f32 %v2551_v10, %v2537_v59  ;;  %v6473_v59 = vld [vmem:[#allocation2 + $0x148] sm:$0xff]  ;;  %v3677_v24 = vrot.slane %v3675_v19, 4  ;;  %v6088_v10 = vld [vmem:[%s9094_s0 + $0x84] sm:$0xe] }
 0x2a1   :  { %4180 = vmatpush.bf16.msrb.mxu1 %v6473_v59 }
 0x2a2   :  { %v2553_v60 = vadd.f32 %v2552_v30, %v2538_v50  ;;  %v3668_v50 = vor.u32 %v3667_v31, %v3664_v9  ;;  %v6096_v30 = vrot.slane %v6088_v10, 9  ;;  %v3678_v51 = vor.u32 %v3677_v24, %v3673_v26  ;;  %v2998_v63 = vpop.f32.mrf.mxu3  ;;  %v5904_v31 = vld [vmem:[%s9094_s0 + $0x78] sm:$0xe] }
 0x2a3   :  { %v3204_v10 = vrot.slane %v7827_v28, 5 }
 0x2a4   :  { %v2554_v16 = vadd.f32 %v2553_v60, %v2539_v18  ;;  %v4028_v60 = vsel %vm6679_vm5, %v4026_v8, %v4027_v56  ;;  %v3669_v33 = vrot.slane %v3668_v50, 4  ;;  %v4025_v45 = vsel %vm6679_vm5, %v6096_v30, %v4024_v29  ;;  %v3143_v19 = vpop.f32.mrf.mxu1  ;;  %v6449_v50 = vld [vmem:[%s9094_s0 + $0x90] sm:$0xff]  ;;  %v6038_v30 = vld [vmem:[%s9094_s0 + $0x9c] sm:$0xf] }
 0x2a5   :  { %v3679_v11 = vrot.slane %v3678_v51, 4  ;;  %v4094_v54 = vunpack.c.l.b16 %v4025_v45  ;;  %v8161_v9 = vadd.f32 %v3143_v19, %v2998_v63  ;;  %4181 = vmatpush.bf16.msrb.mxu1 %v6472_v41  ;;  %v5912_v8 = vrot.slane %v5904_v31, 9  ;;  %v8188_v41 = vld [vmem:[%s9094_s0 + $0xa4] sm:$0x1] }
 0x2a6   :  { %v2555_v34 = vadd.f32 %v2554_v16, %v2540_v14  ;;  %v4095_v16 = vunpack.c.l.b16 %v4028_v60  ;;  %v3206_v51 = vrot.slane %v3204_v10, 4  ;;  %v3689_v45 = vshll.u32 %v6038_v30, 16 }
 0x2a7   :  { %v3684_v56 = vsel %vm6675_vm4, %v3679_v11, %v3683_v39  ;;  %v6510_v39 = vld [vmem:[#allocation2 + $0x230] sm:$0xff]  ;;  %v3705_v19 = vshll.u32 %v8188_v41, 16  ;;  %v4031_v31 = vrot.slane %v8122_v47, 5 }
 0x2a8   :  { %v2556_v23 = vadd.f32 %v2555_v34, %v2541_v3  ;;  %v3674_v3 = vsel %vm6675_vm4, %v3669_v33, %v3673_v26  ;;  %v3848_v59 = vunpack.c.l.b16 %v3684_v56  ;;  %v4110_v24 = vpack.c.b16 %v4095_v16, %v4094_v54  ;;  %3561 = vmatmul.bf16.gmra.mxu0 %v6449_v50  ;;  %4995 = vmatpush.bf16.msra.mxu3 %v6510_v39 }
 0x2a9   :  { %v3847_v34 = vunpack.c.l.b16 %v3674_v3  ;;  %v3686_v33 = vshrl.u32 %v6038_v30, 16  ;;  %v3205_v16 = vsel %vm6679_vm5, %v5912_v8, %v3204_v10  ;;  %v3691_v63 = vrot.slane %v3689_v45, 5 }
 0x2aa   :  { %v2557_v14 = vadd.f32 %v2556_v23, %v2542_v58  ;;  %4182 = vmatmul.bf16.vlgmr.msrb.gmra.mxu1 %v4110_v24  ;;  %v3207_v23 = vrot.slane %v7832_v1, 5  ;;  %v8179_v60 = vpop.f32.mrf.mxu3  ;;  %v6502_v1 = vld [vmem:[#allocation2 + $0x1f0] sm:$0xff]  ;;  %v4034_v10 = vrot.slane %v8137_v7, 5  ;;  %v4033_v30 = vrot.slane %v4031_v31, 4 }
 0x2ab   :  { %v3862_v26 = vpack.c.b16 %v3848_v59, %v3847_v34  ;;  %4746 = vmatpush.bf16.msra.mxu0 %v6502_v1  ;;  %v3688_v3 = vrot.slane %v3686_v33, 4  ;;  %v3274_v45 = vunpack.c.l.b16 %v3205_v16  ;;  %v5905_v16 = vld [vmem:[%s9094_s0 + $0x84] sm:$0xe] }
 0x2ac   :  { %v2558_v15 = vadd.f32 %v2557_v14, %v2543_v57  ;;  %v8177_v57 = vld [vmem:[%s9094_s0 + $0xa0] sm:$0xf]  ;;  %v8181_v14 = vpop.f32.mrf.mxu1  ;;  %v3208_v24 = vsel %vm6679_vm5, %v3206_v51, %v3207_v23  ;;  %v4035_v47 = vsel %vm6679_vm5, %v4033_v30, %v4034_v10  ;;  %v6501_v30 = vld [vmem:[#allocation2 + $0x1e8] sm:$0xff] }
 0x2ad   :  { %v3695_v11 = vshll.u32 %v8177_v57, 16  ;;  %v3699_v54 = vshrl.u32 %v8177_v57, 16  ;;  %v3275_v23 = vunpack.c.l.b16 %v3208_v24  ;;  %v4097_v51 = vunpack.c.l.b16 %v4035_v47  ;;  %v6450_v10 = vld [vmem:[%s9094_s0 + $0x9c] sm:$0xff] }
 0x2ae   :  { %v2559_v29 = vadd.f32 %v2558_v15, %v2544_v13  ;;  %3938 = vmatmul.bf16.gmra.mxu3 %v3862_v26  ;;  %v6089_v13 = vld [vmem:[%s9094_s0 + $0x90] sm:$0xe]  ;;  %v6495_v26 = vld [vmem:[#allocation2 + $0x1b8] sm:$0xff]  ;;  %v3214_v24 = vrot.slane %v7863_v17, 5 }
 0x2af   :  { %v3697_v56 = vrot.slane %v3695_v11, 5  ;;  %v3701_v34 = vrot.slane %v3699_v54, 4  ;;  %4747 = vmatpush.bf16.msra.mxu0 %v6501_v30 }
 0x2b0   :  { %v2560_v0 = vrot.slane %v2559_v29, 4 }
 0x2b1   :  { %v3702_v8 = vor.u32 %v3701_v34, %v3697_v56 }
 0x2b2   :  { %v2561_v58 = vadd.f32 %v2560_v0, %v2559_v29  ;;  %v6097_v29 = vrot.slane %v6089_v13, 9  ;;  %v3692_v0 = vor.u32 %v3691_v63, %v3688_v3  ;;  %v3003_v11 = vpop.f32.mrf.mxu3  ;;  %v6494_v13 = vld [vmem:[#allocation2 + $0x1b0] sm:$0xff] }
 0x2b3   :  { %v3703_v33 = vrot.slane %v3702_v8, 4  ;;  %v6493_v8 = vld [vmem:[#allocation2 + $0x1a8] sm:$0xff] }
 0x2b4   :  { %v2562_v28 = vrot.slane %v2561_v58, 2  ;;  %v4032_v50 = vsel %vm6679_vm5, %v6097_v29, %v4031_v31  ;;  %v3693_v39 = vrot.slane %v3692_v0, 4  ;;  %v3148_v54 = vpop.f32.mrf.mxu1  ;;  %v3211_v29 = vrot.slane %v7854_v25, 5  ;;  %v8224_v25 = vld [vmem:[%s9094_s0 + $0xac] sm:$0xf] }
 0x2b5   :  { %v4096_v1 = vunpack.c.l.b16 %v4032_v50  ;;  %v8208_v63 = vadd.f32 %v3148_v54, %v3003_v11  ;;  %v3723_v47 = vshrl.u32 %v8224_v25, 16 }
 0x2b6   :  { %v2563_v15 = vadd.f32 %v2562_v28, %v2561_v58  ;;  %v3707_v58 = vrot.slane %v3705_v19, 5  ;;  %v3698_v7 = vsel %vm6675_vm4, %v3693_v39, %v3697_v56  ;;  %v3290_v56 = vpack.c.b16 %v3275_v23, %v3274_v45  ;;  %v6090_v45 = vld [vmem:[%s9094_s0 + $0x9c] sm:$0xe] }
 0x2b7   :  { %v3849_v3 = vunpack.c.l.b16 %v3698_v7  ;;  %v4111_v34 = vpack.c.b16 %v4097_v51, %v4096_v1  ;;  %v3213_v0 = vrot.slane %v3211_v29, 4  ;;  %v3719_v1 = vshll.u32 %v8224_v25, 16 }
 0x2b8   :  { %v2564_v59 = vrot.slane %v2563_v15, 1  ;;  %3566 = vmatmul.bf16.gmra.mxu0 %v6450_v10  ;;  %v4038_v23 = vrot.slane %v8177_v57, 5 }
 0x2b9   :  { %v3721_v11 = vrot.slane %v3719_v1, 5 }
 0x2ba   :  { %v2565_v28 = vadd.f32 %v2564_v59, %v2563_v15  ;;  %v3708_v15 = vsel %vm6675_vm4, %v3703_v33, %v3707_v58  ;;  %v5913_v59 = vrot.slane %v5905_v16, 9  ;;  %4187 = vmatmul.bf16.gmra.mxu1 %v4111_v34  ;;  %v6509_v58 = vld [vmem:[#allocation2 + $0x228] sm:$0xff]  ;;  %v8226_v17 = vpop.f32.mrf.mxu3  ;;  %v8234_v33 = vld [vmem:[%s9094_s0 + $0xb0] sm:$0x1]  ;;  %v3215_v16 = vsel %vm6679_vm5, %v3213_v0, %v3214_v24 }
 0x2bb   :  { %v3850_v19 = vunpack.c.l.b16 %v3708_v15  ;;  %4996 = vmatpush.bf16.msra.mxu3 %v6509_v58  ;;  %v3729_v54 = vshll.u32 %v8234_v33, 16  ;;  %v6098_v15 = vrot.slane %v6090_v45, 9 }
 0x2bc   :  { %2582 = vmatmul.f32.vlgmr.msrb.gmra.mxu2 %v2565_v28  ;;  %v8228_v50 = vpop.f32.mrf.mxu1  ;;  %v3212_v34 = vsel %vm6679_vm5, %v5913_v59, %v3211_v29 }
 0x2bd   :  { %4368 = vmatpush.bf16.msrb.mxu2 %v6495_v26  ;;  %v3863_v31 = vpack.c.b16 %v3850_v19, %v3849_v3  ;;  %v6041_v26 = vld [vmem:[%s9094_s0 + $0xa8] sm:$0xf]  ;;  %v4040_v3 = vrot.slane %v4038_v23, 4  ;;  %v4041_v19 = vrot.slane %v8188_v41, 5  ;;  %v4039_v10 = vsel %vm6679_vm5, %v6098_v15, %v4038_v23 }
 0x2be   :  { %v3710_v28 = vshrl.u32 %v6041_v26, 16  ;;  %v3713_v39 = vshll.u32 %v6041_v26, 16  ;;  %v4098_v58 = vunpack.c.l.b16 %v4039_v10  ;;  %v3276_v41 = vunpack.c.l.b16 %v3212_v34  ;;  %v6044_v34 = vld [vmem:[%s9094_s0 + $0xb4] sm:$0xf] }
 0x2bf   :  { %3943 = vmatmul.bf16.gmra.mxu3 %v3863_v31  ;;  %v3731_v31 = vrot.slane %v3729_v54, 5  ;;  %v4042_v26 = vsel %vm6679_vm5, %v4040_v3, %v4041_v19  ;;  %v6451_v19 = vld [vmem:[%s9094_s0 + $0xa8] sm:$0xff]  ;;  %v3734_v10 = vshrl.u32 %v6044_v34, 16 }
 0x2c0   :  { %v3712_v7 = vrot.slane %v3710_v28, 4  ;;  %v3715_v51 = vrot.slane %v3713_v39, 5  ;;  %v4099_v30 = vunpack.c.l.b16 %v4042_v26  ;;  %v3277_v39 = vunpack.c.l.b16 %v3215_v16  ;;  %v6492_v16 = vld [vmem:[#allocation2 + $0x1a0] sm:$0xff] }
 0x2c1   :  { %4369 = vmatpush.bf16.msrb.mxu2 %v6494_v13  ;;  %v3725_v13 = vrot.slane %v3723_v47, 4  ;;  %v3737_v26 = vshll.u32 %v6044_v34, 16 }
 0x2c2   :  { %v3716_v57 = vor.u32 %v3715_v51, %v3712_v7  ;;  %v3008_v59 = vpop.f32.mrf.mxu3  ;;  %v4112_v23 = vpack.c.b16 %v4099_v30, %v4098_v58  ;;  %v5906_v7 = vld [vmem:[%s9094_s0 + $0x90] sm:$0xe]  ;;  %v3218_v51 = vrot.slane %v7888_v20, 5  ;;  %v3291_v54 = vpack.c.b16 %v3277_v39, %v3276_v41  ;;  %v8271_v20 = vld [vmem:[%s9094_s0 + $0xb8] sm:$0xf] }
 0x2c3   :  { %v5914_v15 = vrot.slane %v5906_v7, 9  ;;  %v8281_v58 = vld [vmem:[%s9094_s0 + $0xbc] sm:$0x1]  ;;  %v3747_v30 = vshrl.u32 %v8271_v20, 16  ;;  %v4045_v41 = vrot.slane %v8224_v25, 5  ;;  %v3736_v39 = vrot.slane %v3734_v10, 4 }
 0x2c4   :  { %3362 = vmatmul.bf16.vlgmr.msra.gmra.mxu2 %v3290_v56  ;;  %v3726_v56 = vor.u32 %v3725_v13, %v3721_v11  ;;  %v3153_v24 = vpop.f32.mrf.mxu1  ;;  %v3220_v3 = vrot.slane %v3218_v51, 4 }
 0x2c5   :  { %4370 = vmatpush.bf16.msrb.mxu2 %v6493_v8  ;;  %v3717_v8 = vrot.slane %v3716_v57, 4  ;;  %v8255_v47 = vadd.f32 %v3153_v24, %v3008_v59  ;;  %v6508_v57 = vld [vmem:[#allocation2 + $0x220] sm:$0xff]  ;;  %v3753_v24 = vshll.u32 %v8281_v58, 16  ;;  %v3219_v7 = vsel %vm6679_vm5, %v5914_v15, %v3218_v51 }
 0x2c6   :  { %v3727_v28 = vrot.slane %v3726_v56, 4  ;;  %4997 = vmatpush.bf16.msra.mxu3 %v6508_v57 }
 0x2c7   :  { %v3722_v29 = vsel %vm6675_vm4, %v3717_v8, %v3721_v11  ;;  %v3221_v11 = vrot.slane %v7895_v4, 5  ;;  %v3743_v8 = vshll.u32 %v8271_v20, 16 }
 0x2c8   :  { %v3732_v0 = vsel %vm6675_vm4, %v3727_v28, %v3731_v31  ;;  %v3851_v1 = vunpack.c.l.b16 %v3722_v29  ;;  %v6500_v31 = vld [vmem:[#allocation2 + $0x1e0] sm:$0xff]  ;;  %3571 = vmatmul.bf16.gmra.mxu0 %v6451_v19  ;;  %v6091_v28 = vld [vmem:[%s9094_s0 + $0xa8] sm:$0xe]  ;;  %v3739_v29 = vrot.slane %v3737_v26, 5  ;;  %v3755_v19 = vrot.slane %v3753_v24, 5 }
 0x2c9   :  { %v3852_v45 = vunpack.c.l.b16 %v3732_v0  ;;  %4371 = vmatpush.bf16.msrb.mxu2 %v6492_v16  ;;  %v3745_v59 = vrot.slane %v3743_v8, 5  ;;  %4748 = vmatpush.bf16.msra.mxu0 %v6500_v31  ;;  %v3749_v0 = vrot.slane %v3747_v30, 4 }
 0x2ca   :  { %4192 = vmatmul.bf16.gmra.mxu1 %v4112_v23  ;;  %v8273_v4 = vpop.f32.mrf.mxu3  ;;  %v4048_v23 = vrot.slane %v8234_v33, 5  ;;  %v3740_v25 = vor.u32 %v3739_v29, %v3736_v39  ;;  %v3278_v33 = vunpack.c.l.b16 %v3219_v7  ;;  %v5907_v39 = vld [vmem:[%s9094_s0 + $0x9c] sm:$0xe]  ;;  %v3225_v29 = vrot.slane %v7911_v53, 5  ;;  %v6047_v7 = vld [vmem:[%s9094_s0 + $0xc0] sm:$0xf] }
 0x2cb   :  { %v3864_v13 = vpack.c.b16 %v3852_v45, %v3851_v1  ;;  %v6099_v1 = vrot.slane %v6091_v28, 9  ;;  %v4047_v45 = vrot.slane %v4045_v41, 4  ;;  %v8320_v53 = vld [vmem:[%s9094_s0 + $0xc4] sm:$0xf] }
 0x2cc   :  { %v8275_v56 = vpop.f32.mrf.mxu1  ;;  %v3741_v57 = vrot.slane %v3740_v25, 4  ;;  %v6507_v25 = vld [vmem:[#allocation2 + $0x218] sm:$0xff] }
 0x2cd   :  { %v4046_v34 = vsel %vm6679_vm5, %v6099_v1, %v4045_v41  ;;  %v4049_v16 = vsel %vm6679_vm5, %v4047_v45, %v4048_v23  ;;  %v5915_v1 = vrot.slane %v5907_v39, 9  ;;  %v3227_v45 = vrot.slane %v3225_v29, 4  ;;  %v6452_v23 = vld [vmem:[%s9094_s0 + $0xb4] sm:$0xff]  ;;  %4998 = vmatpush.bf16.msra.mxu3 %v6507_v25 }
 0x2ce   :  { %v4100_v31 = vunpack.c.l.b16 %v4046_v34  ;;  %v4101_v10 = vunpack.c.l.b16 %v4049_v16  ;;  %v3746_v51 = vsel %vm6675_vm4, %v3741_v57, %v3745_v59  ;;  %v3761_v34 = vshll.u32 %v6047_v7, 16  ;;  %v8328_v57 = vld [vmem:[%s9094_s0 + $0xc8] sm:$0x1] }
 0x2cf   :  { %3948 = vmatmul.bf16.gmra.mxu3 %v3864_v13  ;;  %v3750_v13 = vor.u32 %v3749_v0, %v3745_v59  ;;  %v3853_v30 = vunpack.c.l.b16 %v3746_v51  ;;  %v3228_v59 = vrot.slane %v7918_v46, 5  ;;  %v3767_v16 = vshll.u32 %v8320_v53, 16 }
 0x2d0   :  { %v4113_v41 = vpack.c.b16 %v4101_v10, %v4100_v31  ;;  %v3771_v31 = vshrl.u32 %v8320_v53, 16  ;;  %v6092_v10 = vld [vmem:[%s9094_s0 + $0xb4] sm:$0xe]  ;;  %v3763_v51 = vrot.slane %v3761_v34, 5 }
 0x2d1   :  { %v3751_v26 = vrot.slane %v3750_v13, 4  ;;  %v6499_v13 = vld [vmem:[#allocation2 + $0x1d8] sm:$0xff] }
 0x2d2   :  { %v8300_v15 = vpop.f32.mrf.mxu3  ;;  %4749 = vmatpush.bf16.msra.mxu0 %v6499_v13 }
 0x2d3   :  { %9128 = vst [vmem:[#allocation11_spill] sm:$0xff] %v8300_v15 }
 0x2d4   :  { %3367 = vmatmul.bf16.gmra.mxu2 %v3291_v54  ;;  %v3222_v54 = vsel %vm6679_vm5, %v3220_v3, %v3221_v11  ;;  %v8302_v11 = vpop.f32.mrf.mxu1  ;;  %v3756_v3 = vsel %vm6675_vm4, %v3751_v26, %v3755_v19  ;;  %v3758_v19 = vshrl.u32 %v6047_v7, 16  ;;  %v4052_v26 = vrot.slane %v8271_v20, 5 }
 0x2d5   :  { %v3279_v8 = vunpack.c.l.b16 %v3222_v54  ;;  %9129 = vst [vmem:[#allocation12_spill] sm:$0xff] %v8302_v11  ;;  %v3854_v28 = vunpack.c.l.b16 %v3756_v3  ;;  %v6491_v54 = vld [vmem:[#allocation2 + $0x198] sm:$0xff]  ;;  %v3769_v3 = vrot.slane %v3767_v16, 5  ;;  %v3229_v20 = vsel %vm6679_vm5, %v3227_v45, %v3228_v59 }
 0x2d6   :  { %4372 = vmatpush.bf16.msrb.mxu2 %v6491_v54  ;;  %v4054_v39 = vrot.slane %v4052_v26, 4 }
 0x2d7   :  { %v3292_v24 = vpack.c.b16 %v3279_v8, %v3278_v33  ;;  %v3865_v0 = vpack.c.b16 %v3854_v28, %v3853_v30  ;;  %v3760_v8 = vrot.slane %v3758_v19, 4  ;;  %v3777_v30 = vshll.u32 %v8328_v57, 16 }
 0x2d8   :  { %3576 = vmatmul.bf16.gmra.mxu0 %v6452_v23  ;;  %v3773_v28 = vrot.slane %v3771_v31, 4 }
 0x2d9   :  { %v3764_v23 = vor.u32 %v3763_v51, %v3760_v8  ;;  %v3779_v54 = vrot.slane %v3777_v30, 5  ;;  %v3232_v30 = vrot.slane %v7934_v42, 5  ;;  %v8367_v42 = vld [vmem:[%s9094_s0 + $0xd0] sm:$0xf] }
 0x2da   :  { %4197 = vmatmul.bf16.gmra.mxu1 %v4113_v41  ;;  %v8335_v33 = vpop.f32.mrf.mxu3  ;;  %v6100_v41 = vrot.slane %v6092_v10, 9  ;;  %v3774_v7 = vor.u32 %v3773_v28, %v3769_v3  ;;  %v3281_v10 = vunpack.c.l.b16 %v3229_v20 }
 0x2db   :  { %9131 = vst [vmem:[#allocation10_spill] sm:$0xff] %v8335_v33  ;;  %v3765_v19 = vrot.slane %v3764_v23, 4  ;;  %v3234_v20 = vrot.slane %v3232_v30, 4  ;;  %v6453_v23 = vld [vmem:[%s9094_s0 + $0xc0] sm:$0xff] }
 0x2dc   :  { %v8322_v46 = vpop.f32.mrf.mxu1  ;;  %v4053_v25 = vsel %vm6679_vm5, %v6100_v41, %v4052_v26  ;;  %v3775_v31 = vrot.slane %v3774_v7, 4  ;;  %v5908_v26 = vld [vmem:[%s9094_s0 + $0xa8] sm:$0xe]  ;;  %v6050_v7 = vld [vmem:[%s9094_s0 + $0xcc] sm:$0xf] }
 0x2dd   :  { %9130 = vst [vmem:[#allocation13_spill] sm:$0xff] %v8322_v46  ;;  %v4102_v34 = vunpack.c.l.b16 %v4053_v25  ;;  %v6506_v25 = vld [vmem:[#allocation2 + $0x210] sm:$0xff] }
 0x2de   :  { %v3780_v59 = vsel %vm6675_vm4, %v3775_v31, %v3779_v54  ;;  %v6490_v54 = vld [vmem:[#allocation2 + $0x190] sm:$0xff]  ;;  %4999 = vmatpush.bf16.msra.mxu3 %v6506_v25 }
 0x2df   :  { %3953 = vmatmul.bf16.gmra.mxu3 %v3865_v0  ;;  %v3226_v0 = vsel %vm6679_vm5, %v5915_v1, %v3225_v29  ;;  %v3770_v29 = vsel %vm6675_vm4, %v3765_v19, %v3769_v3  ;;  %v3856_v8 = vunpack.c.l.b16 %v3780_v59  ;;  %v3235_v3 = vrot.slane %v7941_v61, 5  ;;  %v8375_v31 = vld [vmem:[%s9094_s0 + $0xd4] sm:$0x1]  ;;  %4373 = vmatpush.bf16.msrb.mxu2 %v6490_v54 }
 0x2e0   :  { %v3855_v45 = vunpack.c.l.b16 %v3770_v29  ;;  %v3782_v19 = vshrl.u32 %v6050_v7, 16  ;;  %v4059_v29 = vrot.slane %v8320_v53, 5 }
 0x2e2   :  { %v3866_v41 = vpack.c.b16 %v3856_v8, %v3855_v45  ;;  %v3801_v8 = vshll.u32 %v8375_v31, 16 }
 0x2e4   :  { %3372 = vmatmul.bf16.gmra.mxu2 %v3292_v24  ;;  %v4055_v24 = vrot.slane %v8281_v58, 5  ;;  %v3280_v58 = vunpack.c.l.b16 %v3226_v0  ;;  %v3163_v1 = vpop.f32.mrf.mxu1  ;;  %v5916_v0 = vrot.slane %v5908_v26, 9  ;;  %v3803_v25 = vrot.slane %v3801_v8, 5 }
 0x2e6   :  { %v4056_v13 = vsel %vm6679_vm5, %v4054_v39, %v4055_v24  ;;  %v3293_v28 = vpack.c.b16 %v3281_v10, %v3280_v58  ;;  %v3018_v39 = vpop.f32.mrf.mxu3  ;;  %v3795_v58 = vshrl.u32 %v8367_v42, 16  ;;  %v6093_v10 = vld [vmem:[%s9094_s0 + $0xc0] sm:$0xe] }
 0x2e7   :  { %v4103_v16 = vunpack.c.l.b16 %v4056_v13  ;;  %v8355_v24 = vadd.f32 %v3163_v1, %v3018_v39  ;;  %v6498_v13 = vld [vmem:[#allocation2 + $0x1d0] sm:$0xff]  ;;  %v3784_v1 = vrot.slane %v3782_v19, 4  ;;  %v6101_v26 = vrot.slane %v6093_v10, 9 }
 0x2e8   :  { %3581 = vmatmul.bf16.gmra.mxu0 %v6453_v23  ;;  %v3233_v39 = vsel %vm6679_vm5, %v5916_v0, %v3232_v30  ;;  %v3236_v23 = vsel %vm6679_vm5, %v3234_v20, %v3235_v3 }
 0x2e9   :  { %v4114_v51 = vpack.c.b16 %v4103_v16, %v4102_v34  ;;  %9132 = vst [vmem:[#allocation8_spill] sm:$0xff] %v8355_v24  ;;  %v3785_v34 = vshll.u32 %v6050_v7, 16  ;;  %v3791_v16 = vshll.u32 %v8367_v42, 16  ;;  %4750 = vmatpush.bf16.msra.mxu0 %v6498_v13  ;;  %v4060_v19 = vsel %vm6679_vm5, %v6101_v26, %v4059_v29 }
 0x2ea   :  { %v3282_v10 = vunpack.c.l.b16 %v3233_v39  ;;  %v3283_v30 = vunpack.c.l.b16 %v3236_v23 }
 0x2eb   :  { %4202 = vmatmul.bf16.gmra.mxu1 %v4114_v51  ;;  %v3787_v59 = vrot.slane %v3785_v34, 5  ;;  %v3793_v45 = vrot.slane %v3791_v16, 5  ;;  %v3797_v51 = vrot.slane %v3795_v58, 4  ;;  %v4104_v16 = vunpack.c.l.b16 %v4060_v19  ;;  %v6454_v19 = vld [vmem:[%s9094_s0 + $0xcc] sm:$0xff] }
 0x2ec   :  { %v8369_v61 = vpop.f32.mrf.mxu1 }
 0x2ed   :  { %9133 = vst [vmem:[#allocation9_spill] sm:$0xff] %v8369_v61  ;;  %v3788_v7 = vor.u32 %v3787_v59, %v3784_v1  ;;  %v3798_v54 = vor.u32 %v3797_v51, %v3793_v45  ;;  %v6540_v51 = vld [vmem:[%s9094_s0 + $0xb8] sm:$0xf] }
 0x2ee   :  { %v8388_v53 = vpop.f32.mrf.mxu3  ;;  %v3239_v26 = vrot.slane %v6540_v51, 5 }
 0x2ef   :  { %3958 = vmatmul.bf16.gmra.mxu3 %v3866_v41  ;;  %v4062_v41 = vrot.slane %v8328_v57, 5  ;;  %9134 = vst [vmem:[#allocation14_spill] sm:$0xff] %v8388_v53  ;;  %v3789_v34 = vrot.slane %v3788_v7, 4  ;;  %v3799_v58 = vrot.slane %v3798_v54, 4  ;;  %v6541_v7 = vld [vmem:[%s9094_s0 + $0xbc] sm:$0x1] }
 0x2f0   :  { %v3242_v54 = vrot.slane %v6541_v7, 5 }
 0x2f1   :  { %v3794_v0 = vsel %vm6675_vm4, %v3789_v34, %v3793_v45  ;;  %v3804_v20 = vsel %vm6675_vm4, %v3799_v58, %v3803_v25  ;;  %v3241_v25 = vrot.slane %v3239_v26, 4  ;;  %v8418_v34 = vld [vmem:[%s9094_s0 + $0xdc] sm:$0xf]  ;;  %v6497_v58 = vld [vmem:[#allocation2 + $0x1c8] sm:$0xff] }
 0x2f2   :  { %v3857_v1 = vunpack.c.l.b16 %v3794_v0  ;;  %v3858_v59 = vunpack.c.l.b16 %v3804_v20  ;;  %v3815_v0 = vshll.u32 %v8418_v34, 16  ;;  %v3819_v20 = vshrl.u32 %v8418_v34, 16  ;;  %4751 = vmatpush.bf16.msra.mxu0 %v6497_v58 }
 0x2f4   :  { %3377 = vmatmul.bf16.gmra.mxu2 %v3293_v28  ;;  %v4061_v28 = vrot.slane %v4059_v29, 4  ;;  %v3168_v3 = vpop.f32.mrf.mxu1  ;;  %v5909_v29 = vld [vmem:[%s9094_s0 + $0xb4] sm:$0xe] }
 0x2f5   :  { %v5917_v23 = vrot.slane %v5909_v29, 9 }
 0x2f6   :  { %v4063_v13 = vsel %vm6679_vm5, %v4061_v28, %v4062_v41  ;;  %v3294_v28 = vpack.c.b16 %v3283_v30, %v3282_v10  ;;  %v3867_v41 = vpack.c.b16 %v3858_v59, %v3857_v1  ;;  %v3023_v39 = vpop.f32.mrf.mxu3  ;;  %v6094_v1 = vld [vmem:[%s9094_s0 + $0xcc] sm:$0xe]  ;;  %v4066_v59 = vrot.slane %v8367_v42, 5 }
 0x2f7   :  { %v4105_v57 = vunpack.c.l.b16 %v4063_v13  ;;  %v8404_v45 = vadd.f32 %v3168_v3, %v3023_v39  ;;  %v6053_v13 = vld [vmem:[%s9094_s0 + $0xd8] sm:$0xf]  ;;  %v8424_v3 = vld [vmem:[%s9094_s0 + $0xe0] sm:$0x1]  ;;  %v3821_v39 = vrot.slane %v3819_v20, 4  ;;  %v6102_v7 = vrot.slane %v6094_v1, 9 }
 0x2f8   :  { %v3806_v10 = vshrl.u32 %v6053_v13, 16  ;;  %v3809_v30 = vshll.u32 %v6053_v13, 16  ;;  %3586 = vmatmul.bf16.gmra.mxu0 %v6454_v19  ;;  %v4068_v19 = vrot.slane %v4066_v59, 4  ;;  %v4069_v13 = vrot.slane %v8375_v31, 5 }
 0x2f9   :  { %v4115_v8 = vpack.c.b16 %v4105_v57, %v4104_v16  ;;  %9135 = vst [vmem:[#allocation15_spill] sm:$0xff] %v8404_v45  ;;  %v6489_v16 = vld [vmem:[#allocation2 + $0x188] sm:$0xff]  ;;  %v3240_v45 = vsel %vm6679_vm5, %v5917_v23, %v3239_v26  ;;  %v3243_v42 = vsel %vm6679_vm5, %v3241_v25, %v3242_v54 }
 0x2fa   :  { %v6505_v57 = vld [vmem:[#allocation2 + $0x208] sm:$0xff]  ;;  %4374 = vmatpush.bf16.msrb.mxu2 %v6489_v16  ;;  %v3808_v29 = vrot.slane %v3806_v10, 4  ;;  %v3811_v51 = vrot.slane %v3809_v30, 5  ;;  %v4070_v58 = vsel %vm6679_vm5, %v4068_v19, %v4069_v13  ;;  %v3284_v61 = vunpack.c.l.b16 %v3240_v45  ;;  %v6542_v19 = vld [vmem:[%s9094_s0 + $0xc4] sm:$0xf] }
 0x2fb   :  { %4207 = vmatmul.bf16.gmra.mxu1 %v4115_v8  ;;  %5000 = vmatpush.bf16.msra.mxu3 %v6505_v57  ;;  %v4107_v31 = vunpack.c.l.b16 %v4070_v58  ;;  %v3285_v26 = vunpack.c.l.b16 %v3243_v42  ;;  %v3246_v13 = vrot.slane %v6542_v19, 5  ;;  %v6504_v42 = vld [vmem:[#allocation2 + $0x200] sm:$0xff] }
 0x2fc   :  { %v8431_v8 = vpop.f32.mrf.mxu1  ;;  %v3812_v57 = vor.u32 %v3811_v51, %v3808_v29 }
 0x2fd   :  { %9136 = vst [vmem:[#allocation16_spill] sm:$0xff] %v8431_v8 }
 0x2fe   :  { %v8439_v16 = vpop.f32.mrf.mxu3  ;;  %v3813_v20 = vrot.slane %v3812_v57, 4  ;;  %v6496_v57 = vld [vmem:[#allocation2 + $0x1c0] sm:$0xff] }
 0x2ff   :  { %3963 = vmatmul.bf16.gmra.mxu3 %v3867_v41  ;;  %v3825_v41 = vshll.u32 %v8424_v3, 16  ;;  %9137 = vst [vmem:[#allocation17_spill] sm:$0xff] %v8439_v16  ;;  %4752 = vmatpush.bf16.msra.mxu0 %v6496_v57 }
 0x300   :  { %5001 = vmatpush.bf16.msra.mxu3 %v6504_v42 }
 0x301   :  { %v3827_v30 = vrot.slane %v3825_v41, 5  ;;  %v3295_v41 = vpack.c.b16 %v3285_v26, %v3284_v61  ;;  %v6455_v61 = vld [vmem:[%s9094_s0 + $0xd8] sm:$0xff] }
 0x304   :  { %3382 = vmatmul.bf16.gmra.mxu2 %v3294_v28  ;;  %v3817_v28 = vrot.slane %v3815_v0, 5  ;;  %v4067_v0 = vsel %vm6679_vm5, %v6102_v7, %v4066_v59  ;;  %v3173_v7 = vpop.f32.mrf.mxu1  ;;  %v9150_v5 = vld [vmem:[#allocation16_spill] sm:$0xff] }
 0x305   :  { %v4106_v1 = vunpack.c.l.b16 %v4067_v0  ;;  %v6543_v0 = vld [vmem:[%s9094_s0 + $0xc8] sm:$0x1] }
 0x306   :  { %v3822_v10 = vor.u32 %v3821_v39, %v3817_v28  ;;  %v3818_v23 = vsel %vm6675_vm4, %v3813_v20, %v3817_v28  ;;  %v3028_v39 = vpop.f32.mrf.mxu3  ;;  %v5910_v28 = vld [vmem:[%s9094_s0 + $0xc0] sm:$0xe]  ;;  %v3249_v58 = vrot.slane %v6543_v0, 5  ;;  %v6095_v0 = vld [vmem:[%s9094_s0 + $0xd8] sm:$0xe] }
 0x307   :  { %v3859_v25 = vunpack.c.l.b16 %v3818_v23  ;;  %v4116_v51 = vpack.c.b16 %v4107_v31, %v4106_v1  ;;  %v8452_v45 = vadd.f32 %v3173_v7, %v3028_v39  ;;  %v6544_v23 = vld [vmem:[%s9094_s0 + $0xd0] sm:$0xf] }
 0x308   :  { %v3823_v8 = vrot.slane %v3822_v10, 4  ;;  %v5918_v10 = vrot.slane %v5910_v28, 9  ;;  %3591 = vmatmul.bf16.gmra.mxu0 %v6455_v61  ;;  %v6216_v28 = vld [vmem:[%s9094_s0 + $0x90] sm:$0xf]  ;;  %v4073_v61 = vrot.slane %v8418_v34, 5  ;;  %v6103_v34 = vrot.slane %v6095_v0, 9 }
 0x309   :  { %9138 = vst [vmem:[#allocation18_spill] sm:$0xff] %v8452_v45  ;;  %v4458_v42 = vshrl.u32 %v6216_v28, 16  ;;  %v4461_v57 = vshll.u32 %v6216_v28, 16 }
 0x30a   :  { %v3828_v54 = vsel %vm6675_vm4, %v3823_v8, %v3827_v30  ;;  %v6488_v8 = vld [vmem:[#allocation2 + $0x180] sm:$0xff]  ;;  %v3248_v30 = vrot.slane %v3246_v13, 4  ;;  %v3247_v20 = vsel %vm6679_vm5, %v5918_v10, %v3246_v13  ;;  %v6217_v13 = vld [vmem:[%s9094_s0 + $0x94] sm:$0xf] }
 0x30b   :  { %v3860_v29 = vunpack.c.l.b16 %v3828_v54  ;;  %4212 = vmatmul.bf16.gmra.mxu1 %v4116_v51  ;;  %4375 = vmatpush.bf16.msrb.mxu2 %v6488_v8  ;;  %v3286_v31 = vunpack.c.l.b16 %v3247_v20  ;;  %v3253_v54 = vrot.slane %v6544_v23, 5  ;;  %v4844_v8 = vrot.slane %v6217_v13, 5  ;;  %v6272_v20 = vld [vmem:[%s9094_s0 + $0x90] sm:$0xe] }
 0x30c   :  { %v3250_v1 = vsel %vm6679_vm5, %v3248_v30, %v3249_v58  ;;  %v6218_v58 = vld [vmem:[%s9094_s0 + $0x98] sm:$0x1]  ;;  %v6280_v23 = vrot.slane %v6272_v20, 9 }
 0x30d   :  { %v3868_v59 = vpack.c.b16 %v3860_v29, %v3859_v25  ;;  %v3287_v26 = vunpack.c.l.b16 %v3250_v1  ;;  %v5911_v25 = vld [vmem:[%s9094_s0 + $0xcc] sm:$0xe]  ;;  %v4477_v16 = vshll.u32 %v6218_v58, 16 }
 0x30e   :  { %v5919_v51 = vrot.slane %v5911_v25, 9  ;;  %v8496_v1 = vpop.f32.mrf.mxu3  ;;  %v4847_v25 = vrot.slane %v6218_v58, 5  ;;  %v6219_v58 = vld [vmem:[%s9094_s0 + $0x9c] sm:$0xf] }
 0x30f   :  { %3968 = vmatmul.bf16.gmra.mxu3 %v3868_v59  ;;  %v3296_v29 = vpack.c.b16 %v3287_v26, %v3286_v31  ;;  %v6545_v59 = vld [vmem:[%s9094_s0 + $0xd4] sm:$0x1]  ;;  %9139 = vst [vmem:[#allocation19_spill] sm:$0xff] %v8496_v1  ;;  %v4075_v31 = vrot.slane %v4073_v61, 4  ;;  %v4076_v26 = vrot.slane %v8424_v3, 5 }
 0x310   :  { %v3256_v39 = vrot.slane %v6545_v59, 5  ;;  %v3254_v7 = vsel %vm6679_vm5, %v5919_v51, %v3253_v54  ;;  %v4463_v51 = vrot.slane %v4461_v57, 5  ;;  %v4471_v57 = vshrl.u32 %v6217_v13, 16 }
 0x311   :  { %v3288_v10 = vunpack.c.l.b16 %v3254_v7  ;;  %v4077_v59 = vsel %vm6679_vm5, %v4075_v31, %v4076_v26  ;;  %v4467_v7 = vshll.u32 %v6217_v13, 16 }
 0x312   :  { %v4109_v28 = vunpack.c.l.b16 %v4077_v59  ;;  %v4473_v31 = vrot.slane %v4471_v57, 4  ;;  %v6221_v59 = vld [vmem:[%s9094_s0 + $0xa4] sm:$0x1] }
 0x314   :  { %3387 = vmatmul.bf16.gmra.mxu2 %v3295_v41  ;;  %v3255_v41 = vrot.slane %v3253_v54, 4  ;;  %v4846_v54 = vrot.slane %v4844_v8, 4 }
 0x316   :  { %v3257_v19 = vsel %vm6679_vm5, %v3255_v41, %v3256_v39  ;;  %v4074_v41 = vsel %vm6679_vm5, %v6103_v34, %v4073_v61  ;;  %v4845_v39 = vsel %vm6679_vm5, %v6280_v23, %v4844_v8  ;;  %v4848_v3 = vsel %vm6679_vm5, %v4846_v54, %v4847_v25  ;;  %v8507_v8 = vpop.f32.mrf.mxu0 }
 0x317   :  { %v3289_v30 = vunpack.c.l.b16 %v3257_v19  ;;  %v4108_v19 = vunpack.c.l.b16 %v4074_v41  ;;  %v4914_v0 = vunpack.c.l.b16 %v4845_v39  ;;  %v4915_v20 = vunpack.c.l.b16 %v4848_v3  ;;  %v6273_v39 = vld [vmem:[%s9094_s0 + $0x9c] sm:$0xe] }
 0x318   :  { %v4479_v54 = vrot.slane %v4477_v16, 5  ;;  %v4485_v16 = vshll.u32 %v6219_v58, 16 }
 0x319   :  { %v4117_v45 = vpack.c.b16 %v4109_v28, %v4108_v19  ;;  %v3297_v61 = vpack.c.b16 %v3289_v30, %v3288_v10  ;;  %v4930_v34 = vpack.c.b16 %v4915_v20, %v4914_v0  ;;  %v6281_v28 = vrot.slane %v6273_v39, 9  ;;  %v6480_v39 = vld [vmem:[%s9094_s0 + $0x90] sm:$0xff] }
 0x31a   :  { %v4854_v0 = vrot.slane %v6221_v59, 5  ;;  %v4487_v57 = vrot.slane %v4485_v16, 5 }
 0x31b   :  { %4217 = vmatmul.bf16.gmra.mxu1 %v4117_v45  ;;  %v6220_v45 = vld [vmem:[%s9094_s0 + $0xa0] sm:$0xf] }
 0x31e   :  { %v8527_v19 = vpop.f32.mrf.mxu0 }
 0x31f   :  { %5002 = vmatmul.bf16.vlgmr.msra.gmra.mxu3 %v4930_v34 }
 0x321   :  { %v8511_v25 = vpop.f32.mrf.mxu3 }
 0x324   :  { %3392 = vmatmul.bf16.gmra.mxu2 %v3296_v29  ;;  %v4460_v29 = vrot.slane %v4458_v42, 4  ;;  %v4469_v42 = vrot.slane %v4467_v7, 5  ;;  %v4495_v7 = vshrl.u32 %v6220_v45, 16 }
 0x326   :  { %v4464_v1 = vor.u32 %v4463_v51, %v4460_v29  ;;  %v4474_v23 = vor.u32 %v4473_v31, %v4469_v42  ;;  %v4491_v51 = vshll.u32 %v6220_v45, 16  ;;  %v4497_v34 = vrot.slane %v4495_v7, 4 }
 0x328   :  { %v4465_v53 = vrot.slane %v4464_v1, 4  ;;  %v4475_v29 = vrot.slane %v4474_v23, 4  ;;  %v4482_v1 = vshrl.u32 %v6219_v58, 16 }
 0x329   :  { %v8531_v31 = vpop.f32.mrf.mxu3 }
 0x32a   :  { %v4470_v26 = vsel %vm6675_vm4, %v4465_v53, %v4469_v42  ;;  %v4480_v10 = vsel %vm6675_vm4, %v4475_v29, %v4479_v54  ;;  %v4851_v53 = vrot.slane %v6220_v45, 5  ;;  %v4484_v20 = vrot.slane %v4482_v1, 4  ;;  %v8529_v42 = vpop.f32.mrf.mxu1 }
 0x32b   :  { %v4665_v13 = vunpack.c.l.b16 %v4470_v26  ;;  %v4666_v30 = vunpack.c.l.b16 %v4480_v10  ;;  %9140 = vst [vmem:[#allocation20_spill] sm:$0xff] %v8529_v42  ;;  %v4501_v54 = vshll.u32 %v6221_v59, 16 }
 0x32c   :  { %v4853_v3 = vrot.slane %v4851_v53, 4  ;;  %v4852_v26 = vsel %vm6679_vm5, %v6281_v28, %v4851_v53  ;;  %v4488_v10 = vor.u32 %v4487_v57, %v4484_v20  ;;  %v8546_v28 = vpop.f32.mrf.mxu0 }
 0x32d   :  { %v4681_v41 = vpack.c.b16 %v4666_v30, %v4665_v13  ;;  %v4916_v29 = vunpack.c.l.b16 %v4852_v26  ;;  %v4503_v45 = vrot.slane %v4501_v54, 5 }
 0x32e   :  { %v4855_v23 = vsel %vm6679_vm5, %v4853_v3, %v4854_v0 }
 0x32f   :  { %4753 = vmatmul.bf16.vlgmr.msra.gmra.mxu0 %v4681_v41  ;;  %v4917_v13 = vunpack.c.l.b16 %v4855_v23  ;;  %v4489_v41 = vrot.slane %v4488_v10, 4  ;;  %v6222_v23 = vld [vmem:[%s9094_s0 + $0xa8] sm:$0xf] }
 0x330   :  { %v4509_v10 = vshll.u32 %v6222_v23, 16 }
 0x331   :  { %v4931_v1 = vpack.c.b16 %v4917_v13, %v4916_v29  ;;  %v8549_v57 = vpop.f32.mrf.mxu3  ;;  %v4506_v13 = vshrl.u32 %v6222_v23, 16 }
 0x332   :  { %v4183_v3 = vpop.f32.mrf.mxu1 }
 0x333   :  { %5007 = vmatmul.bf16.gmra.mxu3 %v4931_v1 }
 0x334   :  { %3397 = vmatmul.bf16.gmra.mxu2 %v3297_v61  ;;  %v4493_v61 = vrot.slane %v4491_v51, 5 }
 0x336   :  { %v4498_v30 = vor.u32 %v4497_v34, %v4493_v61  ;;  %v4494_v53 = vsel %vm6675_vm4, %v4489_v41, %v4493_v61  ;;  %v6223_v61 = vld [vmem:[%s9094_s0 + $0xac] sm:$0xf] }
 0x337   :  { %v4667_v0 = vunpack.c.l.b16 %v4494_v53  ;;  %v4858_v29 = vrot.slane %v6223_v61, 5  ;;  %v4519_v1 = vshrl.u32 %v6223_v61, 16 }
 0x338   :  { %v4499_v16 = vrot.slane %v4498_v30, 4  ;;  %v6224_v30 = vld [vmem:[%s9094_s0 + $0xb0] sm:$0x1] }
 0x339   :  { %v4861_v53 = vrot.slane %v6224_v30, 5  ;;  %v8569_v23 = vpop.f32.mrf.mxu3 }
 0x33a   :  { %v4504_v59 = vsel %vm6675_vm4, %v4499_v16, %v4503_v45  ;;  %v6274_v45 = vld [vmem:[%s9094_s0 + $0xa8] sm:$0xe] }
 0x33b   :  { %v4668_v20 = vunpack.c.l.b16 %v4504_v59 }
 0x33d   :  { %v4682_v26 = vpack.c.b16 %v4668_v20, %v4667_v0  ;;  %v4508_v0 = vrot.slane %v4506_v13, 4  ;;  %v4511_v20 = vrot.slane %v4509_v10, 5  ;;  %v4525_v10 = vshll.u32 %v6224_v30, 16 }
 0x33f   :  { %v2583_v58 = vpop.f32.mrf.mxu2  ;;  %4758 = vmatmul.bf16.gmra.mxu0 %v4682_v26  ;;  %v4512_v33 = vor.u32 %v4511_v20, %v4508_v0  ;;  %v3141_v26 = vadd.f32 %v8126_v12, %v8124_v32 }
 0x340   :  { %v2586_v51 = vmul.f32 0.00024414063, %v2583_v58  ;;  %v4515_v58 = vshll.u32 %v6223_v61, 16 }
 0x342   :  { %v8544_v7 = vadd.f32 1e-05, %v2586_v51  ;;  %v8565_v51 = vpop.f32.mrf.mxu0  ;;  %v8608_v0 = vpop.f32.mrf.mxu3 }
 0x344   :  { %6536 = vrsqrt.f32 %v8544_v7  ;;  %4376 = vmatmul.bf16.vlgmr.msrb.gmra.mxu2 %v6480_v39  ;;  %v6282_v39 = vrot.slane %v6274_v45, 9  ;;  %v4185_v45 = vpop.f32.mrf.mxu1  ;;  %vm2595_vm7 = vweird.f32 %v8544_v7 }
 0x346   :  { %v4859_v61 = vsel %vm6679_vm5, %v6282_v39, %v4858_v29 }
 0x347   :  { %v3363_v34 = vpop.f32.mrf.mxu2  ;;  %v4918_v24 = vunpack.c.l.b16 %v4859_v61  ;;  %v6225_v61 = vld [vmem:[%s9094_s0 + $0xb4] sm:$0xf] }
 0x348   :  { %v3403_v54 = vadd.f32 %v3363_v34, %v8083_v35  ;;  %v4860_v35 = vrot.slane %v4858_v29, 4  ;;  %v4513_v29 = vrot.slane %v4512_v33, 4  ;;  %v8596_v33 = vld [vmem:[%s9094_s0 + $0xbc] sm:$0x1] }
 0x349   :  { %v4868_v30 = vrot.slane %v8596_v33, 5 }
 0x34a   :  { %v6537_v41 = vpop.eup %6536  ;;  %v3597_v16 = vadd.f32 %v8507_v8, %v3403_v54  ;;  %v4862_v8 = vsel %vm6679_vm5, %v4860_v35, %v4861_v53  ;;  %v4517_v54 = vrot.slane %v4515_v58, 5  ;;  %v6481_v58 = vld [vmem:[%s9094_s0 + $0x9c] sm:$0xff]  ;;  %v4527_v53 = vrot.slane %v4525_v10, 5 }
 0x34b   :  { %v2590_v59 = vmul.f32 %v6537_v41, %v8544_v7  ;;  %v4919_v46 = vunpack.c.l.b16 %v4862_v8  ;;  %vm2596_vm6 = vweird.f32 %v6537_v41 }
 0x34c   :  { %v3974_v34 = vadd.f32 %v8511_v25, %v3597_v16  ;;  %v4521_v25 = vrot.slane %v4519_v1, 4  ;;  %v4518_v32 = vsel %vm6675_vm4, %v4513_v29, %v4517_v54  ;;  %vm2597_vm8 = vmor %vm2595_vm7, %vm2596_vm6 }
 0x34d   :  { %v2591_v42 = vmul.f32 %v6537_v41, %v2590_v59  ;;  %v4932_v15 = vpack.c.b16 %v4919_v46, %v4918_v24  ;;  %v2587_v24 = vld [vmem:[%s9097_s3] sm:$0x1] }
 0x34e   :  { %v8577_v13 = vadd.f32 %v4183_v3, %v3974_v34  ;;  %v4522_v35 = vor.u32 %v4521_v25, %v4517_v54  ;;  %v4530_v25 = vshrl.u32 %v6225_v61, 16 }
 0x34f   :  { %v2592_v16 = vmul.f32 0.5, %v2591_v42  ;;  %v3365_v11 = vpop.f32.mrf.mxu2  ;;  %5012 = vmatmul.bf16.gmra.mxu3 %v4932_v15  ;;  %v8586_v42 = vpop.f32.mrf.mxu0  ;;  %v6275_v15 = vld [vmem:[%s9094_s0 + $0xb4] sm:$0xe] }
 0x350   :  { %v3404_v39 = vadd.f32 %v3365_v11, %v3141_v26  ;;  %v4523_v46 = vrot.slane %v4522_v35, 4  ;;  %v8591_v11 = vld [vmem:[%s9094_s0 + $0xb8] sm:$0xf]  ;;  %v6283_v34 = vrot.slane %v6275_v15, 9  ;;  %v8633_v15 = vld [vmem:[%s9098_s4] ss:$0 sm:$0xff] }
 0x351   :  { %v2593_v59 = vsub.f32 1.5, %v2592_v16  ;;  %v4865_v3 = vrot.slane %v8591_v11, 5 }
 0x352   :  { %v3598_v12 = vadd.f32 %v8527_v19, %v3404_v39  ;;  %v4669_v19 = vunpack.c.l.b16 %v4518_v32  ;;  %v4528_v20 = vsel %vm6675_vm4, %v4523_v46, %v4527_v53  ;;  %v8619_v39 = vpop.f32.mrf.mxu1  ;;  %v4533_v53 = vshll.u32 %v6225_v61, 16 }
 0x353   :  { %v2594_v7 = vmul.f32 %v6537_v41, %v2593_v59  ;;  %v4670_v54 = vunpack.c.l.b16 %v4528_v20  ;;  %v4867_v26 = vrot.slane %v4865_v3, 4  ;;  %v4539_v59 = vshll.u32 %v8591_v11, 16  ;;  %v8644_v20 = vpop.f32.mrf.mxu3 }
 0x354   :  { %4381 = vmatmul.bf16.gmra.mxu2 %v6481_v58  ;;  %v3975_v1 = vadd.f32 %v8531_v31, %v3598_v12  ;;  %v4866_v31 = vsel %vm6679_vm5, %v6283_v34, %v4865_v3  ;;  %v4532_v46 = vrot.slane %v4530_v25, 4  ;;  %v4549_v34 = vshll.u32 %v8596_v33, 16 }
 0x355   :  { %v2598_v8 = vsel %vm2597_vm8, %v6537_v41, %v2594_v7  ;;  %v4683_v58 = vpack.c.b16 %v4670_v54, %v4669_v19  ;;  %v4869_v35 = vsel %vm6679_vm5, %v4867_v26, %v4868_v30  ;;  %v4920_v12 = vunpack.c.l.b16 %v4866_v31 }
 0x356   :  { %v2599_v10 = vmul.f32 %v2598_v8, %v2587_v24  ;;  %v8615_v16 = vadd.f32 %v4185_v45, %v3975_v1  ;;  %v3146_v45 = vadd.f32 %v8181_v14, %v8179_v60  ;;  %v4921_v30 = vunpack.c.l.b16 %v4869_v35 }
 0x357   :  { %v3368_v29 = vpop.f32.mrf.mxu2  ;;  %v8635_v3 = vpop.f32.mrf.mxu0  ;;  %4763 = vmatmul.bf16.gmra.mxu0 %v4683_v58  ;;  %v4535_v60 = vrot.slane %v4533_v53, 5  ;;  %v8638_v14 = vrot.slane %v4539_v59, 5 }
 0x358   :  { %v2601_v41 = vperm.slane %v2599_v10, 0  ;;  %v3405_v32 = vadd.f32 %v3368_v29, %v8161_v9  ;;  %v4933_v53 = vpack.c.b16 %v4921_v30, %v4920_v12 }
 0x35a   :  { %v2603_v24 = vmul.f32 %v2601_v41, %v8009_v2  ;;  %v2604_v7 = vmul.f32 %v2601_v41, %v8013_v40  ;;  %v2605_v19 = vmul.f32 %v2601_v41, %v8017_v27  ;;  %v2606_v9 = vmul.f32 %v2601_v41, %v8025_v44 }
 0x35b   :  { %v4543_v2 = vshrl.u32 %v8591_v11, 16  ;;  %v2607_v40 = vmul.f32 %v2601_v41, %v8029_v22  ;;  %v2608_v27 = vmul.f32 %v2601_v41, %v8035_v49  ;;  %v2609_v1 = vmul.f32 %v2601_v41, %v8050_v48 }
 0x35c   :  { %v2610_v61 = vmul.f32 %v2601_v41, %v8057_v62  ;;  %v2611_v44 = vmul.f32 %v2601_v41, %v8069_v43  ;;  %v2612_v8 = vmul.f32 %v2601_v41, %v8075_v55  ;;  %v2613_v54 = vmul.f32 %v2601_v41, %v8087_v52 }
 0x35d   :  { %v2614_v11 = vmul.f32 %v2601_v41, %v8093_v38  ;;  %v2623_v22 = vadd.f32 %v8633_v15, %v2603_v24  ;;  %v2624_v49 = vadd.f32 %v8633_v15, %v2604_v7  ;;  %v2625_v48 = vadd.f32 %v8633_v15, %v2605_v19  ;;  %v6229_v24 = vld [vmem:[%s9094_s0 + $0xc4] sm:$0xf]  ;;  %v8681_v7 = vld [vmem:[%s9094_s0 + $0xc8] sm:$0x1] }
 0x35e   :  { %v2615_v26 = vmul.f32 %v2601_v41, %v8099_v36  ;;  %v2616_v33 = vmul.f32 %v2601_v41, %v8105_v37  ;;  %v8658_v62 = vmul.f32 %v2601_v41, %v8109_v21  ;;  %v2626_v43 = vadd.f32 %v8633_v15, %v2606_v9  ;;  %v6482_v36 = vld [vmem:[%s9094_s0 + $0xa8] sm:$0xff] }
 0x35f   :  { %v3370_v55 = vpop.f32.mrf.mxu2  ;;  %v2618_v52 = vmul.f32 %v2601_v41, %v8141_v6  ;;  %v2627_v38 = vadd.f32 %v8633_v15, %v2607_v40  ;;  %v2628_v25 = vadd.f32 %v8633_v15, %v2608_v27  ;;  %v2629_v10 = vadd.f32 %v8633_v15, %v2609_v1  ;;  %2639 = vst [vmem:[#allocation5] sm:$0xff] %v2623_v22  ;;  %v4190_v6 = vpop.f32.mrf.mxu1 }
 0x360   :  { %v2630_v37 = vadd.f32 %v8633_v15, %v2610_v61  ;;  %v2631_v21 = vadd.f32 %v8633_v15, %v2611_v44  ;;  %v2632_v31 = vadd.f32 %v8633_v15, %v2612_v8  ;;  %v2633_v29 = vadd.f32 %v8633_v15, %v2613_v54  ;;  %2640 = vst [vmem:[#allocation5 + $0x8] sm:$0xff] %v2624_v49  ;;  %v8673_v59 = vpop.f32.mrf.mxu0 }
 0x361   :  { %2641 = vst [vmem:[#allocation5 + $0x10] sm:$0xff] %v2625_v48  ;;  %v3599_v58 = vadd.f32 %v8546_v28, %v3405_v32  ;;  %v3406_v35 = vadd.f32 %v3370_v55, %v3146_v45  ;;  %v4536_v41 = vor.u32 %v4535_v60, %v4532_v46  ;;  %v2634_v19 = vadd.f32 %v8633_v15, %v2614_v11  ;;  %v6276_v28 = vld [vmem:[%s9094_s0 + $0xc0] sm:$0xe]  ;;  %v8689_v46 = vpop.f32.mrf.mxu3 }
 0x362   :  { %2642 = vst [vmem:[#allocation5 + $0x18] sm:$0xff] %v2626_v43  ;;  %v4545_v9 = vrot.slane %v4543_v2, 4  ;;  %v4551_v40 = vrot.slane %v4549_v34, 5  ;;  %v4872_v32 = vrot.slane %v6229_v24, 5  ;;  %5017 = vmatmul.bf16.gmra.mxu3 %v4933_v53  ;;  %v6284_v60 = vrot.slane %v6276_v28, 9 }
 0x363   :  { %2643 = vst [vmem:[#allocation5 + $0x20] sm:$0xff] %v2627_v38  ;;  %v3976_v45 = vadd.f32 %v8549_v57, %v3599_v58  ;;  %v3600_v12 = vadd.f32 %v8565_v51, %v3406_v35  ;;  %v4537_v30 = vrot.slane %v4536_v41, 4  ;;  %v6228_v2 = vld [vmem:[%s9094_s0 + $0xc0] sm:$0xf]  ;;  %v4875_v34 = vrot.slane %v8681_v7, 5 }
 0x364   :  { %4386 = vmatmul.bf16.gmra.mxu2 %v6482_v36  ;;  %2644 = vst [vmem:[#allocation5 + $0x28] sm:$0xff] %v2628_v25  ;;  %v4546_v27 = vor.u32 %v4545_v9, %v8638_v14  ;;  %v4874_v1 = vrot.slane %v4872_v32, 4  ;;  %v4554_v61 = vshrl.u32 %v6228_v2, 16  ;;  %v2635_v57 = vadd.f32 %v8633_v15, %v2615_v26 }
 0x365   :  { %2645 = vst [vmem:[#allocation5 + $0x30] sm:$0xff] %v2629_v10  ;;  %v8698_v51 = vadd.f32 %v8619_v39, %v3976_v45  ;;  %v3977_v44 = vadd.f32 %v8569_v23, %v3600_v12  ;;  %v4542_v8 = vsel %vm6675_vm4, %v4537_v30, %v8638_v14  ;;  %v2636_v54 = vadd.f32 %v8633_v15, %v2616_v33 }
 0x366   :  { %2646 = vst [vmem:[#allocation5 + $0x38] sm:$0xff] %v2630_v37  ;;  %v4547_v22 = vrot.slane %v4546_v27, 4  ;;  %v4671_v49 = vunpack.c.l.b16 %v4542_v8  ;;  %v4873_v48 = vsel %vm6679_vm5, %v6284_v60, %v4872_v32  ;;  %v4876_v23 = vsel %vm6679_vm5, %v4874_v1, %v4875_v34  ;;  %v6483_v32 = vld [vmem:[%s9094_s0 + $0xb4] sm:$0xff]  ;;  %v6277_v60 = vld [vmem:[%s9094_s0 + $0xcc] sm:$0xe] }
 0x367   :  { %v3373_v11 = vpop.f32.mrf.mxu2  ;;  %2647 = vst [vmem:[#allocation5 + $0x40] sm:$0xff] %v2631_v21  ;;  %v8707_v26 = vadd.f32 %v4190_v6, %v3977_v44  ;;  %v4556_v43 = vrot.slane %v4554_v61, 4  ;;  %v4557_v33 = vshll.u32 %v6228_v2, 16  ;;  %v4563_v55 = vshll.u32 %v6229_v24, 16  ;;  %v4193_v21 = vpop.f32.mrf.mxu1 }
 0x368   :  { %v3407_v39 = vadd.f32 %v3373_v11, %v8208_v63  ;;  %2648 = vst [vmem:[#allocation5 + $0x48] sm:$0xff] %v2632_v31  ;;  %v4552_v14 = vsel %vm6675_vm4, %v4547_v22, %v4551_v40  ;;  %v4567_v38 = vshrl.u32 %v6229_v24, 16  ;;  %v2637_v25 = vadd.f32 %v8633_v15, %v8658_v62  ;;  %v8718_v37 = vpop.f32.mrf.mxu0 }
 0x369   :  { %v2638_v10 = vadd.f32 %v8633_v15, %v2618_v52  ;;  %2649 = vst [vmem:[#allocation5 + $0x50] sm:$0xff] %v2633_v29  ;;  %v4672_v63 = vunpack.c.l.b16 %v4552_v14  ;;  %v4559_v31 = vrot.slane %v4557_v33, 5  ;;  %v4565_v6 = vrot.slane %v4563_v55, 5  ;;  %v8722_v62 = vpop.f32.mrf.mxu3 }
 0x36a   :  { %v3601_v36 = vadd.f32 %v8586_v42, %v3407_v39  ;;  %2650 = vst [vmem:[#allocation5 + $0x58] sm:$0xff] %v2634_v19  ;;  %v4569_v58 = vrot.slane %v4567_v38, 4  ;;  %v4573_v35 = vshll.u32 %v8681_v7, 16  ;;  %v4922_v15 = vunpack.c.l.b16 %v4873_v48 }
 0x36b   :  { %2651 = vst [vmem:[#allocation5 + $0x60] sm:$0xff] %v2635_v57  ;;  %v4684_v41 = vpack.c.b16 %v4672_v63, %v4671_v49  ;;  %v4923_v52 = vunpack.c.l.b16 %v4876_v23  ;;  %v4560_v42 = vor.u32 %v4559_v31, %v4556_v43  ;;  %v3151_v24 = vadd.f32 %v8228_v50, %v8226_v17  ;;  %v6232_v17 = vld [vmem:[%s9094_s0 + $0xd0] sm:$0xf]  ;;  %v6233_v50 = vld [vmem:[%s9094_s0 + $0xd4] sm:$0x1] }
 0x36c   :  { %v3978_v53 = vadd.f32 %v8608_v0, %v3601_v36  ;;  %2652 = vst [vmem:[#allocation5 + $0x68] sm:$0xff] %v2636_v54  ;;  %v4570_v29 = vor.u32 %v4569_v58, %v4565_v6  ;;  %v4575_v0 = vrot.slane %v4573_v35, 5  ;;  %v4879_v27 = vrot.slane %v6232_v17, 5  ;;  %v6231_v57 = vld [vmem:[%s9094_s0 + $0xcc] sm:$0xf] }
 0x36d   :  { %2653 = vst [vmem:[#allocation5 + $0x70] sm:$0xff] %v2637_v25  ;;  %4768 = vmatmul.bf16.gmra.mxu0 %v4684_v41  ;;  %v4561_v9 = vrot.slane %v4560_v42, 4  ;;  %v4934_v45 = vpack.c.b16 %v4923_v52, %v4922_v15  ;;  %v6285_v61 = vrot.slane %v6277_v60, 9  ;;  %v4587_v44 = vshll.u32 %v6232_v17, 16 }
 0x36e   :  { %v8726_v19 = vadd.f32 %v4193_v21, %v3978_v53  ;;  %2654 = vst [vmem:[#allocation5 + $0x78] sm:$0xff] %v2638_v10  ;;  %v4571_v40 = vrot.slane %v4570_v29, 4  ;;  %v4591_v8 = vshrl.u32 %v6232_v17, 16  ;;  %v4881_v54 = vrot.slane %v4879_v27, 4  ;;  %v6234_v17 = vld [vmem:[%s9094_s0 + $0xd8] sm:$0xf] }
 0x36f   :  { %v3375_v7 = vpop.f32.mrf.mxu2  ;;  %v4566_v2 = vsel %vm6675_vm4, %v4561_v9, %v4565_v6  ;;  %v4882_v11 = vrot.slane %v6233_v50, 5  ;;  %v4578_v22 = vshrl.u32 %v6231_v57, 16  ;;  %v4581_v49 = vshll.u32 %v6231_v57, 16  ;;  %v9141_v57 = vld [vmem:[#allocation11_spill] sm:$0xff] }
 0x370   :  { %v3408_v28 = vadd.f32 %v3375_v7, %v3151_v24  ;;  %v8732_v30 = vpop.f32.mrf.mxu0  ;;  %v4673_v48 = vunpack.c.l.b16 %v4566_v2  ;;  %v4589_v14 = vrot.slane %v4587_v44, 5  ;;  %v4593_v33 = vrot.slane %v4591_v8, 4  ;;  %v6484_v24 = vld [vmem:[%s9094_s0 + $0xc0] sm:$0xff] }
 0x371   :  { %v8750_v34 = vpop.f32.mrf.mxu3  ;;  %v4580_v43 = vrot.slane %v4578_v22, 4  ;;  %v4880_v38 = vsel %vm6679_vm5, %v6285_v61, %v4879_v27  ;;  %v4883_v25 = vsel %vm6679_vm5, %v4881_v54, %v4882_v11  ;;  %v4597_v6 = vshll.u32 %v6233_v50, 16  ;;  %v9142_v44 = vld [vmem:[#allocation12_spill] sm:$0xff] }
 0x372   :  { %v3602_v12 = vadd.f32 %v8635_v3, %v3408_v28  ;;  %v4576_v3 = vsel %vm6675_vm4, %v4571_v40, %v4575_v0  ;;  %5022 = vmatmul.bf16.gmra.mxu3 %v4934_v45  ;;  %v4594_v31 = vor.u32 %v4593_v33, %v4589_v14  ;;  %v4925_v53 = vunpack.c.l.b16 %v4883_v25  ;;  %v6235_v40 = vld [vmem:[%s9094_s0 + $0xdc] sm:$0xf] }
 0x373   :  { %v4674_v39 = vunpack.c.l.b16 %v4576_v3  ;;  %v3156_v41 = vadd.f32 %v8275_v56, %v8273_v4  ;;  %v4599_v42 = vrot.slane %v4597_v6, 5  ;;  %v6236_v4 = vld [vmem:[%s9094_s0 + $0xe0] sm:$0x1]  ;;  %v6278_v56 = vld [vmem:[%s9094_s0 + $0xd8] sm:$0xe]  ;;  %v4886_v28 = vrot.slane %v6235_v40, 5 }
 0x374   :  { %4391 = vmatmul.bf16.gmra.mxu2 %v6483_v32  ;;  %v8748_v1 = vadd.f32 %v8644_v20, %v3602_v12  ;;  %v4583_v20 = vrot.slane %v4581_v49, 5  ;;  %v6286_v12 = vrot.slane %v6278_v56, 9  ;;  %v4611_v50 = vshll.u32 %v6235_v40, 16 }
 0x375   :  { %v4685_v36 = vpack.c.b16 %v4674_v39, %v4673_v48  ;;  %v4615_v60 = vshrl.u32 %v6235_v40, 16  ;;  %v4888_v2 = vrot.slane %v4886_v28, 4  ;;  %v4889_v3 = vrot.slane %v6236_v4, 5  ;;  %v6239_v40 = vld [vmem:[%s9094_s0 + $0xec] sm:$0x1] }
 0x376   :  { %v4584_v21 = vor.u32 %v4583_v20, %v4580_v43  ;;  %v4602_v27 = vshrl.u32 %v6234_v17, 16  ;;  %v4605_v61 = vshll.u32 %v6234_v17, 16  ;;  %v3159_v8 = vadd.f32 %v9142_v44, %v9141_v57  ;;  %v6237_v17 = vld [vmem:[%s9094_s0 + $0xe4] sm:$0xf] }
 0x377   :  { %v3378_v23 = vpop.f32.mrf.mxu2  ;;  %v4613_v48 = vrot.slane %v4611_v50, 5  ;;  %v4617_v39 = vrot.slane %v4615_v60, 4  ;;  %v4887_v43 = vsel %vm6679_vm5, %v6286_v12, %v4886_v28  ;;  %v4890_v20 = vsel %vm6679_vm5, %v4888_v2, %v4889_v3 }
 0x378   :  { %v3409_v55 = vadd.f32 %v3378_v23, %v8255_v47  ;;  %v8761_v63 = vpop.f32.mrf.mxu0  ;;  %v4924_v47 = vunpack.c.l.b16 %v4880_v38  ;;  %v4585_v52 = vrot.slane %v4584_v21, 4  ;;  %v4604_v22 = vrot.slane %v4602_v27, 4 }
 0x379   :  { %v8766_v35 = vpop.f32.mrf.mxu3  ;;  %v4607_v49 = vrot.slane %v4605_v61, 5  ;;  %v4618_v25 = vor.u32 %v4617_v39, %v4613_v48  ;;  %v4927_v6 = vunpack.c.l.b16 %v4890_v20  ;;  %v4896_v3 = vrot.slane %v6239_v40, 5 }
 0x37a   :  { %v3603_v10 = vadd.f32 %v8673_v59, %v3409_v55  ;;  %v4595_v59 = vrot.slane %v4594_v31, 4  ;;  %v4935_v7 = vpack.c.b16 %v4925_v53, %v4924_v47  ;;  %v4590_v0 = vsel %vm6675_vm4, %v4585_v52, %v4589_v14  ;;  %v9143_v47 = vld [vmem:[#allocation10_spill] sm:$0xff]  ;;  %v9144_v53 = vld [vmem:[#allocation13_spill] sm:$0xff] }
 0x37b   :  { %v4675_v54 = vunpack.c.l.b16 %v4590_v0  ;;  %v4608_v38 = vor.u32 %v4607_v49, %v4604_v22  ;;  %v4926_v31 = vunpack.c.l.b16 %v4887_v43  ;;  %v4626_v27 = vshrl.u32 %v6237_v17, 16  ;;  %v9145_v22 = vld [vmem:[#allocation8_spill] sm:$0xff] }
 0x37c   :  { %v8764_v58 = vadd.f32 %v8689_v46, %v3603_v10  ;;  %v4621_v10 = vshll.u32 %v6236_v4, 16  ;;  %v6279_v4 = vld [vmem:[%s9094_s0 + $0xe4] sm:$0xe]  ;;  %v4629_v61 = vshll.u32 %v6237_v17, 16 }
 0x37d   :  { %4773 = vmatmul.bf16.gmra.mxu0 %v4685_v36  ;;  %v4609_v52 = vrot.slane %v4608_v38, 4  ;;  %v6287_v12 = vrot.slane %v6279_v4, 9  ;;  %v4645_v38 = vshll.u32 %v6239_v40, 16 }
 0x37f   :  { %v3380_v15 = vpop.f32.mrf.mxu2  ;;  %v4614_v56 = vsel %vm6675_vm4, %v4609_v52, %v4613_v48 }
 0x380   :  { %v3410_v29 = vadd.f32 %v3380_v15, %v3156_v41  ;;  %v8774_v9 = vpop.f32.mrf.mxu0  ;;  %v3161_v41 = vadd.f32 %v9144_v53, %v9143_v47  ;;  %v4677_v57 = vunpack.c.l.b16 %v4614_v56  ;;  %v9146_v47 = vld [vmem:[#allocation14_spill] sm:$0xff]  ;;  %v9147_v53 = vld [vmem:[#allocation9_spill] sm:$0xff] }
 0x381   :  { %v8792_v45 = vpop.f32.mrf.mxu3 }
 0x382   :  { %v3604_v46 = vadd.f32 %v8718_v37, %v3410_v29  ;;  %v4600_v37 = vsel %vm6675_vm4, %v4595_v59, %v4599_v42  ;;  %5027 = vmatmul.bf16.gmra.mxu3 %v4935_v7  ;;  %v4623_v59 = vrot.slane %v4621_v10, 5  ;;  %v6485_v29 = vld [vmem:[%s9094_s0 + $0xcc] sm:$0xff] }
 0x384   :  { %4396 = vmatmul.bf16.gmra.mxu2 %v6484_v24  ;;  %v8790_v32 = vadd.f32 %v8722_v62, %v3604_v46  ;;  %v4676_v62 = vunpack.c.l.b16 %v4600_v37  ;;  %v4936_v24 = vpack.c.b16 %v4927_v6, %v4926_v31  ;;  %v6238_v46 = vld [vmem:[%s9094_s0 + $0xe8] sm:$0xf] }
 0x385   :  { %v4635_v50 = vshll.u32 %v6238_v46, 16  ;;  %v4639_v60 = vshrl.u32 %v6238_v46, 16 }
 0x386   :  { %v4686_v33 = vpack.c.b16 %v4676_v62, %v4675_v54  ;;  %v4628_v54 = vrot.slane %v4626_v27, 4  ;;  %v4631_v62 = vrot.slane %v4629_v61, 5 }
 0x387   :  { %v3383_v11 = vpop.f32.mrf.mxu2 }
 0x388   :  { %v3411_v23 = vadd.f32 %v3383_v11, %v3159_v8  ;;  %v8804_v55 = vpop.f32.mrf.mxu0  ;;  %v4641_v11 = vrot.slane %v4639_v60, 4 }
 0x389   :  { %v8809_v21 = vpop.f32.mrf.mxu3 }
 0x38a   :  { %v3605_v14 = vadd.f32 %v8732_v30, %v3411_v23  ;;  %v4619_v30 = vrot.slane %v4618_v25, 4 }
 0x38c   :  { %v8807_v36 = vadd.f32 %v8750_v34, %v3605_v14  ;;  %v4624_v0 = vsel %vm6675_vm4, %v4619_v30, %v4623_v59  ;;  %v4632_v14 = vor.u32 %v4631_v62, %v4628_v54  ;;  %v4647_v30 = vrot.slane %v4645_v38, 5  ;;  %v6486_v59 = vld [vmem:[%s9094_s0 + $0xd8] sm:$0xff]  ;;  %v9151_v62 = vld [vmem:[#allocation18_spill] sm:$0xff] }
 0x38d   :  { %4778 = vmatmul.bf16.gmra.mxu0 %v4686_v33  ;;  %v4678_v44 = vunpack.c.l.b16 %v4624_v0 }
 0x38e   :  { %v4633_v18 = vrot.slane %v4632_v14, 4 }
 0x38f   :  { %v3385_v15 = vpop.f32.mrf.mxu2  ;;  %v4687_v43 = vpack.c.b16 %v4678_v44, %v4677_v57  ;;  %v6487_v57 = vld [vmem:[%s9094_s0 + $0xe4] sm:$0xff] }
 0x390   :  { %v3412_v42 = vadd.f32 %v3385_v15, %v3161_v41  ;;  %v3587_v7 = vpop.f32.mrf.mxu0  ;;  %v3166_v41 = vadd.f32 %v9147_v53, %v9146_v47  ;;  %v5093_v47 = vld [vmem:[%s9096_s2 + $0x68] sm:$0xff] }
 0x391   :  { %v3964_v28 = vpop.f32.mrf.mxu3 }
 0x392   :  { %v3606_v34 = vadd.f32 %v8761_v63, %v3412_v42  ;;  %v4893_v63 = vrot.slane %v6238_v46, 5  ;;  %5032 = vmatmul.bf16.gmra.mxu3 %v4936_v24 }
 0x394   :  { %4401 = vmatmul.bf16.gmra.mxu2 %v6485_v29  ;;  %v8831_v37 = vadd.f32 %v8766_v35, %v3606_v34  ;;  %v4895_v2 = vrot.slane %v4893_v63, 4  ;;  %v4637_v35 = vrot.slane %v4635_v50, 5  ;;  %v4894_v48 = vsel %vm6679_vm5, %v6287_v12, %v4893_v63  ;;  %v9148_v63 = vld [vmem:[#allocation15_spill] sm:$0xff] }
 0x395   :  { %v4928_v31 = vunpack.c.l.b16 %v4894_v48 }
 0x396   :  { %v4897_v39 = vsel %vm6679_vm5, %v4895_v2, %v4896_v3  ;;  %v4642_v33 = vor.u32 %v4641_v11, %v4637_v35  ;;  %v4638_v29 = vsel %vm6675_vm4, %v4633_v18, %v4637_v35  ;;  %v9149_v2 = vld [vmem:[#allocation17_spill] sm:$0xff] }
 0x397   :  { %v3388_v8 = vpop.f32.mrf.mxu2  ;;  %v4929_v6 = vunpack.c.l.b16 %v4897_v39  ;;  %v4679_v4 = vunpack.c.l.b16 %v4638_v29  ;;  %v3171_v3 = vadd.f32 %v9150_v5, %v9149_v2  ;;  %v9152_v39 = vld [vmem:[#allocation19_spill] sm:$0xff] }
 0x398   :  { %v3413_v49 = vadd.f32 %v3388_v8, %v9145_v22  ;;  %v3589_v20 = vpop.f32.mrf.mxu0  ;;  %v4643_v52 = vrot.slane %v4642_v33, 4 }
 0x399   :  { %v3966_v10 = vpop.f32.mrf.mxu3  ;;  %v4937_v42 = vpack.c.b16 %v4929_v6, %v4928_v31 }
 0x39a   :  { %v3607_v23 = vadd.f32 %v8774_v9, %v3413_v49  ;;  %v4648_v24 = vsel %vm6675_vm4, %v4643_v52, %v4647_v30 }
 0x39b   :  { %v4680_v56 = vunpack.c.l.b16 %v4648_v24 }
 0x39c   :  { %v8843_v25 = vadd.f32 %v8792_v45, %v3607_v23  ;;  %v9153_v23 = vld [vmem:[#allocation20_spill] sm:$0xff] }
 0x39d   :  { %4783 = vmatmul.bf16.gmra.mxu0 %v4687_v43  ;;  %v3176_v43 = vadd.f32 %v9153_v23, %v9152_v39 }
 0x39f   :  { %v3390_v15 = vpop.f32.mrf.mxu2 }
 0x3a0   :  { %v3414_v9 = vadd.f32 %v3390_v15, %v3166_v41  ;;  %v3592_v46 = vpop.f32.mrf.mxu0 }
 0x3a1   :  { %v3969_v40 = vpop.f32.mrf.mxu3 }
 0x3a2   :  { %v3608_v45 = vadd.f32 %v8804_v55, %v3414_v9  ;;  %5037 = vmatmul.bf16.gmra.mxu3 %v4937_v42  ;;  %v4688_v55 = vpack.c.b16 %v4680_v56, %v4679_v4  ;;  %v5092_v9 = vld [vmem:[%s9096_s2 + $0x60] sm:$0xff] }
 0x3a4   :  { %4406 = vmatmul.bf16.gmra.mxu2 %v6486_v59  ;;  %v8856_v34 = vadd.f32 %v8809_v21, %v3608_v45 }
 0x3a7   :  { %v3393_v0 = vpop.f32.mrf.mxu2 }
 0x3a8   :  { %v3415_v12 = vadd.f32 %v3393_v0, %v9148_v63  ;;  %v3594_v27 = vpop.f32.mrf.mxu0 }
 0x3a9   :  { %v3971_v60 = vpop.f32.mrf.mxu3 }
 0x3aa   :  { %v3609_v17 = vadd.f32 %v3587_v7, %v3415_v12 }
 0x3ac   :  { %v8859_v50 = vadd.f32 %v3964_v28, %v3609_v17  ;;  %v5095_v28 = vld [vmem:[%s9096_s2 + $0x78] sm:$0xff] }
 0x3ad   :  { %4788 = vmatmul.bf16.gmra.mxu0 %v4688_v55  ;;  %5096 = vmatpush.msra.mxu1 %v5095_v28 }
 0x3ae   :  { %5171 = vmatpush.msra.mxu2 %v5095_v28 }
 0x3af   :  { %v3395_v21 = vpop.f32.mrf.mxu2 }
 0x3b0   :  { %v3416_v61 = vadd.f32 %v3395_v21, %v3171_v3  ;;  %v4754_v11 = vpop.f32.mrf.mxu0 }
 0x3b1   :  { %v5003_v7 = vpop.f32.mrf.mxu3 }
 0x3b2   :  { %v3610_v44 = vadd.f32 %v3589_v20, %v3416_v61  ;;  %v5094_v20 = vld [vmem:[%s9096_s2 + $0x70] sm:$0xff] }
 0x3b3   :  { %5097 = vmatpush.msra.mxu1 %v5094_v20  ;;  %5172 = vmatpush.msra.mxu2 %v5094_v20 }
 0x3b4   :  { %4411 = vmatmul.bf16.gmra.mxu2 %v6487_v57  ;;  %v8866_v8 = vadd.f32 %v3966_v10, %v3610_v44 }
 0x3b5   :  { %5098 = vmatpush.msra.mxu1 %v5093_v47  ;;  %5173 = vmatpush.msra.mxu2 %v5093_v47 }
 0x3b7   :  { %v3398_v54 = vpop.f32.mrf.mxu2  ;;  %5099 = vmatpush.msra.mxu1 %v5092_v9  ;;  %5174 = vmatpush.msra.mxu2 %v5092_v9  ;;  %v5083_v9 = vld [vmem:[%s9096_s2 + $0x18] sm:$0xff] }
 0x3b8   :  { %v3417_v35 = vadd.f32 %v3398_v54, %v9151_v62  ;;  %v4756_v38 = vpop.f32.mrf.mxu0  ;;  %v5088_v54 = vld [vmem:[%s9096_s2 + $0x40] sm:$0xff] }
 0x3b9   :  { %v5005_v48 = vpop.f32.mrf.mxu3 }
 0x3ba   :  { %v3611_v22 = vadd.f32 %v3592_v46, %v3417_v35 }
 0x3bc   :  { %v8872_v49 = vadd.f32 %v3969_v40, %v3611_v22  ;;  %v8896_v40 = vpop.f32.mrf.mxu1 }
 0x3bf   :  { %v3400_v14 = vpop.f32.mrf.mxu2 }
 0x3c0   :  { %v3418_v33 = vadd.f32 %v3400_v14, %v3176_v43  ;;  %v4759_v15 = vpop.f32.mrf.mxu0  ;;  %v5086_v43 = vld [vmem:[%s9096_s2 + $0x30] sm:$0xff] }
 0x3c1   :  { %v5008_v6 = vpop.f32.mrf.mxu3 }
 0x3c2   :  { %v3612_v10 = vadd.f32 %v3594_v27, %v3418_v33  ;;  %v5089_v27 = vld [vmem:[%s9096_s2 + $0x48] sm:$0xff] }
 0x3c4   :  { %v8879_v31 = vadd.f32 %v3971_v60, %v3612_v10  ;;  %v4198_v2 = vpop.f32.mrf.mxu1 }
 0x3c7   :  { %v4377_v53 = vpop.f32.mrf.mxu2 }
 0x3c8   :  { %v4417_v41 = vadd.f32 %v4377_v53, %v8577_v13  ;;  %v4761_v45 = vpop.f32.mrf.mxu0  ;;  %v5091_v13 = vld [vmem:[%s9096_s2 + $0x58] sm:$0xff]  ;;  %v5084_v53 = vld [vmem:[%s9096_s2 + $0x20] sm:$0xff] }
 0x3c9   :  { %v5010_v30 = vpop.f32.mrf.mxu3  ;;  %5100 = vmatpush.msra.mxu1 %v5091_v13  ;;  %5175 = vmatpush.msra.mxu2 %v5091_v13 }
 0x3ca   :  { %v4794_v18 = vadd.f32 %v4754_v11, %v4417_v41 }
 0x3cc   :  { %v8885_v52 = vadd.f32 %v5003_v7, %v4794_v18  ;;  %v4200_v7 = vpop.f32.mrf.mxu1 }
 0x3cf   :  { %v4379_v59 = vpop.f32.mrf.mxu2 }
 0x3d0   :  { %v4418_v42 = vadd.f32 %v4379_v59, %v8615_v16  ;;  %v5090_v16 = vld [vmem:[%s9096_s2 + $0x50] sm:$0xff] }
 0x3d1   :  { %5101 = vmatpush.msra.mxu1 %v5090_v16  ;;  %5176 = vmatpush.msra.mxu2 %v5090_v16 }
 0x3d2   :  { %v4795_v29 = vadd.f32 %v4756_v38, %v4418_v42  ;;  %v5013_v46 = vpop.f32.mrf.mxu3  ;;  %v5085_v38 = vld [vmem:[%s9096_s2 + $0x28] sm:$0xff] }
 0x3d3   :  { %5102 = vmatpush.msra.mxu1 %v5089_v27  ;;  %5177 = vmatpush.msra.mxu2 %v5089_v27 }
 0x3d4   :  { %v8891_v24 = vadd.f32 %v5005_v48, %v4795_v29  ;;  %v4764_v0 = vpop.f32.mrf.mxu0  ;;  %v4203_v22 = vpop.f32.mrf.mxu1 }
 0x3d5   :  { %5103 = vmatpush.msra.mxu1 %v5088_v54  ;;  %5178 = vmatpush.msra.mxu2 %v5088_v54 }
 0x3d7   :  { %v4382_v4 = vpop.f32.mrf.mxu2 }
 0x3d8   :  { %v4419_v56 = vadd.f32 %v4382_v4, %v8698_v51 }
 0x3da   :  { %v4796_v63 = vadd.f32 %v4759_v15, %v4419_v56  ;;  %v8904_v55 = vpop.f32.mrf.mxu3  ;;  %v4228_v56 = vadd.f32 %v8896_v40, %v8748_v1 }
 0x3dc   :  { %v8899_v12 = vadd.f32 %v5008_v6, %v4796_v63  ;;  %v8907_v5 = vpop.f32.mrf.mxu0  ;;  %v4205_v20 = vpop.f32.mrf.mxu1  ;;  %v4229_v63 = vadd.f32 %v4198_v2, %v8764_v58 }
 0x3df   :  { %v4384_v17 = vpop.f32.mrf.mxu2 }
 0x3e0   :  { %v4420_v60 = vadd.f32 %v4384_v17, %v8707_v26 }
 0x3e2   :  { %v4797_v3 = vadd.f32 %v4761_v45, %v4420_v60 }
 0x3e4   :  { %v8909_v51 = vadd.f32 %v5010_v30, %v4797_v3  ;;  %v4208_v47 = vpop.f32.mrf.mxu1  ;;  %v4230_v3 = vadd.f32 %v4200_v7, %v8790_v32 }
 0x3e5   :  { %v8915_v57 = vpop.f32.mrf.mxu3  ;;  %v4233_v2 = vadd.f32 %v4208_v47, %v8843_v25  ;;  %v5081_v25 = vld [vmem:[%s9096_s2 + $0x8] sm:$0xff] }
 0x3e7   :  { %v4387_v21 = vpop.f32.mrf.mxu2 }
 0x3e8   :  { %v4421_v61 = vadd.f32 %v4387_v21, %v8726_v19  ;;  %v5087_v19 = vld [vmem:[%s9096_s2 + $0x38] sm:$0xff]  ;;  %v4231_v21 = vadd.f32 %v4203_v22, %v8807_v36 }
 0x3e9   :  { %5104 = vmatpush.msra.mxu1 %v5087_v19  ;;  %5179 = vmatpush.msra.mxu2 %v5087_v19  ;;  %v4232_v19 = vadd.f32 %v4205_v20, %v8831_v37 }
 0x3ea   :  { %v4798_v44 = vadd.f32 %v4764_v0, %v4421_v61  ;;  %v4769_v26 = vpop.f32.mrf.mxu0  ;;  %v5059_v61 = vadd.f32 %v8891_v24, %v8885_v52 }
 0x3eb   :  { %5105 = vmatpush.msra.mxu1 %v5086_v43  ;;  %5180 = vmatpush.msra.mxu2 %v5086_v43 }
 0x3ec   :  { %v8917_v28 = vadd.f32 %v5013_v46, %v4798_v44  ;;  %v4210_v30 = vpop.f32.mrf.mxu1  ;;  %v5082_v46 = vld [vmem:[%s9096_s2 + $0x10] sm:$0xff]  ;;  %v5060_v1 = vadd.f32 %v5059_v61, %v8899_v12 }
 0x3ed   :  { %v8922_v11 = vpop.f32.mrf.mxu3  ;;  %5106 = vmatpush.msra.mxu1 %v5085_v38  ;;  %5181 = vmatpush.msra.mxu2 %v5085_v38 }
 0x3ee   :  { %v5061_v32 = vadd.f32 %v5060_v1, %v8909_v51 }
 0x3ef   :  { %v4389_v62 = vpop.f32.mrf.mxu2  ;;  %5107 = vmatpush.msra.mxu1 %v5084_v53  ;;  %5182 = vmatpush.msra.mxu2 %v5084_v53 }
 0x3f0   :  { %v4422_v16 = vadd.f32 %v4389_v62, %v4228_v56  ;;  %v5062_v37 = vadd.f32 %v5061_v32, %v8917_v28 }
 0x3f1   :  { %5108 = vmatpush.msra.mxu1 %v5083_v9  ;;  %5183 = vmatpush.msra.mxu2 %v5083_v9 }
 0x3f2   :  { %v4771_v35 = vpop.f32.mrf.mxu0  ;;  %v4799_v44 = vadd.f32 %v8907_v5, %v4422_v16 }
 0x3f3   :  { %5109 = vmatpush.msra.mxu1 %v5082_v46  ;;  %5184 = vmatpush.msra.mxu2 %v5082_v46 }
 0x3f4   :  { %v4213_v29 = vpop.f32.mrf.mxu1  ;;  %v8965_v7 = vadd.f32 %v8904_v55, %v4799_v44  ;;  %v5080_v55 = vld [vmem:[%s9096_s2] sm:$0xff] }
 0x3f5   :  { %v8927_v23 = vpop.f32.mrf.mxu3  ;;  %5110 = vmatpush.msra.mxu1 %v5081_v25  ;;  %5185 = vmatpush.msra.mxu2 %v5081_v25 }
 0x3f6   :  { %v5063_v38 = vadd.f32 %v5062_v37, %v8965_v7 }
 0x3f7   :  { %v4392_v48 = vpop.f32.mrf.mxu2  ;;  %5111 = vmatpush.msra.mxu1 %v5080_v55  ;;  %5186 = vmatpush.msra.mxu2 %v5080_v55 }
 0x3f8   :  { %v4423_v27 = vadd.f32 %v4392_v48, %v4229_v63  ;;  %v4234_v48 = vadd.f32 %v4210_v30, %v8856_v34 }
 0x3fa   :  { %v4774_v39 = vpop.f32.mrf.mxu0  ;;  %v4800_v40 = vadd.f32 %v4769_v26, %v4423_v27 }
 0x3fc   :  { %v4215_v17 = vpop.f32.mrf.mxu1  ;;  %v8970_v20 = vadd.f32 %v8915_v57, %v4800_v40 }
 0x3fd   :  { %v8937_v6 = vpop.f32.mrf.mxu3  ;;  %v4236_v47 = vadd.f32 %v4215_v17, %v8866_v8 }
 0x3fe   :  { %v5064_v53 = vadd.f32 %v5063_v38, %v8970_v20 }
 0x3ff   :  { %v4394_v14 = vpop.f32.mrf.mxu2 }
 0x400   :  { %v4424_v54 = vadd.f32 %v4394_v14, %v4230_v3 }
 0x402   :  { %v8932_v33 = vpop.f32.mrf.mxu0  ;;  %v4801_v36 = vadd.f32 %v4771_v35, %v4424_v54  ;;  %v4235_v35 = vadd.f32 %v4213_v29, %v8859_v50 }
 0x404   :  { %v4218_v34 = vpop.f32.mrf.mxu1  ;;  %v8981_v57 = vadd.f32 %v8922_v11, %v4801_v36 }
 0x405   :  { %v8942_v18 = vpop.f32.mrf.mxu3  ;;  %v4237_v9 = vadd.f32 %v4218_v34, %v8872_v49 }
 0x407   :  { %v4397_v10 = vpop.f32.mrf.mxu2 }
 0x408   :  { %v4425_v58 = vadd.f32 %v4397_v10, %v4231_v21 }
 0x40a   :  { %v4779_v15 = vpop.f32.mrf.mxu0  ;;  %v4802_v26 = vadd.f32 %v4774_v39, %v4425_v58 }
 0x40c   :  { %v4220_v49 = vpop.f32.mrf.mxu1 }
 0x40d   :  { %v8947_v45 = vpop.f32.mrf.mxu3 }
 0x40f   :  { %v4399_v41 = vpop.f32.mrf.mxu2 }
 0x410   :  { %v4426_v22 = vadd.f32 %v4399_v41, %v4232_v19  ;;  %v8987_v41 = vadd.f32 %v8927_v23, %v4802_v26 }
 0x412   :  { %v4781_v42 = vpop.f32.mrf.mxu0  ;;  %v4803_v39 = vadd.f32 %v8932_v33, %v4426_v22 }
 0x414   :  { %v5052_v11 = vadd.f32 %v8937_v6, %v4803_v39  ;;  %v4238_v6 = vadd.f32 %v4220_v49, %v8879_v31 }
 0x415   :  { %v5033_v0 = vpop.f32.mrf.mxu3 }
 0x417   :  { %v4402_v59 = vpop.f32.mrf.mxu2 }
 0x418   :  { %v4427_v14 = vadd.f32 %v4402_v59, %v4233_v2  ;;  %v5065_v59 = vadd.f32 %v5064_v53, %v8981_v57 }
 0x41a   :  { %v4784_v4 = vpop.f32.mrf.mxu0  ;;  %v4804_v50 = vadd.f32 %v4779_v15, %v4427_v14  ;;  %v5066_v8 = vadd.f32 %v5065_v59, %v8987_v41 }
 0x41c   :  { %v5053_v56 = vadd.f32 %v8942_v18, %v4804_v50  ;;  %v5067_v17 = vadd.f32 %v5066_v8, %v5052_v11 }
 0x41d   :  { %v5035_v5 = vpop.f32.mrf.mxu3 }
 0x41e   :  { %v5068_v3 = vadd.f32 %v5067_v17, %v5053_v56 }
 0x41f   :  { %v4404_v13 = vpop.f32.mrf.mxu2 }
 0x420   :  { %v4428_v10 = vadd.f32 %v4404_v13, %v4234_v48 }
 0x422   :  { %v4786_v62 = vpop.f32.mrf.mxu0  ;;  %v4805_v29 = vadd.f32 %v4781_v42, %v4428_v10 }
 0x424   :  { %v5054_v15 = vadd.f32 %v8947_v45, %v4805_v29 }
 0x425   :  { %v5038_v23 = vpop.f32.mrf.mxu3 }
 0x426   :  { %v5069_v42 = vadd.f32 %v5068_v3, %v5054_v15 }
 0x427   :  { %v4407_v60 = vpop.f32.mrf.mxu2 }
 0x428   :  { %v4429_v30 = vadd.f32 %v4407_v60, %v4235_v35 }
 0x42a   :  { %v4789_v46 = vpop.f32.mrf.mxu0  ;;  %v4806_v63 = vadd.f32 %v4784_v4, %v4429_v30 }
 0x42c   :  { %v5055_v27 = vadd.f32 %v5033_v0, %v4806_v63 }
 0x42d   :  { %v5040_v58 = vpop.f32.mrf.mxu3 }
 0x42e   :  { %v5070_v54 = vadd.f32 %v5069_v42, %v5055_v27 }
 0x42f   :  { %v4409_v43 = vpop.f32.mrf.mxu2 }
 0x430   :  { %v4430_v33 = vadd.f32 %v4409_v43, %v4236_v47 }
 0x432   :  { %v4807_v60 = vadd.f32 %v4786_v62, %v4430_v33  ;;  %v4791_v18 = vpop.f32.mrf.mxu0 }
 0x434   :  { %v5056_v61 = vadd.f32 %v5035_v5, %v4807_v60 }
 0x436   :  { %v5071_v4 = vadd.f32 %v5070_v54, %v5056_v61 }
 0x437   :  { %v4412_v13 = vpop.f32.mrf.mxu2 }
 0x438   :  { %v4431_v16 = vadd.f32 %v4412_v13, %v4237_v9 }
 0x43a   :  { %v4808_v21 = vadd.f32 %v4789_v46, %v4431_v16 }
 0x43c   :  { %v5057_v19 = vadd.f32 %v5038_v23, %v4808_v21 }
 0x43e   :  { %v5072_v2 = vadd.f32 %v5071_v4, %v5057_v19 }
 0x43f   :  { %v4414_v44 = vpop.f32.mrf.mxu2 }
 0x440   :  { %v4432_v1 = vadd.f32 %v4414_v44, %v4238_v6 }
 0x442   :  { %v4809_v40 = vadd.f32 %v4791_v18, %v4432_v1 }
 0x444   :  { %v5058_v32 = vadd.f32 %v5040_v58, %v4809_v40 }
 0x446   :  { %v5073_v45 = vadd.f32 %v5072_v2, %v5058_v32 }
 0x448   :  { %v5074_v62 = vrot.slane %v5073_v45, 4 }
 0x44a   :  { %v5075_v36 = vadd.f32 %v5074_v62, %v5073_v45 }
 0x44c   :  { %v5076_v22 = vrot.slane %v5075_v36, 2 }
 0x44e   :  { %v5077_v0 = vadd.f32 %v5076_v22, %v5075_v36 }
 0x450   :  { %v5078_v48 = vrot.slane %v5077_v0, 1 }
 0x452   :  { %v5079_v43 = vadd.f32 %v5078_v48, %v5077_v0 }
 0x454   :  { %5112 = vmatmul.f32.vlgmr.msra.gmra.mxu1 %v5079_v43 }
 0x4d1   :  { %v5113_v31 = vpop.f32.mrf.mxu1 }
 0x4d2   :  { %v5116_v5 = vmul.f32 0.00024414063, %v5113_v31  ;;  %v5192_v31 = vld [vmem:[%s9097_s3] sm:$0x1]  ;;  %s6601_s3 = smov [#allocation5]  }
 0x4d4   :  { %v5117_v37 = vperm.slane %v5116_v5, 0 }
 0x4d6   :  { %v8997_v26 = vsub.f32 %v8885_v52, %v5117_v37  ;;  %v9000_v14 = vsub.f32 %v8891_v24, %v5117_v37  ;;  %v9003_v25 = vsub.f32 %v8899_v12, %v5117_v37  ;;  %v9010_v34 = vsub.f32 %v8909_v51, %v5117_v37 }
 0x4d7   :  { %v9013_v38 = vsub.f32 %v8917_v28, %v5117_v37  ;;  %v9018_v39 = vsub.f32 %v8965_v7, %v5117_v37  ;;  %v9023_v47 = vsub.f32 %v8970_v20, %v5117_v37  ;;  %v9028_v28 = vsub.f32 %v8981_v57, %v5117_v37 }
 0x4d8   :  { %v5134_v55 = vmul.f32 %v8997_v26, %v8997_v26  ;;  %v5135_v35 = vmul.f32 %v9000_v14, %v9000_v14  ;;  %v5136_v52 = vmul.f32 %v9003_v25, %v9003_v25  ;;  %v5137_v12 = vmul.f32 %v9010_v34, %v9010_v34 }
 0x4d9   :  { %v5138_v51 = vmul.f32 %v9013_v38, %v9013_v38  ;;  %v5139_v50 = vmul.f32 %v9018_v39, %v9018_v39  ;;  %v9033_v7 = vsub.f32 %v8987_v41, %v5117_v37  ;;  %v5140_v9 = vmul.f32 %v9023_v47, %v9023_v47 }
 0x4da   :  { %v5150_v24 = vadd.f32 %v5135_v35, %v5134_v55  ;;  %v9037_v20 = vsub.f32 %v5052_v11, %v5117_v37  ;;  %v5141_v29 = vmul.f32 %v9028_v28, %v9028_v28  ;;  %v9041_v46 = vsub.f32 %v5053_v56, %v5117_v37 }
 0x4db   :  { %v5142_v57 = vmul.f32 %v9033_v7, %v9033_v7  ;;  %v9045_v8 = vsub.f32 %v5054_v15, %v5117_v37  ;;  %v9049_v16 = vsub.f32 %v5055_v27, %v5117_v37  ;;  %v9053_v17 = vsub.f32 %v5056_v61, %v5117_v37 }
 0x4dc   :  { %v5151_v10 = vadd.f32 %v5150_v24, %v5136_v52  ;;  %v5143_v41 = vmul.f32 %v9037_v20, %v9037_v20  ;;  %v5144_v11 = vmul.f32 %v9041_v46, %v9041_v46  ;;  %v9057_v49 = vsub.f32 %v5057_v19, %v5117_v37 }
 0x4dd   :  { %v5145_v56 = vmul.f32 %v9045_v8, %v9045_v8  ;;  %v5146_v15 = vmul.f32 %v9049_v16, %v9049_v16  ;;  %v9061_v21 = vsub.f32 %v5058_v32, %v5117_v37  ;;  %v5147_v27 = vmul.f32 %v9053_v17, %v9053_v17 }
 0x4de   :  { %v5152_v53 = vadd.f32 %v5151_v10, %v5137_v12  ;;  %v5148_v42 = vmul.f32 %v9057_v49, %v9057_v49  ;;  %v6535_v10 = vld [vmem:[%s9098_s4] ss:$0 sm:$0xff]  ;;  %s5265_s4 = sshll.u32 %s6601_s3, 4  ;;  %s5266_s4 = int_to_ptr.vmem [resolvable:$true] %s5265_s4 }
 0x4df   :  { %v5149_v44 = vmul.f32 %v9061_v21, %v9061_v21 }
 0x4e0   :  { %v5153_v30 = vadd.f32 %v5152_v53, %v5138_v51 }
 0x4e2   :  { %v5154_v59 = vadd.f32 %v5153_v30, %v5139_v50 }
 0x4e4   :  { %v5155_v33 = vadd.f32 %v5154_v59, %v5140_v9 }
 0x4e6   :  { %v5156_v13 = vadd.f32 %v5155_v33, %v5141_v29 }
 0x4e8   :  { %v5157_v63 = vadd.f32 %v5156_v13, %v5142_v57 }
 0x4ea   :  { %v5158_v23 = vadd.f32 %v5157_v63, %v5143_v41 }
 0x4ec   :  { %v5159_v60 = vadd.f32 %v5158_v23, %v5144_v11 }
 0x4ee   :  { %v5160_v3 = vadd.f32 %v5159_v60, %v5145_v56 }
 0x4f0   :  { %v5161_v6 = vadd.f32 %v5160_v3, %v5146_v15 }
 0x4f2   :  { %v5162_v61 = vadd.f32 %v5161_v6, %v5147_v27 }
 0x4f4   :  { %v5163_v54 = vadd.f32 %v5162_v61, %v5148_v42 }
 0x4f6   :  { %v5164_v19 = vadd.f32 %v5163_v54, %v5149_v44 }
 0x4f8   :  { %v5165_v1 = vrot.slane %v5164_v19, 4 }
 0x4fa   :  { %v5166_v18 = vadd.f32 %v5165_v1, %v5164_v19 }
 0x4fc   :  { %v5167_v4 = vrot.slane %v5166_v18, 2 }
 0x4fe   :  { %v5168_v40 = vadd.f32 %v5167_v4, %v5166_v18 }
 0x500   :  { %v5169_v58 = vrot.slane %v5168_v40, 1 }
 0x502   :  { %v5170_v2 = vadd.f32 %v5169_v58, %v5168_v40 }
 0x504   :  { %5187 = vmatmul.f32.vlgmr.msra.gmra.mxu2 %v5170_v2 }
 0x587   :  { %v5188_v32 = vpop.f32.mrf.mxu2 }
 0x588   :  { %v5191_v45 = vmul.f32 0.00024414063, %v5188_v32 }
 0x58a   :  { %v5193_v62 = vadd.f32 1e-05, %v5191_v45 }
 0x58c   :  { %6538 = vrsqrt.f32 %v5193_v62  ;;  %vm5200_vm10 = vweird.f32 %v5193_v62 }
 0x592   :  { %v6539_v36 = vpop.eup %6538 }
 0x593   :  { %v5195_v22 = vmul.f32 %v6539_v36, %v5193_v62  ;;  %vm5201_vm9 = vweird.f32 %v6539_v36 }
 0x594   :  { %vm5202_vm11 = vmor %vm5200_vm10, %vm5201_vm9 }
 0x595   :  { %v5196_v0 = vmul.f32 %v6539_v36, %v5195_v22 }
 0x597   :  { %v5197_v48 = vmul.f32 0.5, %v5196_v0 }
 0x599   :  { %v5198_v43 = vsub.f32 1.5, %v5197_v48 }
 0x59b   :  { %v5199_v5 = vmul.f32 %v6539_v36, %v5198_v43 }
 0x59d   :  { %v5203_v37 = vsel %vm5202_vm11, %v6539_v36, %v5199_v5 }
 0x59e   :  { %v5204_v55 = vmul.f32 %v5203_v37, %v5192_v31 }
 0x5a0   :  { %v5206_v35 = vperm.slane %v5204_v55, 0 }
 0x5a2   :  { %v5208_v52 = vmul.f32 %v5206_v35, %v8997_v26  ;;  %v5209_v24 = vmul.f32 %v5206_v35, %v9000_v14  ;;  %v5210_v12 = vmul.f32 %v5206_v35, %v9003_v25  ;;  %v5211_v51 = vmul.f32 %v5206_v35, %v9010_v34 }
 0x5a3   :  { %v5212_v53 = vmul.f32 %v5206_v35, %v9013_v38  ;;  %v5213_v50 = vmul.f32 %v5206_v35, %v9018_v39  ;;  %v5214_v30 = vmul.f32 %v5206_v35, %v9023_v47  ;;  %v5215_v26 = vmul.f32 %v5206_v35, %v9028_v28 }
 0x5a4   :  { %v5228_v9 = vadd.f32 %v6535_v10, %v5208_v52  ;;  %v5229_v59 = vadd.f32 %v6535_v10, %v5209_v24  ;;  %v5230_v29 = vadd.f32 %v6535_v10, %v5210_v12  ;;  %v5231_v14 = vadd.f32 %v6535_v10, %v5211_v51 }
 0x5a5   :  { %v5216_v25 = vmul.f32 %v5206_v35, %v9033_v7  ;;  %v5232_v33 = vadd.f32 %v6535_v10, %v5212_v53  ;;  %v5217_v57 = vmul.f32 %v5206_v35, %v9037_v20  ;;  %v5233_v13 = vadd.f32 %v6535_v10, %v5213_v50 }
 0x5a6   :  { %5245 = vst [vmem:[#allocation5 + $0x80] sm:$0xff] %v5228_v9  ;;  %v5218_v34 = vmul.f32 %v5206_v35, %v9041_v46  ;;  %v5234_v38 = vadd.f32 %v6535_v10, %v5214_v30  ;;  %v5219_v39 = vmul.f32 %v5206_v35, %v9045_v8  ;;  %v5235_v47 = vadd.f32 %v6535_v10, %v5215_v26 }
 0x5a7   :  { %5246 = vst [vmem:[#allocation5 + $0x88] sm:$0xff] %v5229_v59  ;;  %v5220_v41 = vmul.f32 %v5206_v35, %v9049_v16  ;;  %v5236_v28 = vadd.f32 %v6535_v10, %v5216_v25  ;;  %v5221_v7 = vmul.f32 %v5206_v35, %v9053_v17  ;;  %v5237_v63 = vadd.f32 %v6535_v10, %v5217_v57 }
 0x5a8   :  { %5247 = vst [vmem:[#allocation5 + $0x90] sm:$0xff] %v5230_v29  ;;  %v5222_v20 = vmul.f32 %v5206_v35, %v9057_v49  ;;  %v5238_v11 = vadd.f32 %v6535_v10, %v5218_v34  ;;  %v5223_v46 = vmul.f32 %v5206_v35, %v9061_v21  ;;  %v5239_v23 = vadd.f32 %v6535_v10, %v5219_v39 }
 0x5a9   :  { %5248 = vst [vmem:[#allocation5 + $0x98] sm:$0xff] %v5231_v14  ;;  %v5240_v56 = vadd.f32 %v6535_v10, %v5220_v41  ;;  %v5241_v8 = vadd.f32 %v6535_v10, %v5221_v7 }
 0x5aa   :  { %5249 = vst [vmem:[#allocation5 + $0xa0] sm:$0xff] %v5232_v33  ;;  %v5242_v16 = vadd.f32 %v6535_v10, %v5222_v20  ;;  %v5243_v17 = vadd.f32 %v6535_v10, %v5223_v46 }
 0x5ab   :  { %5250 = vst [vmem:[#allocation5 + $0xa8] sm:$0xff] %v5233_v13 }
 0x5ac   :  { %5251 = vst [vmem:[#allocation5 + $0xb0] sm:$0xff] %v5234_v38 }
 0x5ad   :  { %5252 = vst [vmem:[#allocation5 + $0xb8] sm:$0xff] %v5235_v47 }
 0x5ae   :  { %5253 = vst [vmem:[#allocation5 + $0xc0] sm:$0xff] %v5236_v28 }
 0x5af   :  { %5254 = vst [vmem:[#allocation5 + $0xc8] sm:$0xff] %v5237_v63 }
 0x5b0   :  { %5255 = vst [vmem:[#allocation5 + $0xd0] sm:$0xff] %v5238_v11 }
 0x5b1   :  { %5256 = vst [vmem:[#allocation5 + $0xd8] sm:$0xff] %v5239_v23 }
 0x5b2   :  { %5257 = vst [vmem:[#allocation5 + $0xe0] sm:$0xff] %v5240_v56 }
 0x5b3   :  { %5258 = vst [vmem:[#allocation5 + $0xe8] sm:$0xff] %v5241_v8 }
 0x5b4   :  { %5259 = vst [vmem:[#allocation5 + $0xf0] sm:$0xff] %v5242_v16 }
 0x5b5   :  { %5260 = vst [vmem:[#allocation5 + $0xf8] sm:$0xff] %v5243_v17 }
 0x5b6   :  { %5273 = dma.vmem_to_hbm [thread:$0]  %s5266_s4, 4096, %s5268_s16, [#allocation4], %s6602_s17, %s6602_s17, %s6603_s18  }
 0x5b7   :  { %6596 = dma.done.wait [#allocation4], 4096  }
 0x5b8   :  { %6597 = vsyncadd [#allocation4], 4294963200 }
 0x5b9   :  { %5278 = vsyncpa [#allocation3], 1 }
 0x5ba   :  { %5279 = vsyncpa [#allocation4], 1 }

</bundles_post_ra>
